<compile_context>
chip_gen: v7x
topology: tpu7x:2x2x1
jax: 0.10.0
libtpu: 0.0.40
codegen_flags: <defaults>
</compile_context>

<pallas_src>
import functools

import jax
import jax.numpy as jnp
import numpy as np
from jax import lax
from jax.experimental import pallas as pl
from jax.experimental.pallas import tpu as pltpu


def _silu(x):
    # Exact SiLU = x * sigmoid(x).  The kernel is MXU-push-bound, so the exact
    # reciprocal's extra cost is hidden; this removes the approx-recip drift.
    return x * pl.reciprocal(1.0 + jnp.exp(-x))


def _two_fdis_kernel(x_ref, w1_ref, b1_ref, w2_ref, b2_ref, ow_ref, ob_ref,
                     out_ref, y_sc, *, N, H, F):
    FH = F * H                       # folded feature width (lane-dense)
    BB, Rr, _ = x_ref.shape          # Rr = N * (N // F)
    Mr = BB * Rr

    x2 = x_ref[...].astype(jnp.float32).reshape(Mr, FH)   # outer-dim merge only

    # Fused layer-1: one (Mr, FH) x (FH, 3*FH) dot, branch-major columns.
    h1 = _silu(jnp.dot(x2, w1_ref[...], preferred_element_type=jnp.float32)
               + b1_ref[...])

    # Layer-2 split into three (Mr, FH) x (FH, FH) dots (block-diag fusion
    # wastes MXU passes once 3*FH exceeds one MXU tile); slices of h1 are
    # 128-aligned lane slices.
    def branch(l):
        hb = h1[:, l * FH:(l + 1) * FH]
        return _silu(jnp.dot(hb, w2_ref[l], preferred_element_type=jnp.float32)
                     + b2_ref[l])

    s_f, k0_f, k1_f = branch(0), branch(1), branch(2)

    # Contraction: m[b,i,j,h] = sum_k k0[b,i,k,h] * k1[b,k,j,h]
    if F > 1:
        # Fully folded (F == N): rows = (b, i), lanes = (j, h).  Loop over k
        # with lane-dense VPU FMAs; the accumulator is just (BB, N, N*H) and
        # no minor-dim-splitting reshapes are needed.
        k1_3 = k1_f.reshape(BB, N, FH)                 # outer split only
        m_3 = jnp.zeros((BB, N, FH), jnp.float32)
        for k in range(N):                             # N <= 512 // H here
            a_k = k0_f[:, k * H:(k + 1) * H]           # (Mr, H) static lane slice
            a_k = jnp.concatenate([a_k] * N, axis=-1)  # (Mr, N*H): repeat over j
            m_3 = m_3 + a_k.reshape(BB, N, FH) * k1_3[:, k, :][:, None, :]
        y_f = s_f * m_3.reshape(Mr, FH)                # gating, lane-dense
    else:
        # Unfolded path (H % 128 == 0 or unfoldable): rows = (b, i, j), minor = H.
        # Reshapes below only split outer dims (H stays minor).  Gated rows are
        # written into a VMEM scratch to bound live ranges.
        k0_4 = k0_f.reshape(BB, N, N, H)
        k1_4 = k1_f.reshape(BB, N, N, H)
        s_4 = s_f.reshape(BB, N, N, H)

        def row_i(i):
            a_i = lax.dynamic_index_in_dim(k0_4, i, axis=1, keepdims=False)
            s_i = lax.dynamic_index_in_dim(s_4, i, axis=1, keepdims=False)
            m_i = jnp.sum(a_i[:, :, None, :] * k1_4, axis=1)   # (BB, N, H)
            y_sc[:, pl.ds(i * N, N), :] = s_i * m_i

        if N <= 16:
            for i in range(N):                # short, unrolled (LLO visibility)
                row_i(i)
        else:
            @pl.loop(0, N)                    # bounded live ranges for large N
            def _(i):
                row_i(i)
        y_f = y_sc[...].reshape(Mr, FH)

    # output_lin: Linear -> SiLU -> Linear -> SiLU -> Linear, then residual add.
    h = y_f
    for l in range(3):
        h = jnp.dot(h, ow_ref[l], preferred_element_type=jnp.float32) + ob_ref[l]
        if l < 2:
            h = _silu(h)

    out_ref[...] = (h + y_f).reshape(BB, Rr, FH).astype(out_ref.dtype)


def _round_up(x, m):
    return (x + m - 1) // m * m


def _pick_fold(N, H):
    """Fold the whole j axis into the feature dim when it makes the minor dim a
    multiple of 128 and the kron weights stay small; otherwise no folding."""
    if H % 128 == 0:
        return 1                    # already lane-dense; folding only adds zeros
    if (N * H) % 128 == 0 and N * H <= 512:
        return N
    return 1                        # TODO(synk): intermediate fold factors


def _vmem_capacity_bytes():
    try:
        return int(pltpu.get_tpu_info().vmem_capacity_bytes)
    except Exception:               # pragma: no cover - conservative fallback
        return 64 * 2 ** 20         # v7x-sized


def _pick_batch_tile(B, N, H, F, weight_bytes):
    """Batch rows per grid step.  Padding-aware (lanes padded to 128, sublanes
    to 8) and generation-aware (v5e/v6e 128 MiB vs v7x 64 MiB VMEM); prefers an
    even number of grid steps so v7x's two TensorCores both get work."""
    FH = F * H
    Rr = N * (N // F)
    lanes = _round_up(FH, 128)
    rows = _round_up(Rr, 8)
    # ~20 live f32 activation slabs per batch element + double-buffered I/O tiles.
    per_b = 4 * rows * lanes * 20 + 4 * rows * lanes * 4
    cap = _vmem_capacity_bytes()
    budget = max(int(cap * 0.55) - 2 * weight_bytes, 4 * 2 ** 20)
    max_bb = max(1, budget // per_b)
    cands = [d for d in range(1, B + 1) if B % d == 0 and d <= max_bb]
    even = [d for d in cands if (B // d) % 2 == 0]
    return max(even) if even else max(cands)


def two_fdis_forward(kemb, ew, eb, ow, ob):
    """kemb: (B, N, N, H).  Weights stored (in, out):
       ew: (3, 2, H, H), eb: (3, 2, 1, H)  -- three 2-layer emb MLPs
       ow: (3, H, H),    ob: (3, 1, H)     -- 3-layer output MLP."""
    B, N, _, H = kemb.shape
    dtype = kemb.dtype

    F = _pick_fold(N, H)
    assert F == 1 or F == N
    FH = F * H
    Rr = N * (N // F)

    # Fold weights with kron(I_F, W) (block-diagonal over the merged j axis).
    wdt = jnp.float32
    eye = jnp.eye(F, dtype=wdt)
    fold_w = (lambda w: jnp.kron(eye, w.astype(wdt))) if F > 1 else (
        lambda w: w.astype(wdt))
    fold_b = lambda b: jnp.tile(b.astype(wdt), (1, F))

    w1 = jnp.concatenate([fold_w(ew[i, 0]) for i in range(3)], axis=1)  # (FH, 3FH)
    b1 = jnp.concatenate([fold_b(eb[i, 0]) for i in range(3)], axis=1)  # (1, 3FH)
    w2 = jnp.stack([fold_w(ew[i, 1]) for i in range(3)])                # (3, FH, FH)
    b2 = jnp.stack([fold_b(eb[i, 1]) for i in range(3)])                # (3, 1, FH)
    owf = jnp.stack([fold_w(ow[l]) for l in range(3)])                  # (3, FH, FH)
    obf = jnp.stack([fold_b(ob[l]) for l in range(3)])                  # (3, 1, FH)

    weight_bytes = 4 * int(w1.size + b1.size + w2.size + b2.size
                           + owf.size + obf.size)

    # Lane-dense I/O layout: minor dim FH (256 at the test shape).
    x_f = kemb.reshape(B, Rr, FH)

    BB = _pick_batch_tile(B, N, H, F, weight_bytes)
    grid = (B // BB,)

    lanes = _round_up(FH, 128)
    rows = _round_up(Rr, 8)
    est = weight_bytes + 4 * BB * rows * lanes * 24
    cap = _vmem_capacity_bytes()
    vmem_limit = int(min(0.7 * cap, max(32 * 2 ** 20, 2 * est)))

    cost = pl.CostEstimate(
        flops=int(2 * B * N * N * (9 * H * H + N * H)),
        transcendentals=int(8 * B * N * N * H),
        bytes_accessed=int(4 * 2 * B * N * N * H + weight_bytes))

    kernel = functools.partial(_two_fdis_kernel, N=N, H=H, F=F)

    out_f = pl.pallas_call(
        kernel,
        out_shape=jax.ShapeDtypeStruct((B, Rr, FH), dtype),
        grid=grid,
        in_specs=[
            pl.BlockSpec((BB, Rr, FH), lambda b: (b, 0, 0)),   # kemb tile
            pl.BlockSpec(w1.shape, lambda b: (0, 0)),
            pl.BlockSpec(b1.shape, lambda b: (0, 0)),
            pl.BlockSpec(w2.shape, lambda b: (0, 0, 0)),
            pl.BlockSpec(b2.shape, lambda b: (0, 0, 0)),
            pl.BlockSpec(owf.shape, lambda b: (0, 0, 0)),
            pl.BlockSpec(obf.shape, lambda b: (0, 0, 0)),
        ],
        out_specs=pl.BlockSpec((BB, Rr, FH), lambda b: (b, 0, 0)),
        # y scratch; only touched on the unfolded (F == 1) path, tiny otherwise.
        scratch_shapes=[pltpu.VMEM((BB, Rr, FH), jnp.float32)],
        compiler_params=pltpu.CompilerParams(
            dimension_semantics=("parallel",),
            vmem_limit_bytes=vmem_limit),
        cost_estimate=cost,
    )(x_f, w1, b1, w2, b2, owf, obf)

    return out_f.reshape(B, N, N, H)


def reference_forward(kemb, ew, eb, ow, ob):
    """Pure-JAX reference mirroring the PyTorch module semantics."""
    def mlp(x, ws, bs, n_layers, final_act):
        h = x
        for l in range(n_layers):
            h = jnp.einsum("...i,io->...o", h, ws[l]) + bs[l]
            if l < n_layers - 1 or final_act:
                h = h * jax.nn.sigmoid(h)
        return h

    self_msg = mlp(kemb, ew[0], eb[0], 2, True)
    k0 = mlp(kemb, ew[1], eb[1], 2, True)
    k1 = mlp(kemb, ew[2], eb[2], 2, True)
    # (B,N,N,H) permuted to (B,H,N,N), matmul, permute back == this einsum:
    m = jnp.einsum("bikh,bkjh->bijh", k0, k1)
    x = self_msg * m
    return mlp(x, ow, ob, 3, False) + x


if __name__ == "__main__":
    B, N, H = 2, 8, 32
    key = jax.random.PRNGKey(0)
    k_in, k_ew, k_eb, k_ow, k_ob = jax.random.split(key, 5)

    kemb = jax.random.normal(k_in, (B, N, N, H), jnp.float32) * 0.5
    scale = 1.0 / np.sqrt(H)
    # emb_lins: 3 branches x 2 Linear(H, H) layers; weights stored as (in, out)
    ew = jax.random.normal(k_ew, (3, 2, H, H), jnp.float32) * scale
    eb = jax.random.normal(k_eb, (3, 2, 1, H), jnp.float32) * 0.1
    # output_lin: 3 Linear(H, H) layers
    ow = jax.random.normal(k_ow, (3, H, H), jnp.float32) * scale
    ob = jax.random.normal(k_ob, (3, 1, H), jnp.float32) * 0.1

    out = jax.block_until_ready(two_fdis_forward(kemb, ew, eb, ow, ob))
    expected = jax.block_until_ready(reference_forward(kemb, ew, eb, ow, ob))

    # Both kernel and reference run matmuls at default (bf16-rounded) MXU
    # precision; SiLU in the kernel is exact, so the tolerance mostly absorbs
    # MXU rounding.  TODO(synk): validate once against a CPU float64 baseline.
    np.testing.assert_allclose(np.asarray(out), np.asarray(expected),
                               rtol=2e-2, atol=2e-2)
    print("KERNEL_OK")
</pallas_src>

<mosaic_0001>
module attributes {stable_mosaic.version = 11 : i64} {
  func.func @_two_fdis_kernel(%arg0: i32, %arg1: memref<1x8x256xf32, #tpu.memory_space<vmem>>, %arg2: memref<256x768xf32, #tpu.memory_space<vmem>>, %arg3: memref<1x768xf32, #tpu.memory_space<vmem>>, %arg4: memref<3x256x256xf32, #tpu.memory_space<vmem>>, %arg5: memref<3x1x256xf32, #tpu.memory_space<vmem>>, %arg6: memref<3x256x256xf32, #tpu.memory_space<vmem>>, %arg7: memref<3x1x256xf32, #tpu.memory_space<vmem>>, %arg8: memref<1x8x256xf32, #tpu.memory_space<vmem>>, %arg9: memref<1x8x256xf32, #tpu.memory_space<vmem>>) attributes {dimension_semantics = [#tpu.dimension_semantics<parallel>], iteration_bounds = array<i64: 2>, scalar_prefetch = 0 : i64, scratch_operands = 1 : i64, tpu.core_type = #tpu.core_type<tc>, window_params = [{transform_indices = @transform_0, window_bounds = array<i64: 1, 8, 256>}, {pipeline_mode = #tpu.pipeline_mode<synchronous>, transform_indices = @transform_1, window_bounds = array<i64: 256, 768>}, {pipeline_mode = #tpu.pipeline_mode<synchronous>, transform_indices = @transform_2, window_bounds = array<i64: 1, 768>}, {pipeline_mode = #tpu.pipeline_mode<synchronous>, transform_indices = @transform_3, window_bounds = array<i64: 3, 256, 256>}, {pipeline_mode = #tpu.pipeline_mode<synchronous>, transform_indices = @transform_4, window_bounds = array<i64: 3, 1, 256>}, {pipeline_mode = #tpu.pipeline_mode<synchronous>, transform_indices = @transform_5, window_bounds = array<i64: 3, 256, 256>}, {pipeline_mode = #tpu.pipeline_mode<synchronous>, transform_indices = @transform_6, window_bounds = array<i64: 3, 1, 256>}, {transform_indices = @transform_7, window_bounds = array<i64: 1, 8, 256>}]} {
    %c0 = arith.constant 0 : index
    %c0_0 = arith.constant 0 : index
    %c0_1 = arith.constant 0 : index
    %0 = vector.load %arg1[%c0, %c0_0, %c0_1] : memref<1x8x256xf32, #tpu.memory_space<vmem>>, vector<1x8x256xf32>
    %1 = vector.shape_cast %0 : vector<1x8x256xf32> to vector<8x256xf32>
    %c0_2 = arith.constant 0 : index
    %c0_3 = arith.constant 0 : index
    %2 = vector.load %arg2[%c0_2, %c0_3] : memref<256x768xf32, #tpu.memory_space<vmem>>, vector<256x768xf32>
    %cst = arith.constant dense<0.000000e+00> : vector<8x768xf32>
    %3 = tpu.matmul %1, %2, %cst {dimension_numbers = #tpu.dot_dimension_numbers<[1], [0], [0], [1], [0, 0, 1, 1], [], []>} : vector<8x256xf32>, vector<256x768xf32>, vector<8x768xf32> -> vector<8x768xf32>
    %c0_4 = arith.constant 0 : index
    %c0_5 = arith.constant 0 : index
    %4 = vector.load %arg3[%c0_4, %c0_5] : memref<1x768xf32, #tpu.memory_space<vmem>>, vector<1x768xf32>
    %5 = vector.broadcast %4 : vector<1x768xf32> to vector<8x768xf32>
    %6 = arith.addf %3, %5 : vector<8x768xf32>
    %cst_6 = arith.constant 0.000000e+00 : f32
    %7 = vector.broadcast %cst_6 : f32 to vector<8x768xf32>
    %8 = arith.subf %7, %6 : vector<8x768xf32>
    %9 = math.exp %8 : vector<8x768xf32>
    %cst_7 = arith.constant 1.000000e+00 : f32
    %10 = vector.broadcast %cst_7 : f32 to vector<8x768xf32>
    %11 = arith.addf %10, %9 : vector<8x768xf32>
    %12 = tpu.reciprocal %11 : vector<8x768xf32> -> vector<8x768xf32>
    %13 = arith.mulf %6, %12 : vector<8x768xf32>
    %14 = vector.extract_strided_slice %13 {offsets = [0, 0], sizes = [8, 256], strides = [1, 1]} : vector<8x768xf32> to vector<8x256xf32>
    %c0_8 = arith.constant 0 : index
    %c0_9 = arith.constant 0 : index
    %c0_10 = arith.constant 0 : index
    %15 = vector.load %arg4[%c0_8, %c0_9, %c0_10] : memref<3x256x256xf32, #tpu.memory_space<vmem>>, vector<1x256x256xf32>
    %16 = vector.shape_cast %15 : vector<1x256x256xf32> to vector<256x256xf32>
    %cst_11 = arith.constant dense<0.000000e+00> : vector<8x256xf32>
    %17 = tpu.matmul %14, %16, %cst_11 {dimension_numbers = #tpu.dot_dimension_numbers<[1], [0], [0], [1], [0, 0, 1, 1], [], []>} : vector<8x256xf32>, vector<256x256xf32>, vector<8x256xf32> -> vector<8x256xf32>
    %c0_12 = arith.constant 0 : index
    %c0_13 = arith.constant 0 : index
    %c0_14 = arith.constant 0 : index
    %18 = vector.load %arg5[%c0_12, %c0_13, %c0_14] : memref<3x1x256xf32, #tpu.memory_space<vmem>>, vector<1x1x256xf32>
    %19 = vector.shape_cast %18 : vector<1x1x256xf32> to vector<1x256xf32>
    %20 = vector.broadcast %19 : vector<1x256xf32> to vector<8x256xf32>
    %21 = arith.addf %17, %20 : vector<8x256xf32>
    %cst_15 = arith.constant 0.000000e+00 : f32
    %22 = vector.broadcast %cst_15 : f32 to vector<8x256xf32>
    %23 = arith.subf %22, %21 : vector<8x256xf32>
    %24 = math.exp %23 : vector<8x256xf32>
    %cst_16 = arith.constant 1.000000e+00 : f32
    %25 = vector.broadcast %cst_16 : f32 to vector<8x256xf32>
    %26 = arith.addf %25, %24 : vector<8x256xf32>
    %27 = tpu.reciprocal %26 : vector<8x256xf32> -> vector<8x256xf32>
    %28 = arith.mulf %21, %27 : vector<8x256xf32>
    %29 = vector.extract_strided_slice %13 {offsets = [0, 256], sizes = [8, 256], strides = [1, 1]} : vector<8x768xf32> to vector<8x256xf32>
    %c1 = arith.constant 1 : index
    %c0_17 = arith.constant 0 : index
    %c0_18 = arith.constant 0 : index
    %30 = vector.load %arg4[%c1, %c0_17, %c0_18] : memref<3x256x256xf32, #tpu.memory_space<vmem>>, vector<1x256x256xf32>
    %31 = vector.shape_cast %30 : vector<1x256x256xf32> to vector<256x256xf32>
    %cst_19 = arith.constant dense<0.000000e+00> : vector<8x256xf32>
    %32 = tpu.matmul %29, %31, %cst_19 {dimension_numbers = #tpu.dot_dimension_numbers<[1], [0], [0], [1], [0, 0, 1, 1], [], []>} : vector<8x256xf32>, vector<256x256xf32>, vector<8x256xf32> -> vector<8x256xf32>
    %c1_20 = arith.constant 1 : index
    %c0_21 = arith.constant 0 : index
    %c0_22 = arith.constant 0 : index
    %33 = vector.load %arg5[%c1_20, %c0_21, %c0_22] : memref<3x1x256xf32, #tpu.memory_space<vmem>>, vector<1x1x256xf32>
    %34 = vector.shape_cast %33 : vector<1x1x256xf32> to vector<1x256xf32>
    %35 = vector.broadcast %34 : vector<1x256xf32> to vector<8x256xf32>
    %36 = arith.addf %32, %35 : vector<8x256xf32>
    %cst_23 = arith.constant 0.000000e+00 : f32
    %37 = vector.broadcast %cst_23 : f32 to vector<8x256xf32>
    %38 = arith.subf %37, %36 : vector<8x256xf32>
    %39 = math.exp %38 : vector<8x256xf32>
    %cst_24 = arith.constant 1.000000e+00 : f32
    %40 = vector.broadcast %cst_24 : f32 to vector<8x256xf32>
    %41 = arith.addf %40, %39 : vector<8x256xf32>
    %42 = tpu.reciprocal %41 : vector<8x256xf32> -> vector<8x256xf32>
    %43 = arith.mulf %36, %42 : vector<8x256xf32>
    %44 = vector.extract_strided_slice %13 {offsets = [0, 512], sizes = [8, 256], strides = [1, 1]} : vector<8x768xf32> to vector<8x256xf32>
    %c2 = arith.constant 2 : index
    %c0_25 = arith.constant 0 : index
    %c0_26 = arith.constant 0 : index
    %45 = vector.load %arg4[%c2, %c0_25, %c0_26] : memref<3x256x256xf32, #tpu.memory_space<vmem>>, vector<1x256x256xf32>
    %46 = vector.shape_cast %45 : vector<1x256x256xf32> to vector<256x256xf32>
    %cst_27 = arith.constant dense<0.000000e+00> : vector<8x256xf32>
    %47 = tpu.matmul %44, %46, %cst_27 {dimension_numbers = #tpu.dot_dimension_numbers<[1], [0], [0], [1], [0, 0, 1, 1], [], []>} : vector<8x256xf32>, vector<256x256xf32>, vector<8x256xf32> -> vector<8x256xf32>
    %c2_28 = arith.constant 2 : index
    %c0_29 = arith.constant 0 : index
    %c0_30 = arith.constant 0 : index
    %48 = vector.load %arg5[%c2_28, %c0_29, %c0_30] : memref<3x1x256xf32, #tpu.memory_space<vmem>>, vector<1x1x256xf32>
    %49 = vector.shape_cast %48 : vector<1x1x256xf32> to vector<1x256xf32>
    %50 = vector.broadcast %49 : vector<1x256xf32> to vector<8x256xf32>
    %51 = arith.addf %47, %50 : vector<8x256xf32>
    %cst_31 = arith.constant 0.000000e+00 : f32
    %52 = vector.broadcast %cst_31 : f32 to vector<8x256xf32>
    %53 = arith.subf %52, %51 : vector<8x256xf32>
    %54 = math.exp %53 : vector<8x256xf32>
    %cst_32 = arith.constant 1.000000e+00 : f32
    %55 = vector.broadcast %cst_32 : f32 to vector<8x256xf32>
    %56 = arith.addf %55, %54 : vector<8x256xf32>
    %57 = tpu.reciprocal %56 : vector<8x256xf32> -> vector<8x256xf32>
    %58 = arith.mulf %51, %57 : vector<8x256xf32>
    %59 = vector.shape_cast %58 : vector<8x256xf32> to vector<1x8x256xf32>
    %cst_33 = arith.constant 0.000000e+00 : f32
    %60 = vector.broadcast %cst_33 : f32 to vector<1x8x256xf32>
    %61 = vector.extract_strided_slice %43 {offsets = [0, 0], sizes = [8, 32], strides = [1, 1]} : vector<8x256xf32> to vector<8x32xf32>
    %62 = tpu.concatenate %61, %61, %61, %61, %61, %61, %61, %61 in 1 : vector<8x32xf32>, vector<8x32xf32>, vector<8x32xf32>, vector<8x32xf32>, vector<8x32xf32>, vector<8x32xf32>, vector<8x32xf32>, vector<8x32xf32> -> vector<8x256xf32>
    %63 = vector.shape_cast %62 : vector<8x256xf32> to vector<1x8x256xf32>
    %64 = vector.extract_strided_slice %59 {offsets = [0, 0, 0], sizes = [1, 1, 256], strides = [1, 1, 1]} : vector<1x8x256xf32> to vector<1x1x256xf32>
    %65 = vector.shape_cast %64 : vector<1x1x256xf32> to vector<1x256xf32>
    %66 = vector.shape_cast %65 : vector<1x256xf32> to vector<1x1x256xf32>
    %67 = vector.broadcast %66 : vector<1x1x256xf32> to vector<1x8x256xf32>
    %68 = arith.mulf %63, %67 : vector<1x8x256xf32>
    %69 = arith.addf %60, %68 : vector<1x8x256xf32>
    %70 = vector.extract_strided_slice %43 {offsets = [0, 32], sizes = [8, 32], strides = [1, 1]} : vector<8x256xf32> to vector<8x32xf32>
    %71 = tpu.concatenate %70, %70, %70, %70, %70, %70, %70, %70 in 1 : vector<8x32xf32>, vector<8x32xf32>, vector<8x32xf32>, vector<8x32xf32>, vector<8x32xf32>, vector<8x32xf32>, vector<8x32xf32>, vector<8x32xf32> -> vector<8x256xf32>
    %72 = vector.shape_cast %71 : vector<8x256xf32> to vector<1x8x256xf32>
    %73 = vector.extract_strided_slice %59 {offsets = [0, 1, 0], sizes = [1, 1, 256], strides = [1, 1, 1]} : vector<1x8x256xf32> to vector<1x1x256xf32>
    %74 = vector.shape_cast %73 : vector<1x1x256xf32> to vector<1x256xf32>
    %75 = vector.shape_cast %74 : vector<1x256xf32> to vector<1x1x256xf32>
    %76 = vector.broadcast %75 : vector<1x1x256xf32> to vector<1x8x256xf32>
    %77 = arith.mulf %72, %76 : vector<1x8x256xf32>
    %78 = arith.addf %69, %77 : vector<1x8x256xf32>
    %79 = vector.extract_strided_slice %43 {offsets = [0, 64], sizes = [8, 32], strides = [1, 1]} : vector<8x256xf32> to vector<8x32xf32>
    %80 = tpu.concatenate %79, %79, %79, %79, %79, %79, %79, %79 in 1 : vector<8x32xf32>, vector<8x32xf32>, vector<8x32xf32>, vector<8x32xf32>, vector<8x32xf32>, vector<8x32xf32>, vector<8x32xf32>, vector<8x32xf32> -> vector<8x256xf32>
    %81 = vector.shape_cast %80 : vector<8x256xf32> to vector<1x8x256xf32>
    %82 = vector.extract_strided_slice %59 {offsets = [0, 2, 0], sizes = [1, 1, 256], strides = [1, 1, 1]} : vector<1x8x256xf32> to vector<1x1x256xf32>
    %83 = vector.shape_cast %82 : vector<1x1x256xf32> to vector<1x256xf32>
    %84 = vector.shape_cast %83 : vector<1x256xf32> to vector<1x1x256xf32>
    %85 = vector.broadcast %84 : vector<1x1x256xf32> to vector<1x8x256xf32>
    %86 = arith.mulf %81, %85 : vector<1x8x256xf32>
    %87 = arith.addf %78, %86 : vector<1x8x256xf32>
    %88 = vector.extract_strided_slice %43 {offsets = [0, 96], sizes = [8, 32], strides = [1, 1]} : vector<8x256xf32> to vector<8x32xf32>
    %89 = tpu.concatenate %88, %88, %88, %88, %88, %88, %88, %88 in 1 : vector<8x32xf32>, vector<8x32xf32>, vector<8x32xf32>, vector<8x32xf32>, vector<8x32xf32>, vector<8x32xf32>, vector<8x32xf32>, vector<8x32xf32> -> vector<8x256xf32>
    %90 = vector.shape_cast %89 : vector<8x256xf32> to vector<1x8x256xf32>
    %91 = vector.extract_strided_slice %59 {offsets = [0, 3, 0], sizes = [1, 1, 256], strides = [1, 1, 1]} : vector<1x8x256xf32> to vector<1x1x256xf32>
    %92 = vector.shape_cast %91 : vector<1x1x256xf32> to vector<1x256xf32>
    %93 = vector.shape_cast %92 : vector<1x256xf32> to vector<1x1x256xf32>
    %94 = vector.broadcast %93 : vector<1x1x256xf32> to vector<1x8x256xf32>
    %95 = arith.mulf %90, %94 : vector<1x8x256xf32>
    %96 = arith.addf %87, %95 : vector<1x8x256xf32>
    %97 = vector.extract_strided_slice %43 {offsets = [0, 128], sizes = [8, 32], strides = [1, 1]} : vector<8x256xf32> to vector<8x32xf32>
    %98 = tpu.concatenate %97, %97, %97, %97, %97, %97, %97, %97 in 1 : vector<8x32xf32>, vector<8x32xf32>, vector<8x32xf32>, vector<8x32xf32>, vector<8x32xf32>, vector<8x32xf32>, vector<8x32xf32>, vector<8x32xf32> -> vector<8x256xf32>
    %99 = vector.shape_cast %98 : vector<8x256xf32> to vector<1x8x256xf32>
    %100 = vector.extract_strided_slice %59 {offsets = [0, 4, 0], sizes = [1, 1, 256], strides = [1, 1, 1]} : vector<1x8x256xf32> to vector<1x1x256xf32>
    %101 = vector.shape_cast %100 : vector<1x1x256xf32> to vector<1x256xf32>
    %102 = vector.shape_cast %101 : vector<1x256xf32> to vector<1x1x256xf32>
    %103 = vector.broadcast %102 : vector<1x1x256xf32> to vector<1x8x256xf32>
    %104 = arith.mulf %99, %103 : vector<1x8x256xf32>
    %105 = arith.addf %96, %104 : vector<1x8x256xf32>
    %106 = vector.extract_strided_slice %43 {offsets = [0, 160], sizes = [8, 32], strides = [1, 1]} : vector<8x256xf32> to vector<8x32xf32>
    %107 = tpu.concatenate %106, %106, %106, %106, %106, %106, %106, %106 in 1 : vector<8x32xf32>, vector<8x32xf32>, vector<8x32xf32>, vector<8x32xf32>, vector<8x32xf32>, vector<8x32xf32>, vector<8x32xf32>, vector<8x32xf32> -> vector<8x256xf32>
    %108 = vector.shape_cast %107 : vector<8x256xf32> to vector<1x8x256xf32>
    %109 = vector.extract_strided_slice %59 {offsets = [0, 5, 0], sizes = [1, 1, 256], strides = [1, 1, 1]} : vector<1x8x256xf32> to vector<1x1x256xf32>
    %110 = vector.shape_cast %109 : vector<1x1x256xf32> to vector<1x256xf32>
    %111 = vector.shape_cast %110 : vector<1x256xf32> to vector<1x1x256xf32>
    %112 = vector.broadcast %111 : vector<1x1x256xf32> to vector<1x8x256xf32>
    %113 = arith.mulf %108, %112 : vector<1x8x256xf32>
    %114 = arith.addf %105, %113 : vector<1x8x256xf32>
    %115 = vector.extract_strided_slice %43 {offsets = [0, 192], sizes = [8, 32], strides = [1, 1]} : vector<8x256xf32> to vector<8x32xf32>
    %116 = tpu.concatenate %115, %115, %115, %115, %115, %115, %115, %115 in 1 : vector<8x32xf32>, vector<8x32xf32>, vector<8x32xf32>, vector<8x32xf32>, vector<8x32xf32>, vector<8x32xf32>, vector<8x32xf32>, vector<8x32xf32> -> vector<8x256xf32>
    %117 = vector.shape_cast %116 : vector<8x256xf32> to vector<1x8x256xf32>
    %118 = vector.extract_strided_slice %59 {offsets = [0, 6, 0], sizes = [1, 1, 256], strides = [1, 1, 1]} : vector<1x8x256xf32> to vector<1x1x256xf32>
    %119 = vector.shape_cast %118 : vector<1x1x256xf32> to vector<1x256xf32>
    %120 = vector.shape_cast %119 : vector<1x256xf32> to vector<1x1x256xf32>
    %121 = vector.broadcast %120 : vector<1x1x256xf32> to vector<1x8x256xf32>
    %122 = arith.mulf %117, %121 : vector<1x8x256xf32>
    %123 = arith.addf %114, %122 : vector<1x8x256xf32>
    %124 = vector.extract_strided_slice %43 {offsets = [0, 224], sizes = [8, 32], strides = [1, 1]} : vector<8x256xf32> to vector<8x32xf32>
    %125 = tpu.concatenate %124, %124, %124, %124, %124, %124, %124, %124 in 1 : vector<8x32xf32>, vector<8x32xf32>, vector<8x32xf32>, vector<8x32xf32>, vector<8x32xf32>, vector<8x32xf32>, vector<8x32xf32>, vector<8x32xf32> -> vector<8x256xf32>
    %126 = vector.shape_cast %125 : vector<8x256xf32> to vector<1x8x256xf32>
    %127 = vector.extract_strided_slice %59 {offsets = [0, 7, 0], sizes = [1, 1, 256], strides = [1, 1, 1]} : vector<1x8x256xf32> to vector<1x1x256xf32>
    %128 = vector.shape_cast %127 : vector<1x1x256xf32> to vector<1x256xf32>
    %129 = vector.shape_cast %128 : vector<1x256xf32> to vector<1x1x256xf32>
    %130 = vector.broadcast %129 : vector<1x1x256xf32> to vector<1x8x256xf32>
    %131 = arith.mulf %126, %130 : vector<1x8x256xf32>
    %132 = arith.addf %123, %131 : vector<1x8x256xf32>
    %133 = vector.shape_cast %132 : vector<1x8x256xf32> to vector<8x256xf32>
    %134 = arith.mulf %28, %133 : vector<8x256xf32>
    %c0_34 = arith.constant 0 : index
    %c0_35 = arith.constant 0 : index
    %c0_36 = arith.constant 0 : index
    %135 = vector.load %arg6[%c0_34, %c0_35, %c0_36] : memref<3x256x256xf32, #tpu.memory_space<vmem>>, vector<1x256x256xf32>
    %136 = vector.shape_cast %135 : vector<1x256x256xf32> to vector<256x256xf32>
    %cst_37 = arith.constant dense<0.000000e+00> : vector<8x256xf32>
    %137 = tpu.matmul %134, %136, %cst_37 {dimension_numbers = #tpu.dot_dimension_numbers<[1], [0], [0], [1], [0, 0, 1, 1], [], []>} : vector<8x256xf32>, vector<256x256xf32>, vector<8x256xf32> -> vector<8x256xf32>
    %c0_38 = arith.constant 0 : index
    %c0_39 = arith.constant 0 : index
    %c0_40 = arith.constant 0 : index
    %138 = vector.load %arg7[%c0_38, %c0_39, %c0_40] : memref<3x1x256xf32, #tpu.memory_space<vmem>>, vector<1x1x256xf32>
    %139 = vector.shape_cast %138 : vector<1x1x256xf32> to vector<1x256xf32>
    %140 = vector.broadcast %139 : vector<1x256xf32> to vector<8x256xf32>
    %141 = arith.addf %137, %140 : vector<8x256xf32>
    %cst_41 = arith.constant 0.000000e+00 : f32
    %142 = vector.broadcast %cst_41 : f32 to vector<8x256xf32>
    %143 = arith.subf %142, %141 : vector<8x256xf32>
    %144 = math.exp %143 : vector<8x256xf32>
    %cst_42 = arith.constant 1.000000e+00 : f32
    %145 = vector.broadcast %cst_42 : f32 to vector<8x256xf32>
    %146 = arith.addf %145, %144 : vector<8x256xf32>
    %147 = tpu.reciprocal %146 : vector<8x256xf32> -> vector<8x256xf32>
    %148 = arith.mulf %141, %147 : vector<8x256xf32>
    %c1_43 = arith.constant 1 : index
    %c0_44 = arith.constant 0 : index
    %c0_45 = arith.constant 0 : index
    %149 = vector.load %arg6[%c1_43, %c0_44, %c0_45] : memref<3x256x256xf32, #tpu.memory_space<vmem>>, vector<1x256x256xf32>
    %150 = vector.shape_cast %149 : vector<1x256x256xf32> to vector<256x256xf32>
    %cst_46 = arith.constant dense<0.000000e+00> : vector<8x256xf32>
    %151 = tpu.matmul %148, %150, %cst_46 {dimension_numbers = #tpu.dot_dimension_numbers<[1], [0], [0], [1], [0, 0, 1, 1], [], []>} : vector<8x256xf32>, vector<256x256xf32>, vector<8x256xf32> -> vector<8x256xf32>
    %c1_47 = arith.constant 1 : index
    %c0_48 = arith.constant 0 : index
    %c0_49 = arith.constant 0 : index
    %152 = vector.load %arg7[%c1_47, %c0_48, %c0_49] : memref<3x1x256xf32, #tpu.memory_space<vmem>>, vector<1x1x256xf32>
    %153 = vector.shape_cast %152 : vector<1x1x256xf32> to vector<1x256xf32>
    %154 = vector.broadcast %153 : vector<1x256xf32> to vector<8x256xf32>
    %155 = arith.addf %151, %154 : vector<8x256xf32>
    %cst_50 = arith.constant 0.000000e+00 : f32
    %156 = vector.broadcast %cst_50 : f32 to vector<8x256xf32>
    %157 = arith.subf %156, %155 : vector<8x256xf32>
    %158 = math.exp %157 : vector<8x256xf32>
    %cst_51 = arith.constant 1.000000e+00 : f32
    %159 = vector.broadcast %cst_51 : f32 to vector<8x256xf32>
    %160 = arith.addf %159, %158 : vector<8x256xf32>
    %161 = tpu.reciprocal %160 : vector<8x256xf32> -> vector<8x256xf32>
    %162 = arith.mulf %155, %161 : vector<8x256xf32>
    %c2_52 = arith.constant 2 : index
    %c0_53 = arith.constant 0 : index
    %c0_54 = arith.constant 0 : index
    %163 = vector.load %arg6[%c2_52, %c0_53, %c0_54] : memref<3x256x256xf32, #tpu.memory_space<vmem>>, vector<1x256x256xf32>
    %164 = vector.shape_cast %163 : vector<1x256x256xf32> to vector<256x256xf32>
    %cst_55 = arith.constant dense<0.000000e+00> : vector<8x256xf32>
    %165 = tpu.matmul %162, %164, %cst_55 {dimension_numbers = #tpu.dot_dimension_numbers<[1], [0], [0], [1], [0, 0, 1, 1], [], []>} : vector<8x256xf32>, vector<256x256xf32>, vector<8x256xf32> -> vector<8x256xf32>
    %c2_56 = arith.constant 2 : index
    %c0_57 = arith.constant 0 : index
    %c0_58 = arith.constant 0 : index
    %166 = vector.load %arg7[%c2_56, %c0_57, %c0_58] : memref<3x1x256xf32, #tpu.memory_space<vmem>>, vector<1x1x256xf32>
    %167 = vector.shape_cast %166 : vector<1x1x256xf32> to vector<1x256xf32>
    %168 = vector.broadcast %167 : vector<1x256xf32> to vector<8x256xf32>
    %169 = arith.addf %165, %168 : vector<8x256xf32>
    %170 = arith.addf %169, %134 : vector<8x256xf32>
    %171 = vector.shape_cast %170 : vector<8x256xf32> to vector<1x8x256xf32>
    %c0_59 = arith.constant 0 : index
    %c0_60 = arith.constant 0 : index
    %c0_61 = arith.constant 0 : index
    %172 = vector.load %arg8[%c0_59, %c0_60, %c0_61] : memref<1x8x256xf32, #tpu.memory_space<vmem>>, vector<1x8x256xf32>
    tpu.vector_store %arg8[%c0_59, %c0_60, %c0_61], %171 {strides = array<i32>} : memref<1x8x256xf32, #tpu.memory_space<vmem>>, vector<1x8x256xf32>,
    return
  }
  func.func @transform_0(%arg0: i32) -> (i32, i32, i32) {
    %c0_i32 = arith.constant 0 : i32
    %c0_i32_0 = arith.constant 0 : i32
    %c0_i32_1 = arith.constant 0 : i32
    return %arg0, %c0_i32, %c0_i32_0 : i32, i32, i32
  }
  func.func @transform_1(%arg0: i32) -> (i32, i32) {
    %c0_i32 = arith.constant 0 : i32
    %c0_i32_0 = arith.constant 0 : i32
    %c0_i32_1 = arith.constant 0 : i32
    return %c0_i32, %c0_i32_0 : i32, i32
  }
  func.func @transform_2(%arg0: i32) -> (i32, i32) {
    %c0_i32 = arith.constant 0 : i32
    %c0_i32_0 = arith.constant 0 : i32
    %c0_i32_1 = arith.constant 0 : i32
    return %c0_i32, %c0_i32_0 : i32, i32
  }
  func.func @transform_3(%arg0: i32) -> (i32, i32, i32) {
    %c0_i32 = arith.constant 0 : i32
    %c0_i32_0 = arith.constant 0 : i32
    %c0_i32_1 = arith.constant 0 : i32
    %c0_i32_2 = arith.constant 0 : i32
    return %c0_i32, %c0_i32_0, %c0_i32_1 : i32, i32, i32
  }
  func.func @transform_4(%arg0: i32) -> (i32, i32, i32) {
    %c0_i32 = arith.constant 0 : i32
    %c0_i32_0 = arith.constant 0 : i32
    %c0_i32_1 = arith.constant 0 : i32
    %c0_i32_2 = arith.constant 0 : i32
    return %c0_i32, %c0_i32_0, %c0_i32_1 : i32, i32, i32
  }
  func.func @transform_5(%arg0: i32) -> (i32, i32, i32) {
    %c0_i32 = arith.constant 0 : i32
    %c0_i32_0 = arith.constant 0 : i32
    %c0_i32_1 = arith.constant 0 : i32
    %c0_i32_2 = arith.constant 0 : i32
    return %c0_i32, %c0_i32_0, %c0_i32_1 : i32, i32, i32
  }
  func.func @transform_6(%arg0: i32) -> (i32, i32, i32) {
    %c0_i32 = arith.constant 0 : i32
    %c0_i32_0 = arith.constant 0 : i32
    %c0_i32_1 = arith.constant 0 : i32
    %c0_i32_2 = arith.constant 0 : i32
    return %c0_i32, %c0_i32_0, %c0_i32_1 : i32, i32, i32
  }
  func.func @transform_7(%arg0: i32) -> (i32, i32, i32) {
    %c0_i32 = arith.constant 0 : i32
    %c0_i32_0 = arith.constant 0 : i32
    %c0_i32_1 = arith.constant 0 : i32
    return %arg0, %c0_i32, %c0_i32_0 : i32, i32, i32
  }
}

</mosaic_0001>

<bundles_post_ra>
// kernel: tpu_custom_call.1
= control target key start
LH: loop header
LB: loop body
LE: loop exit
PB: predicated region body
PF: predicated region fallthrough
CT: control target
= control target key end

     0   :  { %s3465_s0 = inlined_call_operand.hbm [shape: f32[2,8,256], index: 0, kind: input, shape index: {}]   ;;  %s3466_s1 = inlined_call_operand.hbm [shape: f32[256,768], index: 1, kind: input, shape index: {}]   ;;  %s3467_s2 = inlined_call_operand.vmem [shape: f32[1,768], index: 2, kind: input, shape index: {}]   ;;  %s3468_s3 = inlined_call_operand.hbm [shape: f32[3,256,256], index: 3, kind: input, shape index: {}]   ;;  %s3469_s4 = inlined_call_operand.vmem [shape: f32[3,1,256], index: 4, kind: input, shape index: {}]   ;;  %s3470_s5 = inlined_call_operand.hbm [shape: f32[3,256,256], index: 5, kind: input, shape index: {}]   ;;  %s3471_s6 = inlined_call_operand.vmem [shape: f32[3,1,256], index: 6, kind: input, shape index: {}]   ;;  %s3472_s7 = inlined_call_operand.hbm [shape: f32[2,8,256], index: 7, kind: output, shape index: {}]  }
   0x1   :  { %3477 = sst [smem:[#allocation17_spill]] %s3466_s1 }
   0x2   :  { %12 = vsyncpa [#allocation4], 0 }
   0x3   :  { %14 = vsyncpa [#allocation4 + $0x1], 0 }
   0x4   :  { %15 = vsyncpa [#allocation7], 0 }
   0x5   :  { %16 = vsyncpa [#allocation10], 0 }
   0x6   :  { %17 = vsyncpa [#allocation5], 0 }
   0x7   :  { %19 = vsyncpa [#allocation5 + $0x1], 0  ;;  %s3019_s24 = smov 0   ;;  %s3021_s25 = smov 0  }
   0x8   :  { %s3023_s26 = smov 0   ;;  %s3025_s27 = smov 0  }
   0x9 LB: > { %s3040_s28 = sadd.s32 4294967295, %s2965_s27   ;;  %s2027_s29 = sadd.s32 4294967294, %s2965_s27   ;;  %s2965_s27 = sphi %s3025_s27, %s3500_s27   ;;  %s2961_s26 = sphi %s3023_s26, %s3499_s26   ;;  %s2957_s25 = sphi %s3021_s25, %s3498_s25   ;;  %s2953_s24 = sphi %s3019_s24, %s3497_s24  }
   0xa   : > { %p45_p0 = scmp.ne.s32.totalorder %s2957_s25, %s2953_s24  ;;  %p3473_p1 = scmp.eq.s32.totalorder %s3040_s28, 0 }
   0xb   : > { %p201_p3 = scmp.eq.s32.totalorder %s2027_s29, 1  ;;  %p2028_p5 = scmp.ge.s32.totalorder %s2965_s27, 1 }
   0xc   : > { %p3049_p4 = por %p3473_p1, %p45_p0  ;;  %p208_p7 = scmp.lt.s32.totalorder %s2965_s27, 3 }
   0xd   : > { %p3054_p6 = por %p201_p3, %p45_p0  ;;  %s2967_s10 = smov [#allocation6]  }
   0xe   : > { %s3478_s30 = scalar_select %p3049_p4, 1, 0 }
   0xf   : > { %s3479_s8 = scalar_select %p3054_p6, 1, 0 }
  0x10   : > { %p3059_p8 = pnand %p2028_p5, %p208_p7  ;;  %s220_s11 = sshll.u32 %s2967_s10, 4  ;;  %s3063_s11 = int_to_ptr.vmem [resolvable:$true] %s220_s11 }
  0x11   : > { %3480 = sst [smem:[#allocation16_spill]] %s3479_s8  ;;  %s2968_s13 = smov [#allocation8]  }
  0x12   : > { %s3481_s9 = scalar_select %p3059_p8, 1, 0 }
  0x13   : > { %p2645_p9 = pneg %p3059_p8  ;;  %s236_s14 = sshll.u32 %s2968_s13, 4  ;;  %s3074_s14 = int_to_ptr.vmem [resolvable:$true] %s236_s14 }
  0x14   : > { %s3483_s1 = sld [smem:[#allocation17_spill]] }
  0x15   : > { %p3070_p11 = pnand %p2645_p9, %p3473_p1 }
  0x17   : > { %p3084_p13 = pneg %p3070_p11 }
  0x1a   : > { %s2777_s17 = scalar_lea.hbm %s3483_s1, 24576 }
  0x1b   : > { %p2778_p12 = scmp.ne.s32.totalorder %s3483_s1, %s2777_s17  ;;  %p2784_p5 = scmp.lt.u32.totalorder %s2777_s17, %s3483_s1 }
  0x1d   : > { %p2780_p0 = pnand %p3084_p13, %p2778_p12 }
  0x1f   : > { %p2781_p3 = pneg %p2780_p0 }
  0x21   : > { %p2786_p7 = pnand %p2784_p5, %p2781_p3 }
  0x23   : > { %2789 = shalt.err (!%p2786_p7)
}
  0x24   : > { %s2790_s23 = scalar_lea.vmem %s3063_s11, 24576  ;;  %p2798_p2 = scmp.lt.s32.totalorder %s3063_s11, %s3063_s11 }
  0x25   : > { %p2791_p9 = scmp.ne.s32.totalorder %s3063_s11, %s2790_s23  ;;  %p2799_p6 = scmp.lt.s32.totalorder %s2790_s23, %s2790_s23 }
  0x27   : > { %p2793_p10 = pnand %p2791_p9, %p3084_p13  ;;  %p2800_p12 = por %p2799_p6, %p2798_p2 }
  0x29   : > { %p2794_p1 = pneg %p2793_p10 }
  0x2b   : > { %p2801_p0 = pnand %p2800_p12, %p2794_p1 }
  0x2d   : > { %2804 = shalt.err (!%p2801_p0)
}
  0x2e   : > { %s2969_s29 = smov 768   ;;  %s2970_s10 = smov 48  }
  0x2f   : > { %2648 = dma.hbm_to_vmem [thread:$0]  (!%p3070_p11), %s3483_s1, 24576, %s3063_s11, [#allocation7], %s2969_s29, %s2969_s29, %s2970_s10  }
  0x30   : > { %s2805_s18 = scalar_lea.hbm %s3468_s3, 24576 }
  0x31   : > { %p2806_p2 = scmp.ne.s32.totalorder %s3468_s3, %s2805_s18  ;;  %p2812_p10 = scmp.lt.u32.totalorder %s2805_s18, %s3468_s3 }
  0x33   : > { %p2808_p1 = pnand %p2806_p2, %p3084_p13 }
  0x35   : > { %p2809_p6 = pneg %p2808_p1 }
  0x37   : > { %p2814_p3 = pnand %p2812_p10, %p2809_p6 }
  0x39   : > { %2817 = shalt.err (!%p2814_p3)
}
  0x3a   : > { %s2818_s11 = scalar_lea.vmem %s3074_s14, 24576  ;;  %p2826_p12 = scmp.lt.s32.totalorder %s3074_s14, %s3074_s14 }
  0x3b   : > { %p2819_p5 = scmp.ne.s32.totalorder %s3074_s14, %s2818_s11  ;;  %p2827_p0 = scmp.lt.s32.totalorder %s2818_s11, %s2818_s11 }
  0x3d   : > { %p2821_p7 = pnand %p2819_p5, %p3084_p13  ;;  %p2828_p2 = por %p2827_p0, %p2826_p12 }
  0x3f   : > { %p2822_p9 = pneg %p2821_p7 }
  0x41   : > { %p2829_p1 = pnand %p2828_p2, %p2822_p9 }
  0x43   : > { %2832 = shalt.err (!%p2829_p1)
}
  0x44   : > { %s2971_s29 = smov 256   ;;  %s2972_s10 = smov 16  }
  0x45   : > { %2651 = dma.hbm_to_vmem [thread:$0]  (!%p3070_p11), %s3468_s3, 24576, %s3074_s14, [#allocation7], %s2971_s29, %s2971_s29, %s2972_s10  }
  0x46   : > { %s2973_s16 = smov [#allocation9]   ;;  %s3129_s18 = sadd.s32 1, %s2965_s27  }
  0x47   : > { %s252_s17 = sshll.u32 %s2973_s16, 4  ;;  %s2833_s22 = scalar_lea.hbm %s3470_s5, 24576  ;;  %s253_s17 = int_to_ptr.vmem [resolvable:$true] %s252_s17 }
  0x48   : > { %p2834_p6 = scmp.ne.s32.totalorder %s3470_s5, %s2833_s22  ;;  %p2840_p5 = scmp.lt.u32.totalorder %s2833_s22, %s3470_s5 }
  0x4a   : > { %p2836_p10 = pnand %p2834_p6, %p3084_p13 }
  0x4c   : > { %p2837_p3 = pneg %p2836_p10 }
  0x4e   : > { %p2842_p7 = pnand %p2840_p5, %p2837_p3 }
  0x50   : > { %2845 = shalt.err (!%p2842_p7)
}
  0x51   : > { %s2846_s14 = scalar_lea.vmem %s253_s17, 24576  ;;  %p2854_p2 = scmp.lt.s32.totalorder %s253_s17, %s253_s17 }
  0x52   : > { %p2847_p9 = scmp.ne.s32.totalorder %s253_s17, %s2846_s14  ;;  %p2855_p1 = scmp.lt.s32.totalorder %s2846_s14, %s2846_s14 }
  0x54   : > { %p2849_p12 = pnand %p2847_p9, %p3084_p13  ;;  %p2856_p4 = por %p2855_p1, %p2854_p2 }
  0x56   : > { %p2850_p0 = pneg %p2849_p12 }
  0x58   : > { %p2857_p8 = pnand %p2856_p4, %p2850_p0 }
  0x5a   : > { %2860 = shalt.err (!%p2857_p8)
}
  0x5b   : > { %2654 = dma.hbm_to_vmem [thread:$0]  (!%p3070_p11), %s3470_s5, 24576, %s253_s17, [#allocation10], %s2971_s29, %s2971_s29, %s2972_s10  }
  0x5c   : > { %s29_s1 = ssub.s32 %s2965_s27, %s3129_s18  ;;  %s32_s8 = sadd.s32 1, %s2961_s26 }
  0x5d   : > { %p30_p4 = scmp.eq.s32.totalorder %s29_s1, 0  ;;  %p39_p8 = scmp.ne.s32.totalorder %s2961_s26, %s2957_s25 }
  0x5e   : > { %p40_p13 = scmp.eq.s32.totalorder %s2965_s27, 0  ;;  %p2666_p6 = scmp.lt.s32.totalorder %s2965_s27, 2 }
  0x5f   : > { %s3157_s12 = scalar_select %p30_p4, %s2961_s26, %s32_s8  }
  0x60   : > { %p41_p10 = por %p40_p13, %p39_p8  ;;  %p3485_p3 = scmp.eq.s32.totalorder %s3040_s28, 1 }
  0x61   : > { %s269_s16 = sand.u32 1, %s2961_s26   ;;  %s2051_s19 = sshll.u32 %s2965_s27, 8 }
  0x62   : > { %p3161_p5 = por %p3485_p3, %p39_p8  ;;  %s2033_s21 = sshll.u32 %s269_s16, 4 }
  0x63   : > { %s3170_s29 = scalar_lea.hbm %s3465_s0, %s2051_s19  ;;  %s273_s10 = scalar_lea.vmem [#allocation3], %s2033_s21 }
  0x64   : > { %s281_s17 = sshll.u32 %s273_s10, 4  ;;  %p3172_p11 = pnand %p2666_p6, %p41_p10  ;;  %s3176_s17 = int_to_ptr.vmem [resolvable:$true] %s281_s17 }
  0x65   : > { %s270_s14 = scalar_lea.sflag [#allocation4], %s269_s16  ;;  %s2861_s13 = scalar_lea.hbm %s3170_s29, 256 }
  0x66   : > { %p2862_p7 = scmp.ne.s32.totalorder %s3170_s29, %s2861_s13  ;;  %p2863_p9 = pneg %p3172_p11 }
  0x67   : > { %s2866_s8 = scalar_lea.hbm %s3465_s0, 512  ;;  %p2867_p2 = scmp.lt.u32.totalorder %s3170_s29, %s3465_s0 }
  0x68   : > { %p2864_p12 = pnand %p2863_p9, %p2862_p7  ;;  %p2868_p1 = scmp.lt.u32.totalorder %s2866_s8, %s2861_s13 }
  0x69   : > { %p2870_p8 = scmp.lt.u32.totalorder %s2861_s13, %s3170_s29 }
  0x6a   : > { %p2865_p0 = pneg %p2864_p12  ;;  %p2869_p4 = por %p2868_p1, %p2867_p2 }
  0x6c   : > { %p2871_p13 = por %p2870_p8, %p2869_p4 }
  0x6e   : > { %p2872_p6 = pnand %p2871_p13, %p2865_p0 }
  0x70   : > { %2875 = shalt.err (!%p2872_p6)
}
  0x71   : > { %s2876_s16 = scalar_lea.vmem %s3176_s17, 256  ;;  %s2974_s22 = smov [#allocation3]  }
  0x72   : > { %p2877_p10 = scmp.ne.s32.totalorder %s3176_s17, %s2876_s16  ;;  %s2881_s23 = sshll.u32 %s2974_s22, 4  ;;  %s2882_s23 = int_to_ptr.vmem [resolvable:$false] %s2881_s23 }
  0x73   : > { %s2883_s10 = scalar_lea.vmem %s2882_s23, 512  ;;  %p2884_p12 = scmp.lt.s32.totalorder %s3176_s17, %s2882_s23 }
  0x74   : > { %p2879_p3 = pnand %p2877_p10, %p2863_p9  ;;  %p2885_p2 = scmp.lt.s32.totalorder %s2883_s10, %s2876_s16 }
  0x76   : > { %p2880_p7 = pneg %p2879_p3  ;;  %p2886_p1 = por %p2885_p2, %p2884_p12 }
  0x78   : > { %p2887_p4 = pnand %p2886_p1, %p2880_p7 }
  0x7a   : > { %2890 = shalt.err (!%p2887_p4)
}
  0x7b   : > { %2658 = dma.hbm_to_vmem [thread:$0]  (!%p3172_p11), %s3170_s29, 256, %s3176_s17, %s270_s14  }
  0x7c   : > { %p3488_p0 = scmp.ne.s32.totalorder %s3481_s9, 0 }
  0x7d   : > { %s3206_s13 = sand.u32 (!%p3488_p0), 1, %s2957_s25   ;;  %p3489_p9 = scmp.ne.s32.totalorder (!%p3488_p0), %s3478_s30, 0 }
  0x7e   : > { %290 = sbr.rel (%p3488_p0) target bundleno = 1565 (0x61d), region = 48  ;;  %s2037_s15 = sshll.u32 (!%p3488_p0), %s3206_s13, 4 }
  0x7f   : > { %s293_s1 = scalar_lea.sflag (!%p3488_p0), [#allocation4], %s3206_s13  ;;  %s3212_s8 = scalar_lea.vmem (!%p3488_p0), [#allocation3], %s2037_s15 }
  0x85   : > { %2936 = dma.done.wait (%p3489_p9), %s293_s1, 256  }
  0x86   : > { %2938 = vsyncadd (%p3489_p9), %s293_s1, 4294967040  ;;  %p3490_p11 = scmp.eq.s32.totalorder %s3040_s28, 0 }
  0x88   : > { %2940 = dma.done.wait (%p3490_p11), [#allocation7], 49152   ;;  %p3491_p8 = pmov %p3490_p11 }
  0x8a   : > { %2942 = vsyncadd (%p3491_p8), [#allocation7], 4294918144  ;;  %p3492_p13 = pmov %p3491_p8 }
  0x8b   : > { %p3493_p6 = pmov %p3491_p8 }
  0x8c   : > { %2944 = dma.done.wait (%p3492_p13), [#allocation10], 24576  }
  0x8d   : > { %2946 = vsyncadd (%p3493_p6), [#allocation10], 4294942720  ;;  %v342_v0 = vld [vmem:[#allocation6 + $0x8] sm:$0xff]  ;;  %v348_v1 = vld [vmem:[#allocation6 + $0x38] sm:$0xff]  ;;  %s2975_s11 = smov 64   ;;  %s2976_s14 = smov 32  }
  0x8e   : > { %v344_v2 = vld [vmem:[#allocation6 + $0x18] sm:$0xff]  ;;  %v2053_v3 = vpack.c.bf16 %v348_v1, %v342_v0  ;;  %v350_v4 = vld [vmem:[#allocation6 + $0x48] sm:$0xff]  ;;  %v341_v5 = vld [vmem:[#allocation6] sm:$0xff]  ;;  %s2977_s19 = smov 96   ;;  %vm1305_vm0 = vcmask 261120   ;;  %vm1307_vm1 = vcmask 523264  }
  0x8f   : > { %v347_v6 = vld [vmem:[#allocation6 + $0x30] sm:$0xff]  ;;  %v2117_v7 = vpack.c.bf16 %v350_v4, %v344_v2  ;;  %v349_v10 = vld [vmem:[#allocation6 + $0x40] sm:$0xff]  ;;  %v354_v11 = vld [vmem:[#allocation6 + $0x68] sm:$0xff]  ;;  %vm1309_vm2 = vcmask 785408   ;;  %s2052_s17 = sshll.u32 %s3040_s28, 8  ;;  %s1914_s28 = scalar_lea.sflag [#allocation5], %s3206_s13 }
  0x90   : > { %v2055_v8 = vpack.c.bf16 %v347_v6, %v341_v5  ;;  %v343_v9 = vld [vmem:[#allocation6 + $0x10] sm:$0xff]  ;;  %2054 = vmatprep.subr.bf16.mxu0 %v2053_v3  ;;  %v360_v13 = vld [vmem:[#allocation6 + $0x98] sm:$0xff]  ;;  %v362_v15 = vld [vmem:[#allocation6 + $0xa8] sm:$0xff]  ;;  %s3421_s16 = scalar_lea.hbm %s3472_s7, %s2052_s17  ;;  %s2978_s22 = smov [#allocation11]  }
  0x91   : > { %v2119_v12 = vpack.c.bf16 %v349_v10, %v343_v9  ;;  %v356_v14 = vld [vmem:[#allocation6 + $0x78] sm:$0xff]  ;;  %2118 = vmatprep.subr.bf16.mxu1 %v2117_v7  ;;  %v2057_v16 = vpack.c.bf16 %v360_v13, %v354_v11  ;;  %v353_v18 = vld [vmem:[#allocation6 + $0x60] sm:$0xff]  ;;  %v359_v19 = vld [vmem:[#allocation6 + $0x90] sm:$0xff]  ;;  %s2895_s23 = sshll.u32 %s2978_s22, 4  ;;  %s2896_s23 = int_to_ptr.vmem [resolvable:$false] %s2895_s23 }
  0x92   : > { %2056 = vmatpush1.bf16.msra.mxu0 %v2055_v8  ;;  %v2121_v17 = vpack.c.bf16 %v362_v15, %v356_v14  ;;  %v355_v20 = vld [vmem:[#allocation6 + $0x70] sm:$0xff]  ;;  %v2059_v21 = vpack.c.bf16 %v359_v19, %v353_v18  ;;  %v361_v22 = vld [vmem:[#allocation6 + $0xa0] sm:$0xff]  ;;  %v366_v23 = vld [vmem:[#allocation6 + $0xc8] sm:$0xff]  ;;  %s2897_s10 = scalar_lea.vmem %s2896_s23, 512 }
  0x93   : > { %2120 = vmatpush1.bf16.msra.mxu1 %v2119_v12  ;;  %v372_v24 = vld [vmem:[#allocation6 + $0xf8] sm:$0xff]  ;;  %2058 = vmatprep.subr.bf16.mxu0 %v2057_v16  ;;  %v2123_v25 = vpack.c.bf16 %v361_v22, %v355_v20  ;;  %v374_v28 = vld [vmem:[#allocation6 + $0x108] sm:$0xff]  ;;  %v365_v29 = vld [vmem:[#allocation6 + $0xc0] sm:$0xff] }
  0x94   : > { %2122 = vmatprep.subr.bf16.mxu1 %v2121_v17  ;;  %v2061_v26 = vpack.c.bf16 %v372_v24, %v366_v23  ;;  %v368_v27 = vld [vmem:[#allocation6 + $0xd8] sm:$0xff]  ;;  %v371_v31 = vld [vmem:[#allocation6 + $0xf0] sm:$0xff]  ;;  %v373_v33 = vld [vmem:[#allocation6 + $0x100] sm:$0xff] }
  0x95   : > { %v2125_v30 = vpack.c.bf16 %v374_v28, %v368_v27  ;;  %v367_v32 = vld [vmem:[#allocation6 + $0xd0] sm:$0xff]  ;;  %v2063_v34 = vpack.c.bf16 %v371_v31, %v365_v29  ;;  %v378_v35 = vld [vmem:[#allocation6 + $0x128] sm:$0xff]  ;;  %v384_v36 = vld [vmem:[#allocation6 + $0x158] sm:$0xff] }
  0x96   : > { %2060 = vmatpush1.bf16.msra.mxu0 %v2059_v21  ;;  %v380_v37 = vld [vmem:[#allocation6 + $0x138] sm:$0xff]  ;;  %v2127_v38 = vpack.c.bf16 %v373_v33, %v367_v32  ;;  %v2065_v39 = vpack.c.bf16 %v384_v36, %v378_v35  ;;  %v386_v40 = vld [vmem:[#allocation6 + $0x168] sm:$0xff]  ;;  %v377_v41 = vld [vmem:[#allocation6 + $0x120] sm:$0xff] }
  0x97   : > { %2124 = vmatpush1.bf16.msra.mxu1 %v2123_v25  ;;  %2062 = vmatprep.subr.bf16.mxu0 %v2061_v26  ;;  %v383_v42 = vld [vmem:[#allocation6 + $0x150] sm:$0xff]  ;;  %v2129_v43 = vpack.c.bf16 %v386_v40, %v380_v37  ;;  %v385_v45 = vld [vmem:[#allocation6 + $0x160] sm:$0xff]  ;;  %v390_v46 = vld [vmem:[#allocation6 + $0x188] sm:$0xff] }
  0x98   : > { %2126 = vmatprep.subr.bf16.mxu1 %v2125_v30  ;;  %v379_v44 = vld [vmem:[#allocation6 + $0x130] sm:$0xff]  ;;  %v396_v47 = vld [vmem:[#allocation6 + $0x1b8] sm:$0xff]  ;;  %v398_v49 = vld [vmem:[#allocation6 + $0x1c8] sm:$0xff]  ;;  %v2067_v50 = vpack.c.bf16 %v383_v42, %v377_v41 }
  0x99   : > { %v392_v48 = vld [vmem:[#allocation6 + $0x198] sm:$0xff]  ;;  %v2131_v51 = vpack.c.bf16 %v385_v45, %v379_v44  ;;  %v2069_v52 = vpack.c.bf16 %v396_v47, %v390_v46  ;;  %v389_v53 = vld [vmem:[#allocation6 + $0x180] sm:$0xff]  ;;  %v395_v54 = vld [vmem:[#allocation6 + $0x1b0] sm:$0xff] }
  0x9a   : > { %2064 = vmatpush1.bf16.msra.mxu0 %v2063_v34  ;;  %v391_v55 = vld [vmem:[#allocation6 + $0x190] sm:$0xff]  ;;  %v2133_v56 = vpack.c.bf16 %v398_v49, %v392_v48  ;;  %v397_v57 = vld [vmem:[#allocation6 + $0x1c0] sm:$0xff]  ;;  %v402_v58 = vld [vmem:[#allocation6 + $0x1e8] sm:$0xff]  ;;  %v2071_v62 = vpack.c.bf16 %v395_v54, %v389_v53 }
  0x9b   : > { %2128 = vmatpush1.bf16.msra.mxu1 %v2127_v38  ;;  %2066 = vmatprep.subr.bf16.mxu0 %v2065_v39  ;;  %v408_v59 = vld [vmem:[#allocation6 + $0x218] sm:$0xff]  ;;  %v410_v61 = vld [vmem:[#allocation6 + $0x228] sm:$0xff]  ;;  %v2135_v63 = vpack.c.bf16 %v397_v57, %v391_v55  ;;  %v401_v1 = vld [vmem:[#allocation6 + $0x1e0] sm:$0xff] }
  0x9c   : > { %2130 = vmatprep.subr.bf16.mxu1 %v2129_v43  ;;  %v404_v60 = vld [vmem:[#allocation6 + $0x1f8] sm:$0xff]  ;;  %v2073_v0 = vpack.c.bf16 %v408_v59, %v402_v58  ;;  %v407_v2 = vld [vmem:[#allocation6 + $0x210] sm:$0xff]  ;;  %v409_v5 = vld [vmem:[#allocation6 + $0x220] sm:$0xff] }
  0x9d   : > { %v403_v3 = vld [vmem:[#allocation6 + $0x1f0] sm:$0xff]  ;;  %v2137_v4 = vpack.c.bf16 %v410_v61, %v404_v60  ;;  %v414_v6 = vld [vmem:[#allocation6 + $0x248] sm:$0xff]  ;;  %v420_v7 = vld [vmem:[#allocation6 + $0x278] sm:$0xff]  ;;  %v2075_v10 = vpack.c.bf16 %v407_v2, %v401_v1 }
  0x9e   : > { %2068 = vmatpush1.bf16.msra.mxu0 %v2067_v50  ;;  %v416_v8 = vld [vmem:[#allocation6 + $0x258] sm:$0xff]  ;;  %v422_v9 = vld [vmem:[#allocation6 + $0x288] sm:$0xff]  ;;  %v2139_v11 = vpack.c.bf16 %v409_v5, %v403_v3  ;;  %v2077_v12 = vpack.c.bf16 %v420_v7, %v414_v6  ;;  %v413_v13 = vld [vmem:[#allocation6 + $0x240] sm:$0xff] }
  0x9f   : > { %2132 = vmatpush1.bf16.msra.mxu1 %v2131_v51  ;;  %2070 = vmatprep.subr.bf16.mxu0 %v2069_v52  ;;  %v419_v14 = vld [vmem:[#allocation6 + $0x270] sm:$0xff]  ;;  %v2141_v16 = vpack.c.bf16 %v422_v9, %v416_v8  ;;  %v421_v17 = vld [vmem:[#allocation6 + $0x280] sm:$0xff]  ;;  %v426_v18 = vld [vmem:[#allocation6 + $0x2a8] sm:$0xff] }
  0xa0   : > { %2134 = vmatprep.subr.bf16.mxu1 %v2133_v56  ;;  %v415_v15 = vld [vmem:[#allocation6 + $0x250] sm:$0xff]  ;;  %v432_v19 = vld [vmem:[#allocation6 + $0x2d8] sm:$0xff]  ;;  %v434_v21 = vld [vmem:[#allocation6 + $0x2e8] sm:$0xff]  ;;  %v2079_v22 = vpack.c.bf16 %v419_v14, %v413_v13 }
  0xa1   : > { %v428_v20 = vld [vmem:[#allocation6 + $0x2b8] sm:$0xff]  ;;  %v2143_v23 = vpack.c.bf16 %v421_v17, %v415_v15  ;;  %v2081_v24 = vpack.c.bf16 %v432_v19, %v426_v18  ;;  %v425_v25 = vld [vmem:[#allocation6 + $0x2a0] sm:$0xff]  ;;  %v431_v26 = vld [vmem:[#allocation6 + $0x2d0] sm:$0xff] }
  0xa2   : > { %2072 = vmatpush1.bf16.msra.mxu0 %v2071_v62  ;;  %v427_v27 = vld [vmem:[#allocation6 + $0x2b0] sm:$0xff]  ;;  %v2145_v28 = vpack.c.bf16 %v434_v21, %v428_v20  ;;  %v433_v29 = vld [vmem:[#allocation6 + $0x2e0] sm:$0xff]  ;;  %v438_v30 = vld [vmem:[#allocation6 + $0x308] sm:$0xff]  ;;  %v2083_v34 = vpack.c.bf16 %v431_v26, %v425_v25 }
  0xa3   : > { %2136 = vmatpush1.bf16.msra.mxu1 %v2135_v63  ;;  %2074 = vmatprep.subr.bf16.mxu0 %v2073_v0  ;;  %v444_v31 = vld [vmem:[#allocation6 + $0x338] sm:$0xff]  ;;  %v446_v33 = vld [vmem:[#allocation6 + $0x348] sm:$0xff]  ;;  %v2147_v35 = vpack.c.bf16 %v433_v29, %v427_v27  ;;  %v437_v37 = vld [vmem:[#allocation6 + $0x300] sm:$0xff] }
  0xa4   : > { %2138 = vmatprep.subr.bf16.mxu1 %v2137_v4  ;;  %v440_v32 = vld [vmem:[#allocation6 + $0x318] sm:$0xff]  ;;  %v2085_v36 = vpack.c.bf16 %v444_v31, %v438_v30  ;;  %v443_v38 = vld [vmem:[#allocation6 + $0x330] sm:$0xff]  ;;  %v445_v41 = vld [vmem:[#allocation6 + $0x340] sm:$0xff] }
  0xa5   : > { %v439_v39 = vld [vmem:[#allocation6 + $0x310] sm:$0xff]  ;;  %v2149_v40 = vpack.c.bf16 %v446_v33, %v440_v32  ;;  %v450_v42 = vld [vmem:[#allocation6 + $0x368] sm:$0xff]  ;;  %v456_v43 = vld [vmem:[#allocation6 + $0x398] sm:$0xff]  ;;  %v2087_v46 = vpack.c.bf16 %v443_v38, %v437_v37 }
  0xa6   : > { %2076 = vmatpush1.bf16.msra.mxu0 %v2075_v10  ;;  %v452_v44 = vld [vmem:[#allocation6 + $0x378] sm:$0xff]  ;;  %v458_v45 = vld [vmem:[#allocation6 + $0x3a8] sm:$0xff]  ;;  %v2151_v47 = vpack.c.bf16 %v445_v41, %v439_v39  ;;  %v2089_v48 = vpack.c.bf16 %v456_v43, %v450_v42  ;;  %v449_v49 = vld [vmem:[#allocation6 + $0x360] sm:$0xff] }
  0xa7   : > { %2140 = vmatpush1.bf16.msra.mxu1 %v2139_v11  ;;  %2078 = vmatprep.subr.bf16.mxu0 %v2077_v12  ;;  %v455_v50 = vld [vmem:[#allocation6 + $0x390] sm:$0xff]  ;;  %v2153_v52 = vpack.c.bf16 %v458_v45, %v452_v44  ;;  %v457_v53 = vld [vmem:[#allocation6 + $0x3a0] sm:$0xff]  ;;  %v462_v54 = vld [vmem:[#allocation6 + $0x3c8] sm:$0xff] }
  0xa8   : > { %2142 = vmatprep.subr.bf16.mxu1 %v2141_v16  ;;  %v451_v51 = vld [vmem:[#allocation6 + $0x370] sm:$0xff]  ;;  %v468_v55 = vld [vmem:[#allocation6 + $0x3f8] sm:$0xff]  ;;  %v470_v57 = vld [vmem:[#allocation6 + $0x408] sm:$0xff]  ;;  %v2091_v58 = vpack.c.bf16 %v455_v50, %v449_v49 }
  0xa9   : > { %v464_v56 = vld [vmem:[#allocation6 + $0x3d8] sm:$0xff]  ;;  %v2155_v59 = vpack.c.bf16 %v457_v53, %v451_v51  ;;  %v2093_v60 = vpack.c.bf16 %v468_v55, %v462_v54  ;;  %v461_v61 = vld [vmem:[#allocation6 + $0x3c0] sm:$0xff]  ;;  %v467_v62 = vld [vmem:[#allocation6 + $0x3f0] sm:$0xff] }
  0xaa   : > { %2080 = vmatpush1.bf16.msra.mxu0 %v2079_v22  ;;  %v463_v63 = vld [vmem:[#allocation6 + $0x3d0] sm:$0xff]  ;;  %v2157_v0 = vpack.c.bf16 %v470_v57, %v464_v56  ;;  %v469_v1 = vld [vmem:[#allocation6 + $0x400] sm:$0xff]  ;;  %v474_v2 = vld [vmem:[#allocation6 + $0x428] sm:$0xff]  ;;  %v2095_v6 = vpack.c.bf16 %v467_v62, %v461_v61 }
  0xab   : > { %2144 = vmatpush1.bf16.msra.mxu1 %v2143_v23  ;;  %2082 = vmatprep.subr.bf16.mxu0 %v2081_v24  ;;  %v480_v3 = vld [vmem:[#allocation6 + $0x458] sm:$0xff]  ;;  %v482_v5 = vld [vmem:[#allocation6 + $0x468] sm:$0xff]  ;;  %v473_v7 = vld [vmem:[#allocation6 + $0x420] sm:$0xff]  ;;  %v2159_v8 = vpack.c.bf16 %v469_v1, %v463_v63 }
  0xac   : > { %2146 = vmatprep.subr.bf16.mxu1 %v2145_v28  ;;  %v476_v4 = vld [vmem:[#allocation6 + $0x438] sm:$0xff]  ;;  %v2097_v9 = vpack.c.bf16 %v480_v3, %v474_v2  ;;  %v479_v10 = vld [vmem:[#allocation6 + $0x450] sm:$0xff]  ;;  %v481_v12 = vld [vmem:[#allocation6 + $0x460] sm:$0xff] }
  0xad   : > { %v475_v11 = vld [vmem:[#allocation6 + $0x430] sm:$0xff]  ;;  %v2161_v13 = vpack.c.bf16 %v482_v5, %v476_v4  ;;  %v486_v14 = vld [vmem:[#allocation6 + $0x488] sm:$0xff]  ;;  %v492_v15 = vld [vmem:[#allocation6 + $0x4b8] sm:$0xff]  ;;  %v2099_v19 = vpack.c.bf16 %v479_v10, %v473_v7 }
  0xae   : > { %2084 = vmatpush1.bf16.msra.mxu0 %v2083_v34  ;;  %v3227_v16 = vld [vmem:[%s3212_s8 + $0x8] sm:$0xff]  ;;  %v2163_v20 = vpack.c.bf16 %v481_v12, %v475_v11  ;;  %v2101_v21 = vpack.c.bf16 %v492_v15, %v486_v14  ;;  %v485_v22 = vld [vmem:[#allocation6 + $0x480] sm:$0xff]  ;;  %v491_v23 = vld [vmem:[#allocation6 + $0x4b0] sm:$0xff] }
  0xaf   : > { %2148 = vmatpush1.bf16.msra.mxu1 %v2147_v35  ;;  %2086 = vmatprep.subr.bf16.mxu0 %v2085_v36  ;;  %v488_v17 = vld [vmem:[#allocation6 + $0x498] sm:$0xff]  ;;  %v494_v18 = vld [vmem:[#allocation6 + $0x4c8] sm:$0xff]  ;;  %v487_v24 = vld [vmem:[#allocation6 + $0x490] sm:$0xff]  ;;  %v2103_v31 = vpack.c.bf16 %v491_v23, %v485_v22 }
  0xb0   : > { %2150 = vmatprep.subr.bf16.mxu1 %v2149_v40  ;;  %629 = vmatprep.mubr.f32.mxu0 %v3227_v16  ;;  %v2165_v25 = vpack.c.bf16 %v494_v18, %v488_v17  ;;  %v493_v26 = vld [vmem:[#allocation6 + $0x4c0] sm:$0xff]  ;;  %v498_v27 = vld [vmem:[#allocation6 + $0x4e8] sm:$0xff]  ;;  %v504_v28 = vld [vmem:[#allocation6 + $0x518] sm:$0xff] }
  0xb1   : > { %700 = vmatprep.mubr.f32.mxu1 %v3227_v16  ;;  %v500_v29 = vld [vmem:[#allocation6 + $0x4f8] sm:$0xff]  ;;  %v506_v30 = vld [vmem:[#allocation6 + $0x528] sm:$0xff]  ;;  %v2167_v32 = vpack.c.bf16 %v493_v26, %v487_v24  ;;  %v2105_v33 = vpack.c.bf16 %v504_v28, %v498_v27  ;;  %v497_v34 = vld [vmem:[#allocation6 + $0x4e0] sm:$0xff] }
  0xb2   : > { %2088 = vmatpush1.bf16.msra.mxu0 %v2087_v46  ;;  %v503_v35 = vld [vmem:[#allocation6 + $0x510] sm:$0xff]  ;;  %v2169_v37 = vpack.c.bf16 %v506_v30, %v500_v29  ;;  %v505_v38 = vld [vmem:[#allocation6 + $0x520] sm:$0xff]  ;;  %v510_v39 = vld [vmem:[#allocation6 + $0x548] sm:$0xff] }
  0xb3   : > { %2152 = vmatpush1.bf16.msra.mxu1 %v2151_v47  ;;  %2090 = vmatprep.subr.bf16.mxu0 %v2089_v48  ;;  %v499_v36 = vld [vmem:[#allocation6 + $0x4f0] sm:$0xff]  ;;  %v516_v40 = vld [vmem:[#allocation6 + $0x578] sm:$0xff]  ;;  %v518_v42 = vld [vmem:[#allocation6 + $0x588] sm:$0xff]  ;;  %v2107_v43 = vpack.c.bf16 %v503_v35, %v497_v34 }
  0xb4   : > { %2154 = vmatprep.subr.bf16.mxu1 %v2153_v52  ;;  %v512_v41 = vld [vmem:[#allocation6 + $0x558] sm:$0xff]  ;;  %v2171_v44 = vpack.c.bf16 %v505_v38, %v499_v36  ;;  %v2109_v45 = vpack.c.bf16 %v516_v40, %v510_v39  ;;  %v509_v46 = vld [vmem:[#allocation6 + $0x540] sm:$0xff]  ;;  %v515_v47 = vld [vmem:[#allocation6 + $0x570] sm:$0xff] }
  0xb5   : > { %v511_v48 = vld [vmem:[#allocation6 + $0x550] sm:$0xff]  ;;  %v2173_v49 = vpack.c.bf16 %v518_v42, %v512_v41  ;;  %v517_v50 = vld [vmem:[#allocation6 + $0x580] sm:$0xff]  ;;  %v522_v51 = vld [vmem:[#allocation6 + $0x5a8] sm:$0xff]  ;;  %v2111_v55 = vpack.c.bf16 %v515_v47, %v509_v46 }
  0xb6   : > { %2092 = vmatpush1.bf16.msra.mxu0 %v2091_v58  ;;  %v528_v52 = vld [vmem:[#allocation6 + $0x5d8] sm:$0xff]  ;;  %v530_v54 = vld [vmem:[#allocation6 + $0x5e8] sm:$0xff]  ;;  %v2175_v56 = vpack.c.bf16 %v517_v50, %v511_v48  ;;  %v521_v58 = vld [vmem:[#allocation6 + $0x5a0] sm:$0xff] }
  0xb7   : > { %2156 = vmatpush1.bf16.msra.mxu1 %v2155_v59  ;;  %2094 = vmatprep.subr.bf16.mxu0 %v2093_v60  ;;  %v524_v53 = vld [vmem:[#allocation6 + $0x5b8] sm:$0xff]  ;;  %v2113_v57 = vpack.c.bf16 %v528_v52, %v522_v51  ;;  %v527_v59 = vld [vmem:[#allocation6 + $0x5d0] sm:$0xff]  ;;  %v529_v62 = vld [vmem:[#allocation6 + $0x5e0] sm:$0xff] }
  0xb8   : > { %2158 = vmatprep.subr.bf16.mxu1 %v2157_v0  ;;  %v523_v60 = vld [vmem:[#allocation6 + $0x5b0] sm:$0xff]  ;;  %v2177_v61 = vpack.c.bf16 %v530_v54, %v524_v53  ;;  %v346_v63 = vld [vmem:[#allocation6 + $0x28] sm:$0xff]  ;;  %v352_v0 = vld [vmem:[#allocation6 + $0x58] sm:$0xff]  ;;  %v2115_v1 = vpack.c.bf16 %v527_v59, %v521_v58 }
  0xb9   : > { %v2179_v2 = vpack.c.bf16 %v529_v62, %v523_v60  ;;  %v2181_v3 = vpack.c.bf16 %v352_v0, %v346_v63  ;;  %v345_v4 = vld [vmem:[#allocation6 + $0x20] sm:$0xff]  ;;  %v351_v5 = vld [vmem:[#allocation6 + $0x50] sm:$0xff]  ;;  %v364_v7 = vld [vmem:[#allocation6 + $0xb8] sm:$0xff] }
  0xba   : > { %2096 = vmatpush1.bf16.msra.mxu0 %v2095_v6  ;;  %v358_v6 = vld [vmem:[#allocation6 + $0x88] sm:$0xff]  ;;  %v357_v10 = vld [vmem:[#allocation6 + $0x80] sm:$0xff]  ;;  %v817_v15 = vld [vmem:[#allocation8 + $0x18] sm:$0xff] }
  0xbb   : > { %2160 = vmatpush1.bf16.msra.mxu1 %v2159_v8  ;;  %2098 = vmatprep.subr.bf16.mxu0 %v2097_v9  ;;  %v3232_v8 = vld [vmem:[%s3212_s8] sm:$0xff]  ;;  %v2183_v9 = vpack.c.bf16 %v351_v5, %v345_v4  ;;  %v815_v11 = vld [vmem:[#allocation8 + $0x8] sm:$0xff]  ;;  %v2185_v12 = vpack.c.bf16 %v364_v7, %v358_v6  ;;  %v376_v17 = vld [vmem:[#allocation6 + $0x118] sm:$0xff] }
  0xbc   : > { %2162 = vmatprep.subr.bf16.mxu1 %v2161_v13  ;;  %v363_v13 = vld [vmem:[#allocation6 + $0xb0] sm:$0xff]  ;;  %v370_v14 = vld [vmem:[#allocation6 + $0xe8] sm:$0xff]  ;;  %v2245_v18 = vpack.c.bf16 %v817_v15, %v815_v11  ;;  %v821_v23 = vld [vmem:[#allocation8 + $0x38] sm:$0xff] }
  0xbd   : > { %v819_v22 = vld [vmem:[#allocation8 + $0x28] sm:$0xff]  ;;  %v2187_v24 = vpack.c.bf16 %v363_v13, %v357_v10  ;;  %v818_v27 = vld [vmem:[#allocation8 + $0x20] sm:$0xff]  ;;  %v2189_v28 = vpack.c.bf16 %v376_v17, %v370_v14  ;;  %v375_v29 = vld [vmem:[#allocation6 + $0x110] sm:$0xff] }
  0xbe   : > { %2100 = vmatpush1.bf16.msra.mxu0 %v2099_v19  ;;  %v814_v19 = vld [vmem:[#allocation8] sm:$0xff]  ;;  %v2249_v26 = vpack.c.bf16 %v821_v23, %v819_v22  ;;  %v382_v30 = vld [vmem:[#allocation6 + $0x148] sm:$0xff]  ;;  %v825_v34 = vld [vmem:[#allocation8 + $0x58] sm:$0xff] }
  0xbf   : > { %2164 = vmatpush1.bf16.msra.mxu1 %v2163_v20  ;;  %2102 = vmatprep.subr.bf16.mxu0 %v2101_v21  ;;  %v816_v20 = vld [vmem:[#allocation8 + $0x10] sm:$0xff]  ;;  %v822_v39 = vld [vmem:[#allocation8 + $0x40] sm:$0xff]  ;;  %v831_v54 = vld [vmem:[#allocation8 + $0x88] sm:$0xff] }
  0xc0   : > { %2166 = vmatprep.subr.bf16.mxu1 %v2165_v25  ;;  %v2247_v21 = vpack.c.bf16 %v816_v20, %v814_v19  ;;  %v369_v25 = vld [vmem:[#allocation6 + $0xe0] sm:$0xff]  ;;  %v824_v40 = vld [vmem:[#allocation8 + $0x50] sm:$0xff]  ;;  %v418_v4 = vld [vmem:[#allocation6 + $0x268] sm:$0xff] }
  0xc1   : > { %v2191_v36 = vpack.c.bf16 %v375_v29, %v369_v25  ;;  %v387_v42 = vld [vmem:[#allocation6 + $0x170] sm:$0xff]  ;;  %v2255_v46 = vpack.c.bf16 %v824_v40, %v822_v39  ;;  %v393_v48 = vld [vmem:[#allocation6 + $0x1a0] sm:$0xff]  ;;  %v424_v5 = vld [vmem:[#allocation6 + $0x298] sm:$0xff] }
  0xc2   : > { %2104 = vmatpush1.bf16.msra.mxu0 %v2103_v31  ;;  %v820_v31 = vld [vmem:[#allocation8 + $0x30] sm:$0xff]  ;;  %v826_v50 = vld [vmem:[#allocation8 + $0x60] sm:$0xff]  ;;  %v2205_v13 = vpack.c.bf16 %v424_v5, %v418_v4  ;;  %v839_v15 = vld [vmem:[#allocation8 + $0xc8] sm:$0xff] }
  0xc3   : > { %2168 = vmatpush1.bf16.msra.mxu1 %v2167_v32  ;;  %2106 = vmatprep.subr.bf16.mxu0 %v2105_v33  ;;  %v388_v32 = vld [vmem:[#allocation6 + $0x178] sm:$0xff]  ;;  %v823_v33 = vld [vmem:[#allocation8 + $0x48] sm:$0xff]  ;;  %v2251_v35 = vpack.c.bf16 %v820_v31, %v818_v27  ;;  %v828_v51 = vld [vmem:[#allocation8 + $0x70] sm:$0xff] }
  0xc4   : > { %2170 = vmatprep.subr.bf16.mxu1 %v2169_v37  ;;  %v381_v37 = vld [vmem:[#allocation6 + $0x140] sm:$0xff]  ;;  %v2253_v38 = vpack.c.bf16 %v825_v34, %v823_v33  ;;  %v2193_v41 = vpack.c.bf16 %v388_v32, %v382_v30  ;;  %v399_v53 = vld [vmem:[#allocation6 + $0x1d0] sm:$0xff]  ;;  %v2259_v58 = vpack.c.bf16 %v828_v51, %v826_v50  ;;  %v841_v17 = vld [vmem:[#allocation8 + $0xd8] sm:$0xff] }
  0xc5   : > { %v2195_v47 = vpack.c.bf16 %v387_v42, %v381_v37  ;;  %v2199_v59 = vpack.c.bf16 %v399_v53, %v393_v48  ;;  %v405_v60 = vld [vmem:[#allocation6 + $0x200] sm:$0xff]  ;;  %v832_v63 = vld [vmem:[#allocation8 + $0x90] sm:$0xff]  ;;  %v436_v19 = vld [vmem:[#allocation6 + $0x2f8] sm:$0xff]  ;;  %v2269_v23 = vpack.c.bf16 %v841_v17, %v839_v15 }
  0xc6   : > { %2108 = vmatpush1.bf16.msra.mxu0 %v2107_v43  ;;  %v827_v43 = vld [vmem:[#allocation8 + $0x68] sm:$0xff]  ;;  %v830_v62 = vld [vmem:[#allocation8 + $0x80] sm:$0xff]  ;;  %v423_v14 = vld [vmem:[#allocation6 + $0x290] sm:$0xff] }
  0xc7   : > { %2172 = vmatpush1.bf16.msra.mxu1 %v2171_v44  ;;  %2110 = vmatprep.subr.bf16.mxu0 %v2109_v45  ;;  %v829_v44 = vld [vmem:[#allocation8 + $0x78] sm:$0xff]  ;;  %v2263_v6 = vpack.c.bf16 %v832_v63, %v830_v62  ;;  %v834_v11 = vld [vmem:[#allocation8 + $0xa0] sm:$0xff]  ;;  %v840_v25 = vld [vmem:[#allocation8 + $0xd0] sm:$0xff] }
  0xc8   : > { %2174 = vmatprep.subr.bf16.mxu1 %v2173_v49  ;;  %v400_v45 = vld [vmem:[#allocation6 + $0x1d8] sm:$0xff]  ;;  %v2257_v49 = vpack.c.bf16 %v829_v44, %v827_v43  ;;  %v429_v22 = vld [vmem:[#allocation6 + $0x2c0] sm:$0xff]  ;;  %v435_v27 = vld [vmem:[#allocation6 + $0x2f0] sm:$0xff] }
  0xc9   : > { %v845_v29 = vld [vmem:[#allocation8 + $0xf8] sm:$0xff]  ;;  %v442_v30 = vld [vmem:[#allocation6 + $0x328] sm:$0xff]  ;;  %v2211_v33 = vpack.c.bf16 %v435_v27, %v429_v22  ;;  %v447_v37 = vld [vmem:[#allocation6 + $0x350] sm:$0xff] }
  0xca   : > { %2112 = vmatpush1.bf16.msra.mxu0 %v2111_v55  ;;  %v833_v55 = vld [vmem:[#allocation8 + $0x98] sm:$0xff]  ;;  %v453_v42 = vld [vmem:[#allocation6 + $0x380] sm:$0xff]  ;;  %v459_v43 = vld [vmem:[#allocation6 + $0x3b0] sm:$0xff] }
  0xcb   : > { %2176 = vmatpush1.bf16.msra.mxu1 %v2175_v56  ;;  %2114 = vmatprep.subr.bf16.mxu0 %v2113_v57  ;;  %v406_v56 = vld [vmem:[#allocation6 + $0x208] sm:$0xff]  ;;  %v412_v57 = vld [vmem:[#allocation6 + $0x238] sm:$0xff]  ;;  %v471_v48 = vld [vmem:[#allocation6 + $0x410] sm:$0xff] }
  0xcc   : > { %2178 = vmatprep.subr.bf16.mxu1 %v2177_v61  ;;  %v2261_v61 = vpack.c.bf16 %v833_v55, %v831_v54  ;;  %v2201_v0 = vpack.c.bf16 %v412_v57, %v406_v56  ;;  %v448_v31 = vld [vmem:[#allocation6 + $0x358] sm:$0xff]  ;;  %v466_v44 = vld [vmem:[#allocation6 + $0x3e8] sm:$0xff]  ;;  %v477_v53 = vld [vmem:[#allocation6 + $0x440] sm:$0xff] }
  0xcd   : > { %v460_v39 = vld [vmem:[#allocation6 + $0x3b8] sm:$0xff]  ;;  %v483_v54 = vld [vmem:[#allocation6 + $0x470] sm:$0xff]  ;;  %v490_v55 = vld [vmem:[#allocation6 + $0x4a8] sm:$0xff] }
  0xce   : > { %2116 = vmatpush1.bf16.msra.mxu0 %v2115_v1  ;;  %v411_v1 = vld [vmem:[#allocation6 + $0x230] sm:$0xff]  ;;  %v484_v50 = vld [vmem:[#allocation6 + $0x478] sm:$0xff]  ;;  %v2227_v57 = vpack.c.bf16 %v483_v54, %v477_v53  ;;  %v975_v17 = vld [vmem:[#allocation8 + $0x208] sm:$0xff] }
  0xcf   : > { %2180 = vmatpush1.bf16.msra.mxu1 %v2179_v2  ;;  %2182 = vmatprep.subr.bf16.mxu0 %v2181_v3  ;;  %v835_v2 = vld [vmem:[#allocation8 + $0xa8] sm:$0xff]  ;;  %v837_v3 = vld [vmem:[#allocation8 + $0xb8] sm:$0xff]  ;;  %v2203_v7 = vpack.c.bf16 %v411_v1, %v405_v60  ;;  %v495_v60 = vld [vmem:[#allocation6 + $0x4d0] sm:$0xff] }
  0xd0   : > { %2246 = vmatprep.subr.bf16.mxu1 %v2245_v18  ;;  %v2265_v10 = vpack.c.bf16 %v837_v3, %v835_v2  ;;  %v430_v18 = vld [vmem:[#allocation6 + $0x2c8] sm:$0xff]  ;;  %v496_v56 = vld [vmem:[#allocation6 + $0x4d8] sm:$0xff]  ;;  %v501_v1 = vld [vmem:[#allocation6 + $0x500] sm:$0xff] }
  0xd1   : > { %630 = vmatmul.mubr.f32.vlgmr.msra.gmra.mrb[0].mxu0 %v3232_v8  ;;  %v508_v62 = vld [vmem:[#allocation6 + $0x538] sm:$0xff]  ;;  %v507_v2 = vld [vmem:[#allocation6 + $0x530] sm:$0xff]  ;;  %v514_v3 = vld [vmem:[#allocation6 + $0x568] sm:$0xff] }
  0xd2   : > { %701 = vmatmul.mubr.f32.vlgmr.msra.gmra.mrb[0].mxu1 %v3232_v8  ;;  %2184 = vmatpush1.bf16.msra.mxu0 %v2183_v9  ;;  %v417_v9 = vld [vmem:[#allocation6 + $0x260] sm:$0xff]  ;;  %v520_v4 = vld [vmem:[#allocation6 + $0x598] sm:$0xff]  ;;  %v2235_v5 = vpack.c.bf16 %v507_v2, %v501_v1  ;;  %v531_v15 = vld [vmem:[#allocation6 + $0x5f0] sm:$0xff] }
  0xd3   : > { %2186 = vmatprep.subr.bf16.mxu0 %v2185_v12  ;;  %771 = vmatprep.mubr.f32.mxu0 %v3227_v16  ;;  %v394_v16 = vld [vmem:[#allocation6 + $0x1a8] sm:$0xff]  ;;  %v836_v12 = vld [vmem:[#allocation8 + $0xb0] sm:$0xff]  ;;  %v978_v27 = vld [vmem:[#allocation8 + $0x220] sm:$0xff] }
  0xd4   : > { %2248 = vmatpush1.bf16.msra.mxu1 %v2247_v21  ;;  %v2197_v52 = vpack.c.bf16 %v400_v45, %v394_v16  ;;  %v2267_v20 = vpack.c.bf16 %v836_v12, %v834_v11  ;;  %v2207_v21 = vpack.c.bf16 %v423_v14, %v417_v9  ;;  %v472_v16 = vld [vmem:[#allocation6 + $0x418] sm:$0xff]  ;;  %v2219_v45 = vpack.c.bf16 %v459_v43, %v453_v42  ;;  %v519_v9 = vld [vmem:[#allocation6 + $0x590] sm:$0xff]  ;;  %v525_v14 = vld [vmem:[#allocation6 + $0x5c0] sm:$0xff] }
  0xd5   : > { %2250 = vmatprep.subr.bf16.mxu1 %v2249_v26  ;;  %v2209_v26 = vpack.c.bf16 %v436_v19, %v430_v18  ;;  %v532_v11 = vld [vmem:[#allocation6 + $0x5f8] sm:$0xff]  ;;  %v2243_v19 = vpack.c.bf16 %v531_v15, %v525_v14  ;;  %v976_v22 = vld [vmem:[#allocation8 + $0x210] sm:$0xff]  ;;  %v842_v54 = vld [vmem:[#allocation8 + $0xe0] sm:$0xff] }
  0xd6   : > { %2188 = vmatpush1.bf16.msra.mxu0 %v2187_v24  ;;  %v838_v24 = vld [vmem:[#allocation8 + $0xc0] sm:$0xff]  ;;  %v977_v18 = vld [vmem:[#allocation8 + $0x218] sm:$0xff] }
  0xd7   : > { %2190 = vmatprep.subr.bf16.mxu0 %v2189_v28  ;;  %v843_v28 = vld [vmem:[#allocation8 + $0xe8] sm:$0xff]  ;;  %v2271_v32 = vpack.c.bf16 %v840_v25, %v838_v24  ;;  %v981_v24 = vld [vmem:[#allocation8 + $0x238] sm:$0xff] }
  0xd8   : > { %2252 = vmatpush1.bf16.msra.mxu1 %v2251_v35  ;;  %v2273_v34 = vpack.c.bf16 %v845_v29, %v843_v28  ;;  %v2213_v35 = vpack.c.bf16 %v448_v31, %v442_v30  ;;  %v980_v28 = vld [vmem:[#allocation8 + $0x230] sm:$0xff]  ;;  %v983_v29 = vld [vmem:[#allocation8 + $0x248] sm:$0xff]  ;;  %v985_v30 = vld [vmem:[#allocation8 + $0x258] sm:$0xff] }
  0xd9   : > { %2254 = vmatprep.subr.bf16.mxu1 %v2253_v38  ;;  %v454_v38 = vld [vmem:[#allocation6 + $0x388] sm:$0xff]  ;;  %v2315_v31 = vpack.c.bf16 %v980_v28, %v978_v27  ;;  %v993_v42 = vld [vmem:[#allocation8 + $0x298] sm:$0xff] }
  0xda   : > { %2192 = vmatpush1.bf16.msra.mxu0 %v2191_v36  ;;  %v441_v36 = vld [vmem:[#allocation6 + $0x320] sm:$0xff]  ;;  %v849_v1 = vld [vmem:[#allocation8 + $0x118] sm:$0xff] }
  0xdb   : > { %2194 = vmatprep.subr.bf16.mxu0 %v2193_v41  ;;  %v2215_v40 = vpack.c.bf16 %v447_v37, %v441_v36  ;;  %v2217_v41 = vpack.c.bf16 %v460_v39, %v454_v38  ;;  %v989_v36 = vld [vmem:[#allocation8 + $0x278] sm:$0xff]  ;;  %v986_v39 = vld [vmem:[#allocation8 + $0x260] sm:$0xff] }
  0xdc   : > { %2256 = vmatpush1.bf16.msra.mxu1 %v2255_v46  ;;  %v2221_v46 = vpack.c.bf16 %v472_v16, %v466_v44  ;;  %v990_v44 = vld [vmem:[#allocation8 + $0x280] sm:$0xff]  ;;  %v992_v16 = vld [vmem:[#allocation8 + $0x290] sm:$0xff]  ;;  %v853_v14 = vld [vmem:[#allocation8 + $0x138] sm:$0xff] }
  0xdd   : > { %2258 = vmatprep.subr.bf16.mxu1 %v2257_v49  ;;  %v478_v49 = vld [vmem:[#allocation6 + $0x448] sm:$0xff]  ;;  %v857_v27 = vld [vmem:[#allocation8 + $0x158] sm:$0xff] }
  0xde   : > { %2196 = vmatpush1.bf16.msra.mxu0 %v2195_v47  ;;  %v465_v47 = vld [vmem:[#allocation6 + $0x3e0] sm:$0xff] }
  0xdf   : > { %2198 = vmatprep.subr.bf16.mxu0 %v2197_v52  ;;  %v2223_v51 = vpack.c.bf16 %v471_v48, %v465_v47  ;;  %v2225_v52 = vpack.c.bf16 %v484_v50, %v478_v49  ;;  %v2327_v47 = vpack.c.bf16 %v992_v16, %v990_v44  ;;  %v994_v49 = vld [vmem:[#allocation8 + $0x2a0] sm:$0xff]  ;;  %v996_v50 = vld [vmem:[#allocation8 + $0x2b0] sm:$0xff]  ;;  %v1019_v44 = vld [vmem:[#allocation8 + $0x368] sm:$0xff] }
  0xe0   : > { %2260 = vmatpush1.bf16.msra.mxu1 %v2259_v58  ;;  %v2229_v58 = vpack.c.bf16 %v496_v56, %v490_v55  ;;  %v2331_v53 = vpack.c.bf16 %v996_v50, %v994_v49  ;;  %v844_v55 = vld [vmem:[#allocation8 + $0xf0] sm:$0xff]  ;;  %v1021_v16 = vld [vmem:[#allocation8 + $0x378] sm:$0xff] }
  0xe1   : > { %2262 = vmatprep.subr.bf16.mxu1 %v2261_v61  ;;  %v502_v61 = vld [vmem:[#allocation6 + $0x508] sm:$0xff]  ;;  %v865_v49 = vld [vmem:[#allocation8 + $0x198] sm:$0xff]  ;;  %v2353_v50 = vpack.c.bf16 %v1021_v16, %v1019_v44  ;;  %v3252_v44 = vld [vmem:[%s3467_s2] sm:$0x3f] }
  0xe2   : > { %2200 = vmatpush1.bf16.msra.mxu0 %v2199_v59  ;;  %v489_v59 = vld [vmem:[#allocation6 + $0x4a0] sm:$0xff] }
  0xe3   : > { %2202 = vmatprep.subr.bf16.mxu0 %v2201_v0  ;;  %v2231_v63 = vpack.c.bf16 %v495_v60, %v489_v59  ;;  %v2233_v0 = vpack.c.bf16 %v508_v62, %v502_v61  ;;  %v2275_v59 = vpack.c.bf16 %v844_v55, %v842_v54  ;;  %v1003_v60 = vld [vmem:[#allocation8 + $0x2e8] sm:$0xff]  ;;  %v1005_v61 = vld [vmem:[#allocation8 + $0x2f8] sm:$0xff]  ;;  %v864_v54 = vld [vmem:[#allocation8 + $0x190] sm:$0xff] }
  0xe4   : > { %2264 = vmatpush1.bf16.msra.mxu1 %v2263_v6  ;;  %v2237_v6 = vpack.c.bf16 %v520_v4, %v514_v3  ;;  %v2337_v2 = vpack.c.bf16 %v1005_v61, %v1003_v60  ;;  %v1004_v3 = vld [vmem:[#allocation8 + $0x2f0] sm:$0xff]  ;;  %v1023_v55 = vld [vmem:[#allocation8 + $0x388] sm:$0xff]  ;;  %v869_v61 = vld [vmem:[#allocation8 + $0x1b8] sm:$0xff] }
  0xe5   : > { %2266 = vmatprep.subr.bf16.mxu1 %v2265_v10  ;;  %v526_v10 = vld [vmem:[#allocation6 + $0x5c8] sm:$0xff] }
  0xe6   : > { %2204 = vmatpush1.bf16.msra.mxu0 %v2203_v7  ;;  %v513_v7 = vld [vmem:[#allocation6 + $0x560] sm:$0xff]  ;;  %v867_v60 = vld [vmem:[#allocation8 + $0x1a8] sm:$0xff] }
  0xe7   : > { %2206 = vmatprep.subr.bf16.mxu0 %v2205_v13  ;;  %v2239_v12 = vpack.c.bf16 %v519_v9, %v513_v7  ;;  %v2241_v13 = vpack.c.bf16 %v532_v11, %v526_v10  ;;  %v1007_v7 = vld [vmem:[#allocation8 + $0x308] sm:$0xff]  ;;  %v1009_v9 = vld [vmem:[#allocation8 + $0x318] sm:$0xff] }
  0xe8   : > { %2268 = vmatpush1.bf16.msra.mxu1 %v2267_v20  ;;  %v2309_v20 = vpack.c.bf16 %v977_v18, %v975_v17  ;;  %v2341_v15 = vpack.c.bf16 %v1009_v9, %v1007_v7  ;;  %v1008_v17 = vld [vmem:[#allocation8 + $0x310] sm:$0xff]  ;;  %v1026_v7 = vld [vmem:[#allocation8 + $0x3a0] sm:$0xff]  ;;  %v871_v9 = vld [vmem:[#allocation8 + $0x1c8] sm:$0xff] }
  0xe9   : > { %2270 = vmatprep.subr.bf16.mxu1 %v2269_v23  ;;  %v979_v23 = vld [vmem:[#allocation8 + $0x228] sm:$0xff] }
  0xea   : > { %2208 = vmatpush1.bf16.msra.mxu0 %v2207_v21  ;;  %v974_v21 = vld [vmem:[#allocation8 + $0x200] sm:$0xff] }
  0xeb   : > { %2210 = vmatprep.subr.bf16.mxu0 %v2209_v26  ;;  %v2311_v25 = vpack.c.bf16 %v976_v22, %v974_v21  ;;  %v2313_v26 = vpack.c.bf16 %v981_v24, %v979_v23  ;;  %v1011_v21 = vld [vmem:[#allocation8 + $0x328] sm:$0xff]  ;;  %v1013_v22 = vld [vmem:[#allocation8 + $0x338] sm:$0xff] }
  0xec   : > { %2272 = vmatpush1.bf16.msra.mxu1 %v2271_v32  ;;  %v2317_v32 = vpack.c.bf16 %v985_v30, %v983_v29  ;;  %v2345_v28 = vpack.c.bf16 %v1013_v22, %v1011_v21  ;;  %v1012_v29 = vld [vmem:[#allocation8 + $0x330] sm:$0xff]  ;;  %v1030_v21 = vld [vmem:[#allocation8 + $0x3c0] sm:$0xff]  ;;  %v875_v22 = vld [vmem:[#allocation8 + $0x1e8] sm:$0xff] }
  0xed   : > { %2274 = vmatprep.subr.bf16.mxu1 %v2273_v34  ;;  %v984_v34 = vld [vmem:[#allocation8 + $0x250] sm:$0xff] }
  0xee   : > { %2212 = vmatpush1.bf16.msra.mxu0 %v2211_v33  ;;  %v982_v33 = vld [vmem:[#allocation8 + $0x240] sm:$0xff] }
  0xef   : > { %2214 = vmatprep.subr.bf16.mxu0 %v2213_v35  ;;  %v987_v35 = vld [vmem:[#allocation8 + $0x268] sm:$0xff]  ;;  %v2319_v37 = vpack.c.bf16 %v984_v34, %v982_v33  ;;  %v1017_v34 = vld [vmem:[#allocation8 + $0x358] sm:$0xff] }
  0xf0   : > { %v2321_v38 = vpack.c.bf16 %v989_v36, %v987_v35  ;;  %2276 = vmatpush1.bf16.msra.mxu1 %v2275_v59  ;;  %v1015_v33 = vld [vmem:[#allocation8 + $0x348] sm:$0xff]  ;;  %v1022_v59 = vld [vmem:[#allocation8 + $0x380] sm:$0xff] }
  0xf2   : > { %2216 = vmatpush1.bf16.msra.mxu0 %v2215_v40  ;;  %v988_v40 = vld [vmem:[#allocation8 + $0x270] sm:$0xff] }
  0xf3   : > { %2218 = vmatprep.subr.bf16.mxu0 %v2217_v41  ;;  %v991_v41 = vld [vmem:[#allocation8 + $0x288] sm:$0xff]  ;;  %v2323_v43 = vpack.c.bf16 %v988_v40, %v986_v39  ;;  %v861_v39 = vld [vmem:[#allocation8 + $0x178] sm:$0xff]  ;;  %v2349_v40 = vpack.c.bf16 %v1017_v34, %v1015_v33 }
  0xf4   : > { %v1136_v33 = vld [vmem:[#allocation8 + $0x408] sm:$0xff]  ;;  %v1138_v34 = vld [vmem:[#allocation8 + $0x418] sm:$0xff] }
  0xf6   : > { %2220 = vmatpush1.bf16.msra.mxu0 %v2219_v45  ;;  %v995_v45 = vld [vmem:[#allocation8 + $0x2a8] sm:$0xff] }
  0xf7   : > { %2222 = vmatprep.subr.bf16.mxu0 %v2221_v46  ;;  %v997_v46 = vld [vmem:[#allocation8 + $0x2b8] sm:$0xff] }
  0xf8   : > { %v2329_v48 = vpack.c.bf16 %v997_v46, %v995_v45 }
  0xfa   : > { %2224 = vmatpush1.bf16.msra.mxu0 %v2223_v51  ;;  %v999_v51 = vld [vmem:[#allocation8 + $0x2c8] sm:$0xff] }
  0xfb   : > { %2226 = vmatprep.subr.bf16.mxu0 %v2225_v52  ;;  %v1001_v52 = vld [vmem:[#allocation8 + $0x2d8] sm:$0xff] }
  0xfc   : > { %v2333_v56 = vpack.c.bf16 %v1001_v52, %v999_v51  ;;  %v1020_v51 = vld [vmem:[#allocation8 + $0x370] sm:$0xff] }
  0xfe   : > { %2228 = vmatpush1.bf16.msra.mxu0 %v2227_v57  ;;  %v998_v57 = vld [vmem:[#allocation8 + $0x2c0] sm:$0xff] }
  0xff   : > { %2230 = vmatprep.subr.bf16.mxu0 %v2229_v58  ;;  %v1000_v58 = vld [vmem:[#allocation8 + $0x2d0] sm:$0xff] }
 0x100   : > { %v2335_v62 = vpack.c.bf16 %v1000_v58, %v998_v57 }
 0x102   : > { %2232 = vmatpush1.bf16.msra.mxu0 %v2231_v63  ;;  %v1002_v63 = vld [vmem:[#allocation8 + $0x2e0] sm:$0xff] }
 0x103   : > { %2234 = vmatprep.subr.bf16.mxu0 %v2233_v0  ;;  %v847_v0 = vld [vmem:[#allocation8 + $0x108] sm:$0xff]  ;;  %v2339_v11 = vpack.c.bf16 %v1004_v3, %v1002_v63  ;;  %v1024_v63 = vld [vmem:[#allocation8 + $0x390] sm:$0xff] }
 0x104   : > { %v2277_v4 = vpack.c.bf16 %v849_v1, %v847_v0  ;;  %v2297_v0 = vpack.c.bf16 %v869_v61, %v867_v60  ;;  %v866_v1 = vld [vmem:[#allocation8 + $0x1a0] sm:$0xff]  ;;  %v1027_v3 = vld [vmem:[#allocation8 + $0x3a8] sm:$0xff] }
 0x106   : > { %2236 = vmatpush1.bf16.msra.mxu0 %v2235_v5  ;;  %v846_v5 = vld [vmem:[#allocation8 + $0x100] sm:$0xff]  ;;  %2278 = vmatprep.subr.bf16.mxu1 %v2277_v4  ;;  %v1029_v4 = vld [vmem:[#allocation8 + $0x3b8] sm:$0xff] }
 0x107   : > { %2238 = vmatprep.subr.bf16.mxu0 %v2237_v6  ;;  %v848_v6 = vld [vmem:[#allocation8 + $0x110] sm:$0xff] }
 0x108   : > { %v2279_v10 = vpack.c.bf16 %v848_v6, %v846_v5  ;;  %v2359_v6 = vpack.c.bf16 %v1024_v63, %v1022_v59 }
 0x10a   : > { %2240 = vmatpush1.bf16.msra.mxu0 %v2239_v12  ;;  %2280 = vmatpush1.bf16.msra.mxu1 %v2279_v10  ;;  %v1006_v12 = vld [vmem:[#allocation8 + $0x300] sm:$0xff]  ;;  %v873_v10 = vld [vmem:[#allocation8 + $0x1d8] sm:$0xff] }
 0x10b   : > { %2242 = vmatprep.subr.bf16.mxu0 %v2241_v13  ;;  %v851_v13 = vld [vmem:[#allocation8 + $0x128] sm:$0xff]  ;;  %v2343_v24 = vpack.c.bf16 %v1008_v17, %v1006_v12  ;;  %v1028_v12 = vld [vmem:[#allocation8 + $0x3b0] sm:$0xff] }
 0x10c   : > { %v2281_v18 = vpack.c.bf16 %v853_v14, %v851_v13  ;;  %v2301_v13 = vpack.c.bf16 %v873_v10, %v871_v9  ;;  %v870_v14 = vld [vmem:[#allocation8 + $0x1c0] sm:$0xff]  ;;  %v1031_v17 = vld [vmem:[#allocation8 + $0x3c8] sm:$0xff] }
 0x10e   : > { %2244 = vmatpush1.bf16.msra.mxu0 %v2243_v19  ;;  %v850_v19 = vld [vmem:[#allocation8 + $0x120] sm:$0xff]  ;;  %2282 = vmatprep.subr.bf16.mxu1 %v2281_v18  ;;  %v1033_v18 = vld [vmem:[#allocation8 + $0x3d8] sm:$0xff] }
 0x10f   : > { %2310 = vmatprep.subr.bf16.mxu0 %v2309_v20  ;;  %v852_v20 = vld [vmem:[#allocation8 + $0x130] sm:$0xff] }
 0x110   : > { %v2283_v23 = vpack.c.bf16 %v852_v20, %v850_v19  ;;  %v2363_v20 = vpack.c.bf16 %v1028_v12, %v1026_v7  ;;  %v1137_v12 = vld [vmem:[#allocation8 + $0x410] sm:$0xff] }
 0x111   : > { %772 = vmatmul.mubr.f32.vlgmr.msra.gmra.mrb[2].mxu0 %v3232_v8  ;;  %v2325_v8 = vpack.c.bf16 %v993_v42, %v991_v41  ;;  %v1016_v41 = vld [vmem:[#allocation8 + $0x350] sm:$0xff] }
 0x112   : > { %2312 = vmatpush1.bf16.msra.mxu0 %v2311_v25  ;;  %2284 = vmatpush1.bf16.msra.mxu1 %v2283_v23  ;;  %v1010_v25 = vld [vmem:[#allocation8 + $0x320] sm:$0xff]  ;;  %v877_v23 = vld [vmem:[#allocation8 + $0x1f8] sm:$0xff] }
 0x113   : > { %2314 = vmatprep.subr.bf16.mxu0 %v2313_v26  ;;  %v855_v26 = vld [vmem:[#allocation8 + $0x148] sm:$0xff]  ;;  %v2347_v36 = vpack.c.bf16 %v1012_v29, %v1010_v25  ;;  %v1032_v25 = vld [vmem:[#allocation8 + $0x3d0] sm:$0xff] }
 0x114   : > { %v2285_v30 = vpack.c.bf16 %v857_v27, %v855_v26  ;;  %v2305_v26 = vpack.c.bf16 %v877_v23, %v875_v22  ;;  %v874_v27 = vld [vmem:[#allocation8 + $0x1e0] sm:$0xff]  ;;  %v1035_v29 = vld [vmem:[#allocation8 + $0x3e8] sm:$0xff] }
 0x116   : > { %2316 = vmatpush1.bf16.msra.mxu0 %v2315_v31  ;;  %v854_v31 = vld [vmem:[#allocation8 + $0x140] sm:$0xff]  ;;  %2286 = vmatprep.subr.bf16.mxu1 %v2285_v30  ;;  %v1037_v30 = vld [vmem:[#allocation8 + $0x3f8] sm:$0xff] }
 0x117   : > { %2318 = vmatprep.subr.bf16.mxu0 %v2317_v32  ;;  %v856_v32 = vld [vmem:[#allocation8 + $0x150] sm:$0xff] }
 0x118   : > { %v2287_v35 = vpack.c.bf16 %v856_v32, %v854_v31  ;;  %v2367_v32 = vpack.c.bf16 %v1032_v25, %v1030_v21  ;;  %v1141_v25 = vld [vmem:[#allocation8 + $0x430] sm:$0xff] }
 0x11a   : > { %2320 = vmatpush1.bf16.msra.mxu0 %v2319_v37  ;;  %2288 = vmatpush1.bf16.msra.mxu1 %v2287_v35  ;;  %v1014_v37 = vld [vmem:[#allocation8 + $0x340] sm:$0xff]  ;;  %v2369_v35 = vpack.c.bf16 %v1037_v30, %v1035_v29 }
 0x11b   : > { %2322 = vmatprep.subr.bf16.mxu0 %v2321_v38  ;;  %v859_v38 = vld [vmem:[#allocation8 + $0x168] sm:$0xff]  ;;  %v2351_v46 = vpack.c.bf16 %v1016_v41, %v1014_v37  ;;  %v1036_v37 = vld [vmem:[#allocation8 + $0x3f0] sm:$0xff] }
 0x11c   : > { %v2289_v42 = vpack.c.bf16 %v861_v39, %v859_v38  ;;  %v2373_v38 = vpack.c.bf16 %v1138_v34, %v1136_v33  ;;  %v1148_v33 = vld [vmem:[#allocation8 + $0x468] sm:$0xff]  ;;  %v1150_v34 = vld [vmem:[#allocation8 + $0x478] sm:$0xff] }
 0x11e   : > { %2324 = vmatpush1.bf16.msra.mxu0 %v2323_v43  ;;  %v858_v43 = vld [vmem:[#allocation8 + $0x160] sm:$0xff]  ;;  %2290 = vmatprep.subr.bf16.mxu1 %v2289_v42 }
 0x11f   : > { %2326 = vmatprep.subr.bf16.mxu0 %v2325_v8  ;;  %v860_v8 = vld [vmem:[#allocation8 + $0x170] sm:$0xff] }
 0x120   : > { %v2291_v45 = vpack.c.bf16 %v860_v8, %v858_v43 }
 0x122   : > { %2328 = vmatpush1.bf16.msra.mxu0 %v2327_v47  ;;  %2292 = vmatpush1.bf16.msra.mxu1 %v2291_v45  ;;  %v1018_v47 = vld [vmem:[#allocation8 + $0x360] sm:$0xff] }
 0x123   : > { %2330 = vmatprep.subr.bf16.mxu0 %v2329_v48  ;;  %v863_v48 = vld [vmem:[#allocation8 + $0x188] sm:$0xff]  ;;  %v2355_v58 = vpack.c.bf16 %v1020_v51, %v1018_v47 }
 0x124   : > { %v2293_v52 = vpack.c.bf16 %v865_v49, %v863_v48 }
 0x126   : > { %2332 = vmatpush1.bf16.msra.mxu0 %v2331_v53  ;;  %v862_v53 = vld [vmem:[#allocation8 + $0x180] sm:$0xff]  ;;  %2294 = vmatprep.subr.bf16.mxu1 %v2293_v52 }
 0x127   : > { %2334 = vmatprep.subr.bf16.mxu0 %v2333_v56  ;;  %v1025_v56 = vld [vmem:[#allocation8 + $0x398] sm:$0xff]  ;;  %v2295_v57 = vpack.c.bf16 %v864_v54, %v862_v53 }
 0x129   : > { %2296 = vmatpush1.bf16.msra.mxu1 %v2295_v57 }
 0x12a   : > { %2336 = vmatpush1.bf16.msra.mxu0 %v2335_v62  ;;  %v2357_v62 = vpack.c.bf16 %v1025_v56, %v1023_v55  ;;  %2298 = vmatprep.subr.bf16.mxu1 %v2297_v0 }
 0x12b   : > { %2338 = vmatprep.subr.bf16.mxu0 %v2337_v2  ;;  %v868_v2 = vld [vmem:[#allocation8 + $0x1b0] sm:$0xff] }
 0x12c   : > { %v2299_v5 = vpack.c.bf16 %v868_v2, %v866_v1 }
 0x12e   : > { %2340 = vmatpush1.bf16.msra.mxu0 %v2339_v11  ;;  %2300 = vmatpush1.bf16.msra.mxu1 %v2299_v5  ;;  %v2361_v11 = vpack.c.bf16 %v1029_v4, %v1027_v3 }
 0x12f   : > { %2342 = vmatprep.subr.bf16.mxu0 %v2341_v15  ;;  %v872_v15 = vld [vmem:[#allocation8 + $0x1d0] sm:$0xff]  ;;  %2302 = vmatprep.subr.bf16.mxu1 %v2301_v13 }
 0x130   : > { %v2303_v19 = vpack.c.bf16 %v872_v15, %v870_v14  ;;  %v1140_v14 = vld [vmem:[#allocation8 + $0x428] sm:$0xff]  ;;  %v1142_v15 = vld [vmem:[#allocation8 + $0x438] sm:$0xff] }
 0x131   : > { %v2377_v23 = vpack.c.bf16 %v1142_v15, %v1140_v14  ;;  %v1172_v14 = vld [vmem:[#allocation8 + $0x528] sm:$0xff]  ;;  %v1174_v15 = vld [vmem:[#allocation8 + $0x538] sm:$0xff] }
 0x132   : > { %2344 = vmatpush1.bf16.msra.mxu0 %v2343_v24  ;;  %2304 = vmatpush1.bf16.msra.mxu1 %v2303_v19  ;;  %v2365_v24 = vpack.c.bf16 %v1033_v18, %v1031_v17 }
 0x133   : > { %2346 = vmatprep.subr.bf16.mxu0 %v2345_v28  ;;  %v876_v28 = vld [vmem:[#allocation8 + $0x1f0] sm:$0xff]  ;;  %2306 = vmatprep.subr.bf16.mxu1 %v2305_v26 }
 0x134   : > { %v2307_v31 = vpack.c.bf16 %v876_v28, %v874_v27  ;;  %v1144_v27 = vld [vmem:[#allocation8 + $0x448] sm:$0xff]  ;;  %v1146_v28 = vld [vmem:[#allocation8 + $0x458] sm:$0xff] }
 0x135   : > { %v2381_v30 = vpack.c.bf16 %v1146_v28, %v1144_v27 }
 0x136   : > { %2348 = vmatpush1.bf16.msra.mxu0 %v2347_v36  ;;  %2308 = vmatpush1.bf16.msra.mxu1 %v2307_v31  ;;  %v1034_v36 = vld [vmem:[#allocation8 + $0x3e0] sm:$0xff] }
 0x137   : > { %2350 = vmatprep.subr.bf16.mxu0 %v2349_v40  ;;  %2374 = vmatprep.subr.bf16.mxu1 %v2373_v38  ;;  %v2371_v39 = vpack.c.bf16 %v1036_v37, %v1034_v36  ;;  %v535_v40 = vlaneseq  ;;  %v1143_v31 = vld [vmem:[#allocation8 + $0x440] sm:$0xff]  ;;  %v2385_v36 = vpack.c.bf16 %v1150_v34, %v1148_v33  ;;  %v1149_v38 = vld [vmem:[#allocation8 + $0x470] sm:$0xff]  ;;  %v1180_v34 = vld [vmem:[#allocation8 + $0x568] sm:$0xff] }
 0x138   : > { %v1147_v37 = vld [vmem:[#allocation8 + $0x460] sm:$0xff]  ;;  %v1177_v33 = vld [vmem:[#allocation8 + $0x550] sm:$0xff] }
 0x139   : > { %v3238_v41 = vshrl.u32 %v535_v40, 7  ;;  %v1154_v40 = vld [vmem:[#allocation8 + $0x498] sm:$0xff] }
 0x13a   : > { %2352 = vmatpush1.bf16.msra.mxu0 %v2351_v46 }
 0x13b   : > { %2354 = vmatprep.subr.bf16.mxu0 %v2353_v50  ;;  %v3241_v42 = vsub.s32 0, %v3238_v41  ;;  %v3244_v43 = vsub.s32 2, %v3238_v41  ;;  %v3247_v8 = vsub.s32 1, %v3238_v41  ;;  %v3255_v16 = vsub.s32 3, %v3238_v41 }
 0x13d   : > { %v538_v45 = vrot.slane %v3252_v44, %v3241_v42  ;;  %v546_v46 = vrot.slane %v3252_v44, %v3244_v43  ;;  %v542_v47 = vrot.slane %v3252_v44, %v3247_v8  ;;  %v550_v48 = vrot.slane %v3252_v44, %v3255_v16 }
 0x13e   : > { %2356 = vmatpush1.bf16.msra.mxu0 %v2355_v58 }
 0x13f   : > { %2358 = vmatprep.subr.bf16.mxu0 %v2357_v62 }
 0x142   : > { %2360 = vmatpush1.bf16.msra.mxu0 %v2359_v6 }
 0x143   : > { %2362 = vmatprep.subr.bf16.mxu0 %v2361_v11  ;;  %v1135_v11 = vld [vmem:[#allocation8 + $0x400] sm:$0xff] }
 0x144   : > { %v2375_v21 = vpack.c.bf16 %v1137_v12, %v1135_v11  ;;  %v1167_v12 = vld [vmem:[#allocation8 + $0x500] sm:$0xff] }
 0x146   : > { %2364 = vmatpush1.bf16.msra.mxu0 %v2363_v20 }
 0x147   : > { %2366 = vmatprep.subr.bf16.mxu0 %v2365_v24  ;;  %v1139_v24 = vld [vmem:[#allocation8 + $0x420] sm:$0xff] }
 0x148   : > { %v2379_v29 = vpack.c.bf16 %v1141_v25, %v1139_v24  ;;  %v1173_v24 = vld [vmem:[#allocation8 + $0x530] sm:$0xff] }
 0x14a   : > { %2368 = vmatpush1.bf16.msra.mxu0 %v2367_v32  ;;  %v1145_v32 = vld [vmem:[#allocation8 + $0x450] sm:$0xff] }
 0x14b   : > { %2370 = vmatprep.subr.bf16.mxu0 %v2369_v35  ;;  %v2383_v35 = vpack.c.bf16 %v1145_v32, %v1143_v31  ;;  %v1175_v32 = vld [vmem:[#allocation8 + $0x540] sm:$0xff] }
 0x14e   : > { %2372 = vmatpush1.bf16.msra.mxu0 %v2371_v39  ;;  %v1152_v39 = vld [vmem:[#allocation8 + $0x488] sm:$0xff] }
 0x1a4   : > { %v631_v49 = vpop.f32.mrb[0].mxu0 }
 0x1a5   : > { %v632_v50 = vadd.f32 %v631_v49, %v538_v45  ;;  %v702_v51 = vpop.f32.mrb[0].mxu1  ;;  %v633_v52 = vpop.f32.mrb[1].mxu0  ;;  %v2387_v45 = vpack.c.bf16 %v1149_v38, %v1147_v37  ;;  %v1156_v49 = vld [vmem:[#allocation8 + $0x4a8] sm:$0xff]  ;;  %v1179_v38 = vld [vmem:[#allocation8 + $0x560] sm:$0xff] }
 0x1a6   : > { %v703_v53 = vadd.f32 %v702_v51, %v546_v46  ;;  %v634_v54 = vadd.f32 %v633_v52, %v542_v47  ;;  %v704_v55 = vpop.f32.mrb[1].mxu1  ;;  %v2389_v46 = vpack.c.bf16 %v1154_v40, %v1152_v39  ;;  %v1151_v47 = vld [vmem:[#allocation8 + $0x480] sm:$0xff]  ;;  %v1181_v39 = vld [vmem:[#allocation8 + $0x570] sm:$0xff]  ;;  %v1184_v40 = vld [vmem:[#allocation8 + $0x588] sm:$0xff] }
 0x1a7   : > { %v778_v56 = vsub.f32 0.0, %v632_v50  ;;  %v705_v57 = vadd.f32 %v704_v55, %v550_v48  ;;  %v1153_v48 = vld [vmem:[#allocation8 + $0x490] sm:$0xff]  ;;  %v1160_v55 = vld [vmem:[#allocation8 + $0x4c8] sm:$0xff] }
 0x1a8   : > { %v780_v58 = vsub.f32 0.0, %v703_v53  ;;  %v779_v59 = vsub.f32 0.0, %v634_v54  ;;  %v2391_v51 = vpack.c.bf16 %v1153_v48, %v1151_v47  ;;  %v1183_v48 = vld [vmem:[#allocation8 + $0x580] sm:$0xff] }
 0x1a9   : > { %v784_v60 = vmul.f32 1.442695, %v778_v56  ;;  %v781_v61 = vsub.f32 0.0, %v705_v57  ;;  %v1162_v56 = vld [vmem:[#allocation8 + $0x4d8] sm:$0xff] }
 0x1aa   : > { %v788_v62 = vmul.f32 1.442695, %v780_v58  ;;  %v786_v63 = vmul.f32 1.442695, %v779_v59  ;;  %v2397_v58 = vpack.c.bf16 %v1162_v56, %v1160_v55  ;;  %v1159_v59 = vld [vmem:[#allocation8 + $0x4c0] sm:$0xff] }
 0x1ab   : > { %2713 = vpow2.f32 %v784_v60  ;;  %v790_v0 = vmul.f32 1.442695, %v781_v61  ;;  %v1161_v60 = vld [vmem:[#allocation8 + $0x4d0] sm:$0xff]  ;;  %v1164_v61 = vld [vmem:[#allocation8 + $0x4e8] sm:$0xff] }
 0x1ac   : > { %2715 = vpow2.f32 %v788_v62  ;;  %v1166_v62 = vld [vmem:[#allocation8 + $0x4f8] sm:$0xff] }
 0x1ad   : > { %2717 = vpow2.f32 %v786_v63  ;;  %v2399_v63 = vpack.c.bf16 %v1161_v60, %v1159_v59  ;;  %v1192_v60 = vld [vmem:[#allocation8 + $0x5c8] sm:$0xff] }
 0x1ae   : > { %2719 = vpow2.f32 %v790_v0  ;;  %v3266_v0 = vsub.s32 4, %v3238_v41 }
 0x1b5   : > { %v2714_v1 = vpop.eup %2713 }
 0x1b6   : > { %v2716_v2 = vpop.eup %2715  ;;  %v796_v3 = vadd.f32 1.0, %v2714_v1  ;;  %v2401_v1 = vpack.c.bf16 %v1166_v62, %v1164_v61  ;;  %v1194_v61 = vld [vmem:[#allocation8 + $0x5d8] sm:$0xff] }
 0x1b7   : > { %v2718_v4 = vpop.eup %2717  ;;  %v798_v5 = vadd.f32 1.0, %v2716_v2  ;;  %v1163_v2 = vld [vmem:[#allocation8 + $0x4e0] sm:$0xff] }
 0x1b8   : > { %v2720_v6 = vpop.eup %2719  ;;  %2721 = vrcp.f32 %v796_v3  ;;  %v797_v7 = vadd.f32 1.0, %v2718_v4  ;;  %v1165_v3 = vld [vmem:[#allocation8 + $0x4f0] sm:$0xff]  ;;  %v3269_v4 = vsub.s32 5, %v3238_v41 }
 0x1b9   : > { %2723 = vrcp.f32 %v798_v5  ;;  %v799_v9 = vadd.f32 1.0, %v2720_v6  ;;  %v1168_v5 = vld [vmem:[#allocation8 + $0x508] sm:$0xff]  ;;  %v1170_v6 = vld [vmem:[#allocation8 + $0x518] sm:$0xff] }
 0x1ba   : > { %2725 = vrcp.f32 %v797_v7  ;;  %v554_v7 = vrot.slane %v3252_v44, %v3266_v0  ;;  %v2405_v11 = vpack.c.bf16 %v1170_v6, %v1168_v5  ;;  %v1198_v5 = vld [vmem:[#allocation8 + $0x5f8] sm:$0xff] }
 0x1bb   : > { %2727 = vrcp.f32 %v799_v9  ;;  %v2403_v9 = vpack.c.bf16 %v1165_v3, %v1163_v2  ;;  %v1193_v2 = vld [vmem:[#allocation8 + $0x5d0] sm:$0xff]  ;;  %v1196_v3 = vld [vmem:[#allocation8 + $0x5e8] sm:$0xff] }
 0x1c2   : > { %v2722_v10 = vpop.eup %2721 }
 0x1c3   : > { %v2724_v13 = vpop.eup %2723  ;;  %v808_v18 = vmul.f32 %v2722_v10, %v632_v50  ;;  %v1158_v50 = vld [vmem:[#allocation8 + $0x4b8] sm:$0xff]  ;;  %v558_v10 = vrot.slane %v3252_v44, %v3269_v4  ;;  %v1176_v44 = vld [vmem:[#allocation8 + $0x548] sm:$0xff] }
 0x1c4   : > { %v2726_v17 = vpop.eup %2725  ;;  %v810_v26 = vmul.f32 %v2724_v13, %v703_v53  ;;  %v2393_v52 = vpack.c.bf16 %v1158_v50, %v1156_v49  ;;  %v1155_v53 = vld [vmem:[#allocation8 + $0x4a0] sm:$0xff]  ;;  %v1169_v13 = vld [vmem:[#allocation8 + $0x510] sm:$0xff]  ;;  %v1188_v50 = vld [vmem:[#allocation8 + $0x5a8] sm:$0xff] }
 0x1c5   : > { %v2728_v19 = vpop.eup %2727  ;;  %v809_v20 = vmul.f32 %v2726_v17, %v634_v54  ;;  %v1157_v54 = vld [vmem:[#allocation8 + $0x4b0] sm:$0xff] }
 0x1c6   : > { %v811_v22 = vmul.f32 %v2728_v19, %v705_v57  ;;  %v2395_v57 = vpack.c.bf16 %v1157_v54, %v1155_v53  ;;  %v1185_v49 = vld [vmem:[#allocation8 + $0x590] sm:$0xff] }
 0x1c7   : > { %954 = vmatprep.mubr.f32.mxu1 %v809_v20  ;;  %v2407_v20 = vpack.c.bf16 %v1169_v13, %v1167_v12  ;;  %v2423_v53 = vpack.c.bf16 %v1185_v49, %v1183_v48  ;;  %v1458_v48 = vld [vmem:[#allocation9 + $0x90] sm:$0xff]  ;;  %v1461_v49 = vld [vmem:[#allocation9 + $0xa8] sm:$0xff] }
 0x1c8   : > { %1115 = vmatprep.mubr.f32.mxu0 %v811_v22  ;;  %955 = vmatmul.mubr.f32.vlgmr.msra.gmra.mrb[2].mxu1 %v808_v18  ;;  %v2409_v22 = vpack.c.bf16 %v1174_v15, %v1172_v14 }
 0x1c9   : > { %1116 = vmatmul.mubr.f32.vlgmr.msra.gmra.mrb[4].mxu0 %v810_v26  ;;  %2376 = vmatpush1.bf16.msra.mxu1 %v2375_v21  ;;  %v1178_v26 = vld [vmem:[#allocation8 + $0x558] sm:$0xff] }
 0x1ca   : > { %2378 = vmatprep.subr.bf16.mxu1 %v2377_v23  ;;  %v1171_v23 = vld [vmem:[#allocation8 + $0x520] sm:$0xff]  ;;  %v2413_v31 = vpack.c.bf16 %v1178_v26, %v1176_v44 }
 0x1cd   : > { %2380 = vmatpush1.bf16.msra.mxu1 %v2379_v29  ;;  %v2411_v29 = vpack.c.bf16 %v1173_v24, %v1171_v23  ;;  %v1442_v23 = vld [vmem:[#allocation9 + $0x10] sm:$0xff]  ;;  %v1445_v24 = vld [vmem:[#allocation9 + $0x28] sm:$0xff] }
 0x1ce   : > { %2382 = vmatprep.subr.bf16.mxu1 %v2381_v30 }
 0x1d1   : > { %2384 = vmatpush1.bf16.msra.mxu1 %v2383_v35  ;;  %v1182_v35 = vld [vmem:[#allocation8 + $0x578] sm:$0xff] }
 0x1d2   : > { %2386 = vmatprep.subr.bf16.mxu1 %v2385_v36  ;;  %v2415_v36 = vpack.c.bf16 %v1177_v33, %v1175_v32  ;;  %v2417_v37 = vpack.c.bf16 %v1182_v35, %v1180_v34  ;;  %v1450_v32 = vld [vmem:[#allocation9 + $0x50] sm:$0xff]  ;;  %v1453_v33 = vld [vmem:[#allocation9 + $0x68] sm:$0xff]  ;;  %v1455_v34 = vld [vmem:[#allocation9 + $0x78] sm:$0xff] }
 0x1d5   : > { %2388 = vmatpush1.bf16.msra.mxu1 %v2387_v45  ;;  %v1186_v45 = vld [vmem:[#allocation8 + $0x598] sm:$0xff] }
 0x1d6   : > { %2390 = vmatprep.subr.bf16.mxu1 %v2389_v46  ;;  %v2419_v46 = vpack.c.bf16 %v1181_v39, %v1179_v38  ;;  %v2421_v47 = vpack.c.bf16 %v1186_v45, %v1184_v40  ;;  %v1454_v38 = vld [vmem:[#allocation9 + $0x70] sm:$0xff]  ;;  %v1457_v39 = vld [vmem:[#allocation9 + $0x88] sm:$0xff]  ;;  %v1459_v40 = vld [vmem:[#allocation9 + $0x98] sm:$0xff] }
 0x1d9   : > { %2392 = vmatpush1.bf16.msra.mxu1 %v2391_v51  ;;  %v1190_v51 = vld [vmem:[#allocation8 + $0x5b8] sm:$0xff] }
 0x1da   : > { %2394 = vmatprep.subr.bf16.mxu1 %v2393_v52  ;;  %v2425_v56 = vpack.c.bf16 %v1190_v51, %v1188_v50  ;;  %v1463_v50 = vld [vmem:[#allocation9 + $0xb8] sm:$0xff] }
 0x1dd   : > { %2396 = vmatpush1.bf16.msra.mxu1 %v2395_v57  ;;  %v1187_v57 = vld [vmem:[#allocation8 + $0x5a0] sm:$0xff] }
 0x1de   : > { %2398 = vmatprep.subr.bf16.mxu1 %v2397_v58  ;;  %v1189_v58 = vld [vmem:[#allocation8 + $0x5b0] sm:$0xff] }
 0x1df   : > { %v2427_v62 = vpack.c.bf16 %v1189_v58, %v1187_v57 }
 0x1e1   : > { %2400 = vmatpush1.bf16.msra.mxu1 %v2399_v63  ;;  %v2429_v63 = vpack.c.bf16 %v1194_v61, %v1192_v60  ;;  %v1466_v60 = vld [vmem:[#allocation9 + $0xd0] sm:$0xff]  ;;  %v1469_v61 = vld [vmem:[#allocation9 + $0xe8] sm:$0xff] }
 0x1e2   : > { %2402 = vmatprep.subr.bf16.mxu1 %v2401_v1  ;;  %v1191_v1 = vld [vmem:[#allocation8 + $0x5c0] sm:$0xff] }
 0x1e3   : > { %v2431_v6 = vpack.c.bf16 %v1193_v2, %v1191_v1  ;;  %v1468_v2 = vld [vmem:[#allocation9 + $0xe0] sm:$0xff] }
 0x1e4   : > { %v773_v17 = vpop.f32.mrb[2].mxu0 }
 0x1e5   : > { %v3275_v18 = vadd.f32 %v773_v17, %v554_v7  ;;  %2404 = vmatpush1.bf16.msra.mxu1 %v2403_v9  ;;  %v775_v19 = vpop.f32.mrb[3].mxu0  ;;  %v2433_v7 = vpack.c.bf16 %v1198_v5, %v1196_v3  ;;  %v1195_v9 = vld [vmem:[#allocation8 + $0x5e0] sm:$0xff]  ;;  %v1441_v17 = vld [vmem:[#allocation9 + $0x8] sm:$0xff]  ;;  %v1470_v3 = vld [vmem:[#allocation9 + $0xf0] sm:$0xff] }
 0x1e6   : > { %v3277_v21 = vadd.f32 %v775_v19, %v558_v10  ;;  %2406 = vmatprep.subr.bf16.mxu1 %v2405_v11  ;;  %v1197_v10 = vld [vmem:[#allocation8 + $0x5f0] sm:$0xff]  ;;  %v1443_v19 = vld [vmem:[#allocation9 + $0x18] sm:$0xff]  ;;  %v1473_v5 = vld [vmem:[#allocation9 + $0x108] sm:$0xff] }
 0x1e7   : > { %v782_v25 = vsub.f32 0.0, %v3275_v18  ;;  %v2435_v11 = vpack.c.bf16 %v1197_v10, %v1195_v9  ;;  %v2467_v9 = vpack.c.bf16 %v1470_v3, %v1468_v2  ;;  %v1492_v2 = vld [vmem:[#allocation9 + $0x1a0] sm:$0xff]  ;;  %v1494_v3 = vld [vmem:[#allocation9 + $0x1b0] sm:$0xff] }
 0x1e8   : > { %v783_v27 = vsub.f32 0.0, %v3277_v21 }
 0x1e9   : > { %v792_v28 = vmul.f32 1.442695, %v782_v25  ;;  %2408 = vmatpush1.bf16.msra.mxu1 %v2407_v20  ;;  %v1440_v20 = vld [vmem:[#allocation9] sm:$0xff]  ;;  %v1447_v25 = vld [vmem:[#allocation9 + $0x38] sm:$0xff] }
 0x1ea   : > { %v794_v30 = vmul.f32 1.442695, %v783_v27  ;;  %2410 = vmatprep.subr.bf16.mxu1 %v2409_v22  ;;  %v2437_v22 = vpack.c.bf16 %v1443_v19, %v1441_v17  ;;  %v2439_v44 = vpack.c.bf16 %v1442_v23, %v1440_v20  ;;  %v2441_v26 = vpack.c.bf16 %v1447_v25, %v1445_v24  ;;  %v1444_v27 = vld [vmem:[#allocation9 + $0x20] sm:$0xff] }
 0x1eb   : > { %2729 = vpow2.f32 %v792_v28  ;;  %v1446_v28 = vld [vmem:[#allocation9 + $0x30] sm:$0xff]  ;;  %v1476_v25 = vld [vmem:[#allocation9 + $0x120] sm:$0xff] }
 0x1ec   : > { %2731 = vpow2.f32 %v794_v30  ;;  %2438 = vmatprep.subr.bf16.mxu0 %v2437_v22  ;;  %v1451_v30 = vld [vmem:[#allocation9 + $0x58] sm:$0xff] }
 0x1ed   : > { %2412 = vmatpush1.bf16.msra.mxu1 %v2411_v29  ;;  %v1449_v29 = vld [vmem:[#allocation9 + $0x48] sm:$0xff]  ;;  %2440 = vmatpush1.bf16.msra.mxu0 %v2439_v44  ;;  %v1478_v44 = vld [vmem:[#allocation9 + $0x130] sm:$0xff] }
 0x1ee   : > { %2414 = vmatprep.subr.bf16.mxu1 %v2413_v31  ;;  %2442 = vmatprep.subr.bf16.mxu0 %v2441_v26  ;;  %v1448_v31 = vld [vmem:[#allocation9 + $0x40] sm:$0xff] }
 0x1ef   : > { %v2447_v35 = vpack.c.bf16 %v1450_v32, %v1448_v31 }
 0x1f1   : > { %2416 = vmatpush1.bf16.msra.mxu1 %v2415_v36  ;;  %v2449_v36 = vpack.c.bf16 %v1455_v34, %v1453_v33 }
 0x1f2   : > { %2418 = vmatprep.subr.bf16.mxu1 %v2417_v37  ;;  %v1452_v37 = vld [vmem:[#allocation9 + $0x60] sm:$0xff] }
 0x1f3   : > { %v2451_v45 = vpack.c.bf16 %v1454_v38, %v1452_v37  ;;  %v1483_v37 = vld [vmem:[#allocation9 + $0x158] sm:$0xff]  ;;  %v1480_v38 = vld [vmem:[#allocation9 + $0x140] sm:$0xff] }
 0x1f5   : > { %v2730_v52 = vpop.eup %2729  ;;  %2420 = vmatpush1.bf16.msra.mxu1 %v2419_v46  ;;  %v2453_v46 = vpack.c.bf16 %v1459_v40, %v1457_v39  ;;  %v1482_v40 = vld [vmem:[#allocation9 + $0x150] sm:$0xff] }
 0x1f6   : > { %v2732_v54 = vpop.eup %2731  ;;  %v800_v55 = vadd.f32 1.0, %v2730_v52  ;;  %2422 = vmatprep.subr.bf16.mxu1 %v2421_v47  ;;  %v1456_v47 = vld [vmem:[#allocation9 + $0x80] sm:$0xff]  ;;  %v2457_v52 = vpack.c.bf16 %v1463_v50, %v1461_v49  ;;  %v1486_v50 = vld [vmem:[#allocation9 + $0x170] sm:$0xff] }
 0x1f7   : > { %v801_v59 = vadd.f32 1.0, %v2732_v54  ;;  %v2455_v51 = vpack.c.bf16 %v1458_v48, %v1456_v47  ;;  %v1462_v54 = vld [vmem:[#allocation9 + $0xb0] sm:$0xff]  ;;  %v1487_v47 = vld [vmem:[#allocation9 + $0x178] sm:$0xff]  ;;  %v1484_v49 = vld [vmem:[#allocation9 + $0x160] sm:$0xff] }
 0x1f8   : > { %2733 = vrcp.f32 %v800_v55  ;;  %v1465_v55 = vld [vmem:[#allocation9 + $0xc8] sm:$0xff] }
 0x1f9   : > { %2735 = vrcp.f32 %v801_v59  ;;  %2424 = vmatpush1.bf16.msra.mxu1 %v2423_v53  ;;  %v1460_v53 = vld [vmem:[#allocation9 + $0xa0] sm:$0xff] }
 0x1fa   : > { %2426 = vmatprep.subr.bf16.mxu1 %v2425_v56  ;;  %v1467_v56 = vld [vmem:[#allocation9 + $0xd8] sm:$0xff]  ;;  %v2459_v57 = vpack.c.bf16 %v1462_v54, %v1460_v53  ;;  %v1464_v59 = vld [vmem:[#allocation9 + $0xc0] sm:$0xff]  ;;  %v1489_v54 = vld [vmem:[#allocation9 + $0x188] sm:$0xff] }
 0x1fb   : > { %v2461_v58 = vpack.c.bf16 %v1467_v56, %v1465_v55  ;;  %v1491_v55 = vld [vmem:[#allocation9 + $0x198] sm:$0xff] }
 0x1fd   : > { %2428 = vmatpush1.bf16.msra.mxu1 %v2427_v62  ;;  %v1471_v62 = vld [vmem:[#allocation9 + $0xf8] sm:$0xff] }
 0x1fe   : > { %2430 = vmatprep.subr.bf16.mxu1 %v2429_v63  ;;  %v2463_v63 = vpack.c.bf16 %v1466_v60, %v1464_v59  ;;  %v2465_v1 = vpack.c.bf16 %v1471_v62, %v1469_v61  ;;  %v1490_v59 = vld [vmem:[#allocation9 + $0x190] sm:$0xff]  ;;  %v1493_v62 = vld [vmem:[#allocation9 + $0x1a8] sm:$0xff] }
 0x201   : > { %2432 = vmatpush1.bf16.msra.mxu1 %v2431_v6  ;;  %v1475_v6 = vld [vmem:[#allocation9 + $0x118] sm:$0xff] }
 0x202   : > { %v2734_v12 = vpop.eup %2733  ;;  %2434 = vmatprep.subr.bf16.mxu1 %v2433_v7  ;;  %v2042_v7 = vld [vmem:[%s3469_s4 + $0x2] sm:$0x3]  ;;  %v2469_v10 = vpack.c.bf16 %v1475_v6, %v1473_v5  ;;  %v2491_v5 = vpack.c.bf16 %v1494_v3, %v1492_v2  ;;  %v1497_v6 = vld [vmem:[#allocation9 + $0x1c8] sm:$0xff]  ;;  %v1627_v2 = vld [vmem:[#allocation9 + $0x2d8] sm:$0xff] }
 0x203   : > { %v2736_v13 = vpop.eup %2735  ;;  %v812_v14 = vmul.f32 %v2734_v12, %v3275_v18  ;;  %v2443_v18 = vpack.c.bf16 %v1446_v28, %v1444_v27  ;;  %v1474_v12 = vld [vmem:[#allocation9 + $0x110] sm:$0xff]  ;;  %v1048_v17 = vrot.slane %v2042_v7, %v3247_v8 }
 0x204   : > { %v813_v15 = vmul.f32 %v2736_v13, %v3277_v21  ;;  %v2445_v21 = vpack.c.bf16 %v1451_v30, %v1449_v29  ;;  %v1044_v13 = vrot.slane %v2042_v7, %v3241_v42  ;;  %v2475_v30 = vpack.c.bf16 %v1478_v44, %v1476_v25  ;;  %v1499_v7 = vld [vmem:[#allocation9 + $0x1d8] sm:$0xff]  ;;  %v1600_v44 = vld [vmem:[#allocation9 + $0x200] sm:$0xff] }
 0x205   : > { %2436 = vmatpush1.bf16.msra.mxu1 %v2435_v11  ;;  %2444 = vmatpush1.bf16.msra.mxu0 %v2443_v18  ;;  %v1472_v11 = vld [vmem:[#allocation9 + $0x100] sm:$0xff]  ;;  %v1603_v25 = vld [vmem:[#allocation9 + $0x218] sm:$0xff] }
 0x206   : > { %1276 = vmatprep.mubr.f32.mxu1 %v813_v15  ;;  %2446 = vmatprep.subr.bf16.mxu0 %v2445_v21  ;;  %v1479_v15 = vld [vmem:[#allocation9 + $0x138] sm:$0xff]  ;;  %v2471_v20 = vpack.c.bf16 %v1474_v12, %v1472_v11  ;;  %v1498_v11 = vld [vmem:[#allocation9 + $0x1d0] sm:$0xff]  ;;  %v1501_v12 = vld [vmem:[#allocation9 + $0x1e8] sm:$0xff] }
 0x208   : > { %1277 = vmatmul.mubr.f32.vlgmr.msra.gmra.mrb[4].mxu1 %v812_v14  ;;  %v1477_v14 = vld [vmem:[#allocation9 + $0x128] sm:$0xff] }
 0x209   : > { %2448 = vmatpush1.bf16.msra.mxu0 %v2447_v35  ;;  %v2473_v24 = vpack.c.bf16 %v1479_v15, %v1477_v14 }
 0x20a   : > { %2450 = vmatprep.subr.bf16.mxu0 %v2449_v36  ;;  %v1481_v36 = vld [vmem:[#allocation9 + $0x148] sm:$0xff] }
 0x20b   : > { %v2477_v39 = vpack.c.bf16 %v1483_v37, %v1481_v36  ;;  %v1608_v36 = vld [vmem:[#allocation9 + $0x240] sm:$0xff]  ;;  %v1610_v37 = vld [vmem:[#allocation9 + $0x250] sm:$0xff] }
 0x20d   : > { %2452 = vmatpush1.bf16.msra.mxu0 %v2451_v45  ;;  %v2479_v45 = vpack.c.bf16 %v1482_v40, %v1480_v38  ;;  %v1613_v38 = vld [vmem:[#allocation9 + $0x268] sm:$0xff]  ;;  %v2511_v40 = vpack.c.bf16 %v1610_v37, %v1608_v36 }
 0x20e   : > { %2454 = vmatprep.subr.bf16.mxu0 %v2453_v46  ;;  %v1485_v46 = vld [vmem:[#allocation9 + $0x168] sm:$0xff] }
 0x20f   : > { %v2481_v48 = vpack.c.bf16 %v1487_v47, %v1485_v46  ;;  %v1612_v46 = vld [vmem:[#allocation9 + $0x260] sm:$0xff]  ;;  %v1614_v47 = vld [vmem:[#allocation9 + $0x270] sm:$0xff] }
 0x211   : > { %2456 = vmatpush1.bf16.msra.mxu0 %v2455_v51  ;;  %v2483_v51 = vpack.c.bf16 %v1486_v50, %v1484_v49  ;;  %v1619_v49 = vld [vmem:[#allocation9 + $0x298] sm:$0xff]  ;;  %v2515_v50 = vpack.c.bf16 %v1614_v47, %v1612_v46 }
 0x212   : > { %2458 = vmatprep.subr.bf16.mxu0 %v2457_v52 }
 0x215   : > { %2460 = vmatpush1.bf16.msra.mxu0 %v2459_v57  ;;  %v2485_v57 = vpack.c.bf16 %v1491_v55, %v1489_v54  ;;  %v1618_v54 = vld [vmem:[#allocation9 + $0x290] sm:$0xff]  ;;  %v1621_v55 = vld [vmem:[#allocation9 + $0x2a8] sm:$0xff] }
 0x216   : > { %2462 = vmatprep.subr.bf16.mxu0 %v2461_v58  ;;  %v1488_v58 = vld [vmem:[#allocation9 + $0x180] sm:$0xff] }
 0x217   : > { %v2487_v60 = vpack.c.bf16 %v1490_v59, %v1488_v58 }
 0x219   : > { %2464 = vmatpush1.bf16.msra.mxu0 %v2463_v63  ;;  %v1495_v63 = vld [vmem:[#allocation9 + $0x1b8] sm:$0xff] }
 0x21a   : > { %2466 = vmatprep.subr.bf16.mxu0 %v2465_v1  ;;  %v2489_v1 = vpack.c.bf16 %v1495_v63, %v1493_v62  ;;  %v1622_v62 = vld [vmem:[#allocation9 + $0x2b0] sm:$0xff] }
 0x21d   : > { %2468 = vmatpush1.bf16.msra.mxu0 %v2467_v9  ;;  %v1496_v9 = vld [vmem:[#allocation9 + $0x1c0] sm:$0xff] }
 0x21e   : > { %2470 = vmatprep.subr.bf16.mxu0 %v2469_v10  ;;  %v2493_v10 = vpack.c.bf16 %v1499_v7, %v1497_v6  ;;  %v2495_v14 = vpack.c.bf16 %v1498_v11, %v1496_v9  ;;  %v1624_v6 = vld [vmem:[#allocation9 + $0x2c0] sm:$0xff]  ;;  %v1626_v7 = vld [vmem:[#allocation9 + $0x2d0] sm:$0xff]  ;;  %v1629_v9 = vld [vmem:[#allocation9 + $0x2e8] sm:$0xff] }
 0x21f   : > { %v2527_v11 = vpack.c.bf16 %v1626_v7, %v1624_v6 }
 0x221   : > { %2472 = vmatpush1.bf16.msra.mxu0 %v2471_v20  ;;  %v1502_v20 = vld [vmem:[#allocation9 + $0x1f0] sm:$0xff] }
 0x222   : > { %2474 = vmatprep.subr.bf16.mxu0 %v2473_v24  ;;  %v1601_v24 = vld [vmem:[#allocation9 + $0x208] sm:$0xff] }
 0x225   : > { %2476 = vmatpush1.bf16.msra.mxu0 %v2475_v30 }
 0x226   : > { %2478 = vmatprep.subr.bf16.mxu0 %v2477_v39  ;;  %v1615_v39 = vld [vmem:[#allocation9 + $0x278] sm:$0xff] }
 0x229   : > { %2480 = vmatpush1.bf16.msra.mxu0 %v2479_v45  ;;  %v2513_v45 = vpack.c.bf16 %v1615_v39, %v1613_v38 }
 0x22a   : > { %2482 = vmatprep.subr.bf16.mxu0 %v2481_v48  ;;  %v1617_v48 = vld [vmem:[#allocation9 + $0x288] sm:$0xff] }
 0x22d   : > { %2484 = vmatpush1.bf16.msra.mxu0 %v2483_v51  ;;  %v2517_v51 = vpack.c.bf16 %v1619_v49, %v1617_v48 }
 0x22e   : > { %2486 = vmatprep.subr.bf16.mxu0 %v2485_v57 }
 0x231   : > { %2488 = vmatpush1.bf16.msra.mxu0 %v2487_v60  ;;  %v1620_v60 = vld [vmem:[#allocation9 + $0x2a0] sm:$0xff] }
 0x232   : > { %2490 = vmatprep.subr.bf16.mxu0 %v2489_v1  ;;  %v1625_v1 = vld [vmem:[#allocation9 + $0x2c8] sm:$0xff]  ;;  %v2523_v3 = vpack.c.bf16 %v1622_v62, %v1620_v60 }
 0x235   : > { %2492 = vmatpush1.bf16.msra.mxu0 %v2491_v5  ;;  %v2525_v5 = vpack.c.bf16 %v1627_v2, %v1625_v1 }
 0x236   : > { %2494 = vmatprep.subr.bf16.mxu0 %v2493_v10  ;;  %v1631_v10 = vld [vmem:[#allocation9 + $0x2f8] sm:$0xff] }
 0x239   : > { %2496 = vmatpush1.bf16.msra.mxu0 %v2495_v14 }
 0x29b   : > { %v3288_v19 = vpop.f32.mrb[2].mxu1 }
 0x29c   : > { %v1117_v22 = vpop.f32.mrb[4].mxu0  ;;  %v3290_v23 = vpop.f32.mrb[3].mxu1 }
 0x29d   : > { %v1118_v26 = vadd.f32 %v1117_v22, %v1044_v13  ;;  %v1119_v27 = vpop.f32.mrb[5].mxu0  ;;  %v1503_v13 = vld [vmem:[#allocation9 + $0x1f8] sm:$0xff] }
 0x29e   : > { %v1120_v28 = vadd.f32 %v1119_v27, %v1048_v17  ;;  %v2497_v15 = vpack.c.bf16 %v1503_v13, %v1501_v12  ;;  %v1500_v17 = vld [vmem:[#allocation9 + $0x1e0] sm:$0xff]  ;;  %v1602_v27 = vld [vmem:[#allocation9 + $0x210] sm:$0xff]  ;;  %v2529_v12 = vpack.c.bf16 %v1631_v10, %v1629_v9 }
 0x29f   : > { %v1122_v29 = vsub.f32 0.0, %v1118_v26  ;;  %v2499_v22 = vpack.c.bf16 %v1502_v20, %v1500_v17  ;;  %v2503_v30 = vpack.c.bf16 %v1602_v27, %v1600_v44  ;;  %v2043_v13 = vld [vmem:[%s3469_s4 + $0x4] sm:$0x3] }
 0x2a0   : > { %v1123_v18 = vsub.f32 0.0, %v1120_v28  ;;  %2498 = vmatprep.subr.bf16.mxu0 %v2497_v15  ;;  %v1205_v14 = vrot.slane %v2043_v13, %v3241_v42  ;;  %v1209_v15 = vrot.slane %v2043_v13, %v3247_v8 }
 0x2a1   : > { %v1124_v21 = vmul.f32 1.442695, %v1122_v29  ;;  %2500 = vmatpush1.bf16.msra.mxu0 %v2499_v22  ;;  %v1607_v29 = vld [vmem:[#allocation9 + $0x238] sm:$0xff] }
 0x2a2   : > { %v1126_v31 = vmul.f32 1.442695, %v1123_v18 }
 0x2a3   : > { %2737 = vpow2.f32 %v1124_v21  ;;  %v1604_v21 = vld [vmem:[#allocation9 + $0x220] sm:$0xff] }
 0x2a4   : > { %2739 = vpow2.f32 %v1126_v31  ;;  %v1606_v31 = vld [vmem:[#allocation9 + $0x230] sm:$0xff] }
 0x2ad   : > { %v2738_v32 = vpop.eup %2737 }
 0x2ae   : > { %v1128_v33 = vadd.f32 1.0, %v2738_v32  ;;  %v2740_v34 = vpop.eup %2739  ;;  %v1609_v32 = vld [vmem:[#allocation9 + $0x248] sm:$0xff] }
 0x2af   : > { %v1129_v35 = vadd.f32 1.0, %v2740_v34  ;;  %v2507_v34 = vpack.c.bf16 %v1606_v31, %v1604_v21 }
 0x2b0   : > { %2741 = vrcp.f32 %v1128_v33  ;;  %v1611_v33 = vld [vmem:[#allocation9 + $0x258] sm:$0xff] }
 0x2b1   : > { %2743 = vrcp.f32 %v1129_v35  ;;  %v2509_v35 = vpack.c.bf16 %v1611_v33, %v1609_v32 }
 0x2ba   : > { %v2742_v52 = vpop.eup %2741 }
 0x2bb   : > { %v3292_v53 = vmul.f32 %v2742_v52, %v1118_v26  ;;  %v2744_v56 = vpop.eup %2743  ;;  %v2501_v26 = vpack.c.bf16 %v1603_v25, %v1601_v24  ;;  %v1616_v52 = vld [vmem:[#allocation9 + $0x280] sm:$0xff] }
 0x2bc   : > { %v3296_v61 = vmul.f32 %v2744_v56, %v1120_v28  ;;  %v1605_v28 = vld [vmem:[#allocation9 + $0x228] sm:$0xff]  ;;  %v1623_v56 = vld [vmem:[#allocation9 + $0x2b8] sm:$0xff]  ;;  %v2519_v57 = vpack.c.bf16 %v1618_v54, %v1616_v52  ;;  %v878_v25 = vld [vmem:[%s3469_s4] sm:$0x3]  ;;  %v1428_v52 = vsub.s32 7, %v3238_v41 }
 0x2bd   : > { %1299 = vrot.lane.b32.xlu1 %v3292_v53, %s2975_s11  ;;  %1296 = vrot.lane.b32.xlu0 %v3292_v53, %s2976_s14  ;;  %v2505_v18 = vpack.c.bf16 %v1607_v29, %v1605_v28  ;;  %v2521_v59 = vpack.c.bf16 %v1623_v56, %v1621_v55  ;;  %v883_v27 = vrot.slane %v878_v25, %v3241_v42 }
 0x2be   : > { %2502 = vmatprep.subr.bf16.mxu1 %v2501_v26  ;;  %v887_v28 = vrot.slane %v878_v25, %v3247_v8 }
 0x2bf   : > { %2504 = vmatpush1.bf16.msra.mxu1 %v2503_v30  ;;  %v3313_v29 = vadd.f32 %v3288_v19, %v883_v27 }
 0x2c0   : > { %2506 = vmatprep.subr.bf16.mxu1 %v2505_v18  ;;  %v3316_v30 = vadd.f32 %v3290_v23, %v887_v28 }
 0x2c1   : > { %1369 = vrot.lane.b32.xlu1 %v3296_v61, %s2976_s14  ;;  %1302 = vrot.lane.b32.xlu0 %v3292_v53, %s2977_s19  ;;  %v961_v18 = vsub.f32 0.0, %v3313_v29 }
 0x2c2   : > { %v962_v21 = vsub.f32 0.0, %v3316_v30 }
 0x2c3   : > { %2508 = vmatpush1.bf16.msra.mxu1 %v2507_v34  ;;  %v963_v33 = vmul.f32 1.442695, %v961_v18 }
 0x2c4   : > { %2510 = vmatprep.subr.bf16.mxu1 %v2509_v35  ;;  %v965_v34 = vmul.f32 1.442695, %v962_v21 }
 0x2c5   : > { %1375 = vrot.lane.b32.xlu1 %v3296_v61, %s2977_s19  ;;  %1372 = vrot.lane.b32.xlu0 %v3296_v61, %s2975_s11  ;;  %s338_s11 = scalar_lea.vmem [#allocation11], %s2037_s15 }
 0x2c6   : > { %s1928_s14 = sshll.u32 %s338_s11, 4  ;;  %s3423_s14 = int_to_ptr.vmem [resolvable:$true] %s1928_s14 }
 0x2c7   : > { %2512 = vmatpush1.bf16.msra.mxu1 %v2511_v40  ;;  %s2891_s15 = scalar_lea.vmem %s3423_s14, 256  ;;  %p2898_p12 = scmp.lt.s32.totalorder %s3423_s14, %s2896_s23 }
 0x2c8   : > { %2514 = vmatprep.subr.bf16.mxu1 %v2513_v45  ;;  %p2892_p10 = scmp.ne.s32.totalorder %s3423_s14, %s2891_s15  ;;  %p2899_p2 = scmp.lt.s32.totalorder %s2897_s10, %s2891_s15 }
 0x2ca   : > { %p2893_p3 = pnand %p2892_p10, %p3161_p5  ;;  %p2900_p1 = por %p2899_p2, %p2898_p12 }
 0x2cb   : > { %2516 = vmatpush1.bf16.msra.mxu1 %v2515_v50  ;;  %v1413_v50 = vsub.s32 6, %v3238_v41  ;;  %v1628_v41 = vld [vmem:[#allocation9 + $0x2e0] sm:$0xff] }
 0x2cc   : > { %2518 = vmatprep.subr.bf16.mxu1 %v2517_v51  ;;  %p2894_p7 = pneg %p2893_p3 }
 0x2ce   : > { %p2901_p4 = pnand %p2900_p1, %p2894_p7 }
 0x2cf   : > { %2520 = vmatpush1.bf16.msra.mxu1 %v2519_v57 }
 0x2d0   : > { %2522 = vmatprep.subr.bf16.mxu1 %v2521_v59 }
 0x2d3   : > { %2524 = vmatpush1.bf16.msra.mxu1 %v2523_v3 }
 0x2d4   : > { %2526 = vmatprep.subr.bf16.mxu1 %v2525_v5 }
 0x2d7   : > { %2528 = vmatpush1.bf16.msra.mxu1 %v2527_v11 }
 0x2d8   : > { %2530 = vmatprep.subr.bf16.mxu1 %v2529_v12 }
 0x2db   : > { %v1278_v58 = vpop.f32.mrb[4].mxu1 }
 0x2dc   : > { %v1280_v63 = vpop.f32.mrb[5].mxu1  ;;  %v1279_v17 = vadd.f32 %v1278_v58, %v1205_v14 }
 0x2dd   : > { %v1281_v20 = vadd.f32 %v1280_v63, %v1209_v15 }
 0x2de   : > { %v1283_v22 = vsub.f32 0.0, %v1279_v17 }
 0x2df   : > { %v1284_v24 = vsub.f32 0.0, %v1281_v20 }
 0x2e0   : > { %v1285_v44 = vmul.f32 1.442695, %v1283_v22 }
 0x2e1   : > { %v1287_v26 = vmul.f32 1.442695, %v1284_v24 }
 0x2e2   : > { %2745 = vpow2.f32 %v1285_v44 }
 0x2e3   : > { %2747 = vpow2.f32 %v1287_v26 }
 0x2e4   : > { %2749 = vpow2.f32 %v963_v33 }
 0x2e5   : > { %2751 = vpow2.f32 %v965_v34 }
 0x2ec   : > { %v2746_v31 = vpop.eup %2745 }
 0x2ed   : > { %v2748_v32 = vpop.eup %2747  ;;  %v1289_v35 = vadd.f32 1.0, %v2746_v31 }
 0x2ee   : > { %v1290_v36 = vadd.f32 1.0, %v2748_v32  ;;  %v2750_v37 = vpop.eup %2749 }
 0x2ef   : > { %2753 = vrcp.f32 %v1289_v35  ;;  %v2752_v19 = vpop.eup %2751  ;;  %v967_v23 = vadd.f32 1.0, %v2750_v37 }
 0x2f0   : > { %2755 = vrcp.f32 %v1290_v36  ;;  %v968_v40 = vadd.f32 1.0, %v2752_v19 }
 0x2f1   : > { %2757 = vrcp.f32 %v967_v23 }
 0x2f2   : > { %2759 = vrcp.f32 %v968_v40 }
 0x2f9   : > { %v2754_v38 = vpop.eup %2753 }
 0x2fa   : > { %v2756_v39 = vpop.eup %2755  ;;  %v3320_v45 = vmul.f32 %v2754_v38, %v1279_v17 }
 0x2fb   : > { %v3322_v46 = vmul.f32 %v2756_v39, %v1281_v20  ;;  %v2758_v32 = vpop.eup %2757 }
 0x2fc   : > { %v1314_v51 = vrot.slane %v3320_v45, %v3241_v42  ;;  %v1329_v55 = vrot.slane %v3320_v45, %v3247_v8  ;;  %v1344_v56 = vrot.slane %v3320_v45, %v3244_v43  ;;  %v1359_v57 = vrot.slane %v3320_v45, %v3255_v16  ;;  %v2760_v36 = vpop.eup %2759 }
 0x2fd   : > { %v1318_v54 = vrot.slane %v3322_v46, %v3241_v42  ;;  %v1333_v63 = vrot.slane %v3322_v46, %v3247_v8  ;;  %v1348_v1 = vrot.slane %v3322_v46, %v3244_v43  ;;  %v1363_v10 = vrot.slane %v3322_v46, %v3255_v16 }
 0x2fe   : > { %v1384_v43 = vrot.slane %v3320_v45, %v3266_v0  ;;  %v1399_v33 = vrot.slane %v3320_v45, %v3269_v4  ;;  %v1403_v34 = vrot.slane %v3322_v46, %v3269_v4 }
 0x32f   : > { %v1300_v47 = vpop.permute.xlu1 %1299  ;;  %v1297_v48 = vpop.permute.xlu0 %1296 }
 0x330   : > { %v1306_v49 = vsel %vm1305_vm0, %v3292_v53, %v1297_v48  ;;  %v1353_v58 = vsel %vm1305_vm0, %v1297_v48, %v1300_v47 }
 0x331   : > { %v1308_v60 = vsel %vm1307_vm1, %v1306_v49, %v1300_v47 }
 0x333   : > { %v1370_v59 = vpop.permute.xlu1 %1369  ;;  %v1303_v62 = vpop.permute.xlu0 %1302 }
 0x334   : > { %v1310_v2 = vsel %vm1309_vm2, %v1308_v60, %v1303_v62  ;;  %v1323_v3 = vsel %vm1305_vm0, %v1303_v62, %v3292_v53  ;;  %v1338_v5 = vsel %vm1305_vm0, %v1300_v47, %v1303_v62  ;;  %v1354_v6 = vsel %vm1307_vm1, %v1353_v58, %v1303_v62 }
 0x335   : > { %v1324_v7 = vsel %vm1307_vm1, %v1323_v3, %v1297_v48  ;;  %v1339_v9 = vsel %vm1307_vm1, %v1338_v5, %v3292_v53  ;;  %v1319_v11 = vmul.f32 %v1314_v51, %v1310_v2  ;;  %v1320_v12 = vmul.f32 %v1318_v54, %v1310_v2 }
 0x336   : > { %v1325_v13 = vsel %vm1309_vm2, %v1324_v7, %v1300_v47  ;;  %v1340_v14 = vsel %vm1309_vm2, %v1339_v9, %v1297_v48  ;;  %v1355_v20 = vsel %vm1309_vm2, %v1354_v6, %v3292_v53  ;;  %v1378_v24 = vsel %vm1305_vm0, %v3296_v61, %v1370_v59 }
 0x337   : > { %v1334_v15 = vmul.f32 %v1329_v55, %v1325_v13  ;;  %v1335_v17 = vmul.f32 %v1333_v63, %v1325_v13  ;;  %v1376_v22 = vpop.permute.xlu1 %1375  ;;  %v1373_v25 = vpop.permute.xlu0 %1372  ;;  %v1349_v16 = vmul.f32 %v1344_v56, %v1340_v14  ;;  %v1350_v44 = vmul.f32 %v1348_v1, %v1340_v14  ;;  %v1633_v14 = vld [vmem:[#allocation9 + $0x308] sm:$0xff] }
 0x338   : > { %v1393_v26 = vsel %vm1305_vm0, %v1376_v22, %v3296_v61  ;;  %v1379_v27 = vsel %vm1307_vm1, %v1378_v24, %v1373_v25  ;;  %v1388_v53 = vrot.slane %v3322_v46, %v3266_v0  ;;  %v1408_v35 = vsel %vm1305_vm0, %v1373_v25, %v1376_v22  ;;  %v1639_v24 = vld [vmem:[#allocation9 + $0x338] sm:$0xff] }
 0x339   : > { %v1336_v28 = vadd.f32 %v1334_v15, %v1319_v11  ;;  %v1337_v18 = vadd.f32 %v1335_v17, %v1320_v12  ;;  %v1394_v21 = vsel %vm1307_vm1, %v1393_v26, %v1370_v59  ;;  %v1380_v31 = vsel %vm1309_vm2, %v1379_v27, %v1376_v22  ;;  %v1635_v15 = vld [vmem:[#allocation9 + $0x318] sm:$0xff]  ;;  %v1641_v27 = vld [vmem:[#allocation9 + $0x348] sm:$0xff] }
 0x33a   : > { %v1364_v38 = vmul.f32 %v1359_v57, %v1355_v20  ;;  %v1365_v39 = vmul.f32 %v1363_v10, %v1355_v20  ;;  %v1389_v23 = vmul.f32 %v1384_v43, %v1380_v31  ;;  %v1395_v40 = vsel %vm1309_vm2, %v1394_v21, %v1373_v25  ;;  %v1634_v20 = vld [vmem:[#allocation9 + $0x310] sm:$0xff]  ;;  %v1640_v21 = vld [vmem:[#allocation9 + $0x340] sm:$0xff] }
 0x33b   : > { %v1351_v37 = vadd.f32 %v1349_v16, %v1336_v28  ;;  %v1352_v19 = vadd.f32 %v1350_v44, %v1337_v18  ;;  %v1409_v47 = vsel %vm1307_vm1, %v1408_v35, %v3296_v61  ;;  %v1423_v0 = vsel %vm1305_vm0, %v1370_v59, %v1373_v25  ;;  %v1636_v16 = vld [vmem:[#allocation9 + $0x320] sm:$0xff]  ;;  %v1638_v44 = vld [vmem:[#allocation9 + $0x330] sm:$0xff]  ;;  %v1643_v28 = vld [vmem:[#allocation9 + $0x358] sm:$0xff] }
 0x33c   : > { %v1390_v51 = vmul.f32 %v1388_v53, %v1380_v31  ;;  %v1424_v4 = vsel %vm1307_vm1, %v1423_v0, %v1376_v22  ;;  %v1410_v54 = vsel %vm1309_vm2, %v1409_v47, %v1370_v59  ;;  %v1414_v55 = vrot.slane %v3320_v45, %v1413_v50  ;;  %v1637_v22 = vld [vmem:[#allocation9 + $0x328] sm:$0xff]  ;;  %v1642_v31 = vld [vmem:[#allocation9 + $0x350] sm:$0xff]  ;;  %v1644_v35 = vld [vmem:[#allocation9 + $0x360] sm:$0xff] }
 0x33d   : > { %v1366_v48 = vadd.f32 %v1364_v38, %v1351_v37  ;;  %v1367_v49 = vadd.f32 %v1365_v39, %v1352_v19  ;;  %v1418_v56 = vrot.slane %v3322_v46, %v1413_v50  ;;  %v1404_v60 = vmul.f32 %v1399_v33, %v1395_v40  ;;  %v1645_v53 = vld [vmem:[#allocation9 + $0x368] sm:$0xff]  ;;  %v1647_v33 = vld [vmem:[#allocation9 + $0x378] sm:$0xff] }
 0x33e   : > { %v1405_v62 = vmul.f32 %v1403_v34, %v1395_v40  ;;  %v1425_v63 = vsel %vm1309_vm2, %v1424_v4, %v3296_v61  ;;  %v1429_v1 = vrot.slane %v3320_v45, %v1428_v52  ;;  %v1433_v2 = vrot.slane %v3322_v46, %v1428_v52  ;;  %v1630_v46 = vld [vmem:[#allocation9 + $0x2f0] sm:$0xff]  ;;  %v1649_v19 = vld [vmem:[#allocation9 + $0x388] sm:$0xff]  ;;  %v1651_v38 = vld [vmem:[#allocation9 + $0x398] sm:$0xff] }
 0x33f   : > { %v1391_v57 = vadd.f32 %v1389_v23, %v1366_v48  ;;  %v1392_v58 = vadd.f32 %v1390_v51, %v1367_v49  ;;  %v1419_v5 = vmul.f32 %v1414_v55, %v1410_v54  ;;  %v1420_v6 = vmul.f32 %v1418_v56, %v1410_v54  ;;  %v1648_v23 = vld [vmem:[#allocation9 + $0x380] sm:$0xff]  ;;  %v1650_v40 = vld [vmem:[#allocation9 + $0x390] sm:$0xff]  ;;  %v1653_v0 = vld [vmem:[#allocation9 + $0x3a8] sm:$0xff] }
 0x340   : > { %v1434_v7 = vmul.f32 %v1429_v1, %v1425_v63  ;;  %v1435_v10 = vmul.f32 %v1433_v2, %v1425_v63  ;;  %v971_v43 = vmul.f32 %v2758_v32, %v3313_v29  ;;  %v972_v61 = vmul.f32 %v2760_v36, %v3316_v30  ;;  %v1632_v29 = vld [vmem:[#allocation9 + $0x300] sm:$0xff]  ;;  %v1646_v36 = vld [vmem:[#allocation9 + $0x370] sm:$0xff]  ;;  %v1655_v48 = vld [vmem:[#allocation9 + $0x3b8] sm:$0xff] }
 0x341   : > { %v1406_v59 = vadd.f32 %v1404_v60, %v1391_v57  ;;  %v1407_v3 = vadd.f32 %v1405_v62, %v1392_v58  ;;  %v2531_v52 = vpack.c.bf16 %v1630_v46, %v1628_v41  ;;  %v2533_v17 = vpack.c.bf16 %v1635_v15, %v1633_v14  ;;  %v1652_v51 = vld [vmem:[#allocation9 + $0x3a0] sm:$0xff]  ;;  %v1654_v4 = vld [vmem:[#allocation9 + $0x3b0] sm:$0xff]  ;;  %v1657_v55 = vld [vmem:[#allocation9 + $0x3c8] sm:$0xff] }
 0x342   : > { %v2535_v30 = vpack.c.bf16 %v1634_v20, %v1632_v29  ;;  %v2537_v25 = vpack.c.bf16 %v1639_v24, %v1637_v22  ;;  %v2539_v26 = vpack.c.bf16 %v1638_v44, %v1636_v16  ;;  %v2541_v18 = vpack.c.bf16 %v1643_v28, %v1641_v27  ;;  %v1659_v56 = vld [vmem:[#allocation9 + $0x3d8] sm:$0xff]  ;;  %v1656_v58 = vld [vmem:[#allocation9 + $0x3c0] sm:$0xff]  ;;  %v1658_v60 = vld [vmem:[#allocation9 + $0x3d0] sm:$0xff] }
 0x343   : > { %v1421_v50 = vadd.f32 %v1419_v5, %v1406_v59  ;;  %v1422_v9 = vadd.f32 %v1420_v6, %v1407_v3  ;;  %2532 = vmatpush1.bf16.msra.mxu1 %v2531_v52  ;;  %v2543_v32 = vpack.c.bf16 %v1642_v31, %v1640_v21  ;;  %v2545_v34 = vpack.c.bf16 %v1647_v33, %v1645_v53  ;;  %v1661_v63 = vld [vmem:[#allocation9 + $0x3e8] sm:$0xff]  ;;  %v1663_v1 = vld [vmem:[#allocation9 + $0x3f8] sm:$0xff]  ;;  %v1660_v2 = vld [vmem:[#allocation9 + $0x3e0] sm:$0xff] }
 0x344   : > { %2534 = vmatprep.subr.bf16.mxu1 %v2533_v17  ;;  %v2547_v37 = vpack.c.bf16 %v1646_v36, %v1644_v35  ;;  %v2549_v39 = vpack.c.bf16 %v1651_v38, %v1649_v19  ;;  %v2551_v47 = vpack.c.bf16 %v1650_v40, %v1648_v23  ;;  %v2553_v49 = vpack.c.bf16 %v1655_v48, %v1653_v0  ;;  %v1662_v3 = vld [vmem:[#allocation9 + $0x3f0] sm:$0xff]  ;;  %v1762_v6 = vld [vmem:[#allocation9 + $0x408] sm:$0xff]  ;;  %v1765_v41 = vld [vmem:[#allocation9 + $0x420] sm:$0xff] }
 0x345   : > { %v1437_v11 = vadd.f32 %v1435_v10, %v1422_v9  ;;  %v1436_v12 = vadd.f32 %v1434_v7, %v1421_v50  ;;  %v2555_v54 = vpack.c.bf16 %v1654_v4, %v1652_v51  ;;  %v2557_v57 = vpack.c.bf16 %v1659_v56, %v1657_v55  ;;  %v1764_v50 = vld [vmem:[#allocation9 + $0x418] sm:$0xff]  ;;  %v1761_v7 = vld [vmem:[#allocation9 + $0x400] sm:$0xff]  ;;  %v1763_v10 = vld [vmem:[#allocation9 + $0x410] sm:$0xff] }
 0x346   : > { %v2559_v62 = vpack.c.bf16 %v1658_v60, %v1656_v58  ;;  %v2561_v59 = vpack.c.bf16 %v1663_v1, %v1661_v63  ;;  %v2563_v5 = vpack.c.bf16 %v1662_v3, %v1660_v2  ;;  %v2565_v9 = vpack.c.bf16 %v1764_v50, %v1762_v6  ;;  %v1767_v46 = vld [vmem:[#allocation9 + $0x430] sm:$0xff]  ;;  %v1770_v52 = vld [vmem:[#allocation9 + $0x448] sm:$0xff]  ;;  %v1772_v14 = vld [vmem:[#allocation9 + $0x458] sm:$0xff] }
 0x347   : > { %v3392_v13 = vmul.f32 %v1437_v11, %v972_v61  ;;  %v3394_v45 = vmul.f32 %v1436_v12, %v971_v43  ;;  %2536 = vmatpush1.bf16.msra.mxu1 %v2535_v30  ;;  %v1766_v43 = vld [vmem:[#allocation9 + $0x428] sm:$0xff]  ;;  %v1768_v61 = vld [vmem:[#allocation9 + $0x438] sm:$0xff]  ;;  %v2567_v11 = vpack.c.bf16 %v1763_v10, %v1761_v7  ;;  %v2571_v15 = vpack.c.bf16 %v1767_v46, %v1765_v41  ;;  %v1769_v29 = vld [vmem:[#allocation9 + $0x440] sm:$0xff] }
 0x348   : > { %2538 = vmatprep.subr.bf16.mxu1 %v2537_v25  ;;  %v2569_v12 = vpack.c.bf16 %v1768_v61, %v1766_v43  ;;  %2566 = vmatprep.subr.bf16.mxu0 %v2565_v9  ;;  %v2573_v17 = vpack.c.bf16 %v1772_v14, %v1770_v52  ;;  %v1771_v20 = vld [vmem:[#allocation9 + $0x450] sm:$0xff]  ;;  %v1774_v30 = vld [vmem:[#allocation9 + $0x468] sm:$0xff]  ;;  %v1776_v22 = vld [vmem:[#allocation9 + $0x478] sm:$0xff] }
 0x349   : > { %1580 = vmatprep.mubr.f32.mxu0 %v3392_v13  ;;  %v2575_v24 = vpack.c.bf16 %v1771_v20, %v1769_v29  ;;  %v2577_v25 = vpack.c.bf16 %v1776_v22, %v1774_v30  ;;  %v1773_v16 = vld [vmem:[#allocation9 + $0x460] sm:$0xff]  ;;  %v1775_v44 = vld [vmem:[#allocation9 + $0x470] sm:$0xff]  ;;  %v1780_v27 = vld [vmem:[#allocation9 + $0x498] sm:$0xff] }
 0x34a   : > { %1581 = vmatmul.mubr.f32.vlgmr.msra.gmra.mrb[6].mxu0 %v3394_v45  ;;  %v2579_v28 = vpack.c.bf16 %v1775_v44, %v1773_v16  ;;  %v1777_v21 = vld [vmem:[#allocation9 + $0x480] sm:$0xff]  ;;  %v1779_v31 = vld [vmem:[#allocation9 + $0x490] sm:$0xff]  ;;  %v1784_v53 = vld [vmem:[#allocation9 + $0x4b8] sm:$0xff] }
 0x34b   : > { %2540 = vmatpush1.bf16.msra.mxu1 %v2539_v26  ;;  %2568 = vmatpush1.bf16.msra.mxu0 %v2567_v11  ;;  %v1778_v26 = vld [vmem:[#allocation9 + $0x488] sm:$0xff]  ;;  %v2583_v33 = vpack.c.bf16 %v1779_v31, %v1777_v21  ;;  %v1781_v35 = vld [vmem:[#allocation9 + $0x4a0] sm:$0xff]  ;;  %v1783_v36 = vld [vmem:[#allocation9 + $0x4b0] sm:$0xff] }
 0x34c   : > { %2542 = vmatprep.subr.bf16.mxu1 %v2541_v18  ;;  %2570 = vmatprep.subr.bf16.mxu0 %v2569_v12  ;;  %v2581_v18 = vpack.c.bf16 %v1780_v27, %v1778_v26  ;;  %v1788_v19 = vld [vmem:[#allocation9 + $0x4d8] sm:$0xff]  ;;  %v2587_v38 = vpack.c.bf16 %v1783_v36, %v1781_v35  ;;  %v1785_v23 = vld [vmem:[#allocation9 + $0x4c0] sm:$0xff]  ;;  %v1787_v40 = vld [vmem:[#allocation9 + $0x4d0] sm:$0xff] }
 0x34d   : > { %v1792_v0 = vld [vmem:[#allocation9 + $0x4f8] sm:$0xff]  ;;  %v2591_v48 = vpack.c.bf16 %v1787_v40, %v1785_v23  ;;  %v1504_v51 = vld [vmem:[%s3471_s6] sm:$0x3]  ;;  %v1791_v43 = vld [vmem:[#allocation9 + $0x4f0] sm:$0xff] }
 0x34e   : > { %v1509_v4 = vrot.slane %v1504_v51, %v3241_v42  ;;  %v1789_v10 = vld [vmem:[#allocation9 + $0x4e0] sm:$0xff]  ;;  %v1794_v11 = vld [vmem:[#allocation9 + $0x508] sm:$0xff]  ;;  %v1796_v12 = vld [vmem:[#allocation9 + $0x518] sm:$0xff] }
 0x34f   : > { %2544 = vmatpush1.bf16.msra.mxu1 %v2543_v32  ;;  %2572 = vmatpush1.bf16.msra.mxu0 %v2571_v15  ;;  %v1782_v32 = vld [vmem:[#allocation9 + $0x4a8] sm:$0xff]  ;;  %v2595_v61 = vpack.c.bf16 %v1791_v43, %v1789_v10  ;;  %v2597_v41 = vpack.c.bf16 %v1796_v12, %v1794_v11  ;;  %v1793_v46 = vld [vmem:[#allocation9 + $0x500] sm:$0xff]  ;;  %v1795_v52 = vld [vmem:[#allocation9 + $0x510] sm:$0xff] }
 0x350   : > { %2546 = vmatprep.subr.bf16.mxu1 %v2545_v34  ;;  %2574 = vmatprep.subr.bf16.mxu0 %v2573_v17  ;;  %v2585_v34 = vpack.c.bf16 %v1784_v53, %v1782_v32  ;;  %v2599_v14 = vpack.c.bf16 %v1795_v52, %v1793_v46  ;;  %v1798_v15 = vld [vmem:[#allocation9 + $0x528] sm:$0xff]  ;;  %v1800_v17 = vld [vmem:[#allocation9 + $0x538] sm:$0xff]  ;;  %v1797_v20 = vld [vmem:[#allocation9 + $0x520] sm:$0xff] }
 0x351   : > { %v2601_v29 = vpack.c.bf16 %v1800_v17, %v1798_v15  ;;  %v1799_v30 = vld [vmem:[#allocation9 + $0x530] sm:$0xff]  ;;  %v1801_v44 = vld [vmem:[#allocation9 + $0x540] sm:$0xff] }
 0x352   : > { %v2603_v22 = vpack.c.bf16 %v1799_v30, %v1797_v20  ;;  %v1803_v26 = vld [vmem:[#allocation9 + $0x550] sm:$0xff]  ;;  %v1805_v31 = vld [vmem:[#allocation9 + $0x560] sm:$0xff] }
 0x353   : > { %2548 = vmatpush1.bf16.msra.mxu1 %v2547_v37  ;;  %2576 = vmatpush1.bf16.msra.mxu0 %v2575_v24  ;;  %v1786_v37 = vld [vmem:[#allocation9 + $0x4c8] sm:$0xff]  ;;  %v2607_v27 = vpack.c.bf16 %v1803_v26, %v1801_v44  ;;  %v1807_v32 = vld [vmem:[#allocation9 + $0x570] sm:$0xff]  ;;  %v1809_v36 = vld [vmem:[#allocation9 + $0x580] sm:$0xff] }
 0x354   : > { %2550 = vmatprep.subr.bf16.mxu1 %v2549_v39  ;;  %2578 = vmatprep.subr.bf16.mxu0 %v2577_v25  ;;  %v2589_v39 = vpack.c.bf16 %v1788_v19, %v1786_v37  ;;  %v1802_v24 = vld [vmem:[#allocation9 + $0x548] sm:$0xff]  ;;  %v1804_v25 = vld [vmem:[#allocation9 + $0x558] sm:$0xff]  ;;  %v2611_v53 = vpack.c.bf16 %v1807_v32, %v1805_v31  ;;  %v1811_v37 = vld [vmem:[#allocation9 + $0x590] sm:$0xff] }
 0x355   : > { %v2605_v16 = vpack.c.bf16 %v1804_v25, %v1802_v24  ;;  %v2615_v19 = vpack.c.bf16 %v1811_v37, %v1809_v36  ;;  %v1813_v40 = vld [vmem:[#allocation9 + $0x5a0] sm:$0xff] }
 0x356   : > { %v2045_v17 = vld [vmem:[%s3471_s6 + $0x4] sm:$0x3] }
 0x357   : > { %2552 = vmatpush1.bf16.msra.mxu1 %v2551_v47  ;;  %2580 = vmatpush1.bf16.msra.mxu0 %v2579_v28  ;;  %v1790_v47 = vld [vmem:[#allocation9 + $0x4e8] sm:$0xff]  ;;  %v1835_v20 = vrot.slane %v2045_v17, %v3247_v8 }
 0x358   : > { %2554 = vmatprep.subr.bf16.mxu1 %v2553_v49  ;;  %2582 = vmatprep.subr.bf16.mxu0 %v2581_v18  ;;  %v2593_v49 = vpack.c.bf16 %v1792_v0, %v1790_v47  ;;  %v1806_v28 = vld [vmem:[#allocation9 + $0x568] sm:$0xff]  ;;  %v1808_v18 = vld [vmem:[#allocation9 + $0x578] sm:$0xff]  ;;  %v1815_v47 = vld [vmem:[#allocation9 + $0x5b0] sm:$0xff] }
 0x359   : > { %v2609_v21 = vpack.c.bf16 %v1808_v18, %v1806_v28  ;;  %v2619_v0 = vpack.c.bf16 %v1815_v47, %v1813_v40 }
 0x35b   : > { %2556 = vmatpush1.bf16.msra.mxu1 %v2555_v54  ;;  %2584 = vmatpush1.bf16.msra.mxu0 %v2583_v33  ;;  %v1513_v54 = vrot.slane %v1504_v51, %v3247_v8  ;;  %v1810_v33 = vld [vmem:[#allocation9 + $0x588] sm:$0xff] }
 0x35c   : > { %2558 = vmatprep.subr.bf16.mxu1 %v2557_v57  ;;  %2586 = vmatprep.subr.bf16.mxu0 %v2585_v34  ;;  %v1812_v34 = vld [vmem:[#allocation9 + $0x598] sm:$0xff] }
 0x35d   : > { %v2613_v35 = vpack.c.bf16 %v1812_v34, %v1810_v33 }
 0x35f   : > { %2560 = vmatpush1.bf16.msra.mxu1 %v2559_v62  ;;  %2588 = vmatpush1.bf16.msra.mxu0 %v2587_v38  ;;  %v1814_v38 = vld [vmem:[#allocation9 + $0x5a8] sm:$0xff] }
 0x360   : > { %2562 = vmatprep.subr.bf16.mxu1 %v2561_v59  ;;  %2590 = vmatprep.subr.bf16.mxu0 %v2589_v39  ;;  %v1816_v39 = vld [vmem:[#allocation9 + $0x5b8] sm:$0xff] }
 0x361   : > { %v2617_v23 = vpack.c.bf16 %v1816_v39, %v1814_v38 }
 0x363   : > { %2564 = vmatpush1.bf16.msra.mxu1 %v2563_v5  ;;  %2592 = vmatpush1.bf16.msra.mxu0 %v2591_v48  ;;  %v1818_v48 = vld [vmem:[#allocation9 + $0x5c8] sm:$0xff] }
 0x364   : > { %2594 = vmatprep.subr.bf16.mxu0 %v2593_v49  ;;  %v1820_v49 = vld [vmem:[#allocation9 + $0x5d8] sm:$0xff] }
 0x365   : > { %v2621_v51 = vpack.c.bf16 %v1820_v49, %v1818_v48 }
 0x367   : > { %2596 = vmatpush1.bf16.msra.mxu0 %v2595_v61 }
 0x368   : > { %2598 = vmatprep.subr.bf16.mxu0 %v2597_v41 }
 0x36b   : > { %2600 = vmatpush1.bf16.msra.mxu0 %v2599_v14 }
 0x36c   : > { %2602 = vmatprep.subr.bf16.mxu0 %v2601_v29  ;;  %v1831_v29 = vrot.slane %v2045_v17, %v3241_v42 }
 0x36f   : > { %2604 = vmatpush1.bf16.msra.mxu0 %v2603_v22 }
 0x370   : > { %2606 = vmatprep.subr.bf16.mxu0 %v2605_v16 }
 0x373   : > { %2608 = vmatpush1.bf16.msra.mxu0 %v2607_v27 }
 0x374   : > { %2610 = vmatprep.subr.bf16.mxu0 %v2609_v21 }
 0x377   : > { %2612 = vmatpush1.bf16.msra.mxu0 %v2611_v53 }
 0x378   : > { %2614 = vmatprep.subr.bf16.mxu0 %v2613_v35 }
 0x37b   : > { %2616 = vmatpush1.bf16.msra.mxu0 %v2615_v19 }
 0x37c   : > { %2618 = vmatprep.subr.bf16.mxu0 %v2617_v23 }
 0x37f   : > { %2620 = vmatpush1.bf16.msra.mxu0 %v2619_v0 }
 0x380   : > { %2622 = vmatprep.subr.bf16.mxu0 %v2621_v51 }
 0x41d   : > { %v1582_v55 = vpop.f32.mrb[6].mxu0 }
 0x41e   : > { %v1583_v56 = vadd.f32 %v1582_v55, %v1509_v4  ;;  %v1584_v57 = vpop.f32.mrb[7].mxu0  ;;  %v1817_v4 = vld [vmem:[#allocation9 + $0x5c0] sm:$0xff] }
 0x41f   : > { %v1585_v58 = vadd.f32 %v1584_v57, %v1513_v54  ;;  %v1819_v54 = vld [vmem:[#allocation9 + $0x5d0] sm:$0xff]  ;;  %v1824_v57 = vld [vmem:[#allocation9 + $0x5f8] sm:$0xff] }
 0x420   : > { %v1587_v60 = vsub.f32 0.0, %v1583_v56  ;;  %v2623_v55 = vpack.c.bf16 %v1819_v54, %v1817_v4 }
 0x421   : > { %v1588_v62 = vsub.f32 0.0, %v1585_v58 }
 0x422   : > { %v1589_v63 = vmul.f32 1.442695, %v1587_v60  ;;  %2624 = vmatpush1.bf16.msra.mxu0 %v2623_v55 }
 0x423   : > { %v1591_v1 = vmul.f32 1.442695, %v1588_v62  ;;  %v1823_v62 = vld [vmem:[#allocation9 + $0x5f0] sm:$0xff] }
 0x424   : > { %2761 = vpow2.f32 %v1589_v63 }
 0x425   : > { %2763 = vpow2.f32 %v1591_v1  ;;  %v2044_v1 = vld [vmem:[%s3471_s6 + $0x2] sm:$0x3] }
 0x42e   : > { %v2762_v2 = vpop.eup %2761 }
 0x42f   : > { %v2764_v59 = vpop.eup %2763  ;;  %v1593_v3 = vadd.f32 1.0, %v2762_v2  ;;  %v1670_v2 = vrot.slane %v2044_v1, %v3241_v42 }
 0x430   : > { %v1594_v5 = vadd.f32 1.0, %v2764_v59  ;;  %v1674_v59 = vrot.slane %v2044_v1, %v3247_v8 }
 0x431   : > { %2765 = vrcp.f32 %v1593_v3 }
 0x432   : > { %2767 = vrcp.f32 %v1594_v5 }
 0x43b   : > { %v2766_v6 = vpop.eup %2765 }
 0x43c   : > { %v2768_v50 = vpop.eup %2767  ;;  %v1597_v9 = vmul.f32 %v2766_v6, %v1583_v56  ;;  %v1822_v56 = vld [vmem:[#allocation9 + $0x5e8] sm:$0xff] }
 0x43d   : > { %v1598_v7 = vmul.f32 %v2768_v50, %v1585_v58  ;;  %v1821_v58 = vld [vmem:[#allocation9 + $0x5e0] sm:$0xff]  ;;  %v2625_v60 = vpack.c.bf16 %v1824_v57, %v1822_v56 }
 0x43e   : > { %v2627_v63 = vpack.c.bf16 %v1823_v62, %v1821_v58 }
 0x43f   : > { %1741 = vmatprep.mubr.f32.mxu1 %v1598_v7  ;;  %2626 = vmatprep.subr.bf16.mxu0 %v2625_v60 }
 0x440   : > { %1742 = vmatmul.mubr.f32.vlgmr.msra.gmra.mrb[6].mxu1 %v1597_v9  ;;  %2628 = vmatpush1.bf16.msra.mxu0 %v2627_v63 }
 0x513   : > { %v1743_v3 = vpop.f32.mrb[6].mxu1 }
 0x514   : > { %v1744_v5 = vadd.f32 %v1743_v3, %v1670_v2  ;;  %v1745_v6 = vpop.f32.mrb[7].mxu1 }
 0x515   : > { %v1746_v50 = vadd.f32 %v1745_v6, %v1674_v59 }
 0x516   : > { %v1748_v7 = vsub.f32 0.0, %v1744_v5 }
 0x517   : > { %v1749_v9 = vsub.f32 0.0, %v1746_v50 }
 0x518   : > { %v1750_v10 = vmul.f32 1.442695, %v1748_v7 }
 0x519   : > { %v1752_v43 = vmul.f32 1.442695, %v1749_v9 }
 0x51a   : > { %2769 = vpow2.f32 %v1750_v10 }
 0x51b   : > { %2771 = vpow2.f32 %v1752_v43 }
 0x524   : > { %v2770_v61 = vpop.eup %2769 }
 0x525   : > { %v2772_v11 = vpop.eup %2771  ;;  %v1754_v12 = vadd.f32 1.0, %v2770_v61 }
 0x526   : > { %v1755_v41 = vadd.f32 1.0, %v2772_v11 }
 0x527   : > { %2773 = vrcp.f32 %v1754_v12 }
 0x528   : > { %2775 = vrcp.f32 %v1755_v41 }
 0x531   : > { %v2774_v46 = vpop.eup %2773 }
 0x532   : > { %v2776_v52 = vpop.eup %2775  ;;  %v1758_v15 = vmul.f32 %v2774_v46, %v1744_v5 }
 0x533   : > { %v1759_v14 = vmul.f32 %v2776_v52, %v1746_v50 }
 0x535   : > { %1902 = vmatprep.mubr.f32.mxu0 %v1759_v14 }
 0x536   : > { %1903 = vmatmul.mubr.f32.vlgmr.msra.gmra.mrb[8].mxu0 %v1758_v15 }
 0x609   : > { %v1904_v30 = vpop.f32.mrb[8].mxu0 }
 0x60a   : > { %v1905_v22 = vadd.f32 %v1904_v30, %v1831_v29  ;;  %v1906_v24 = vpop.f32.mrb[9].mxu0 }
 0x60b   : > { %v1907_v25 = vadd.f32 %v1906_v24, %v1835_v20 }
 0x60c   : > { %v1909_v16 = vadd.f32 %v1905_v22, %v3394_v45 }
 0x60d   : > { %v1910_v44 = vadd.f32 %v1907_v25, %v3392_v13 }
 0x60e   : > { %1911 = vst [vmem:[%s338_s11] sm:$0xff] %v1909_v16 }
 0x60f   : > { %1912 = vst [vmem:[%s338_s11 + $0x8] sm:$0xff] %v1910_v44 }
 0x610   : > { %2904 = shalt.err (!%p2901_p4)
}
 0x611   : > { %s2905_s13 = scalar_lea.hbm %s3421_s16, 256  ;;  %s2909_s30 = scalar_lea.hbm %s3472_s7, 512 }
 0x612   : > { %p2906_p0 = scmp.ne.s32.totalorder %s3421_s16, %s2905_s13  ;;  %p2910_p8 = scmp.lt.u32.totalorder %s3421_s16, %s3472_s7 }
 0x613   : > { %p2911_p13 = scmp.lt.u32.totalorder %s2909_s30, %s2905_s13  ;;  %p2913_p10 = scmp.lt.u32.totalorder %s2905_s13, %s3421_s16 }
 0x614   : > { %p2907_p9 = pnand %p2906_p0, %p3161_p5 }
 0x615   : > { %p2912_p6 = por %p2911_p13, %p2910_p8 }
 0x616   : > { %p2908_p11 = pneg %p2907_p9 }
 0x617   : > { %p2914_p3 = por %p2913_p10, %p2912_p6 }
 0x619   : > { %p2915_p7 = pnand %p2914_p3, %p2908_p11 }
 0x61b   : > { %2918 = shalt.err (!%p2915_p7)
}
 0x61c   : > { %2643 = dma.vmem_to_hbm [thread:$0]  (%p3161_p5), %s3423_s14, 256, %s3421_s16, %s1914_s28  }
 0x61d PF: > { %s3494_s17 = sld [smem:[#allocation16_spill]]  ;;  %s1940_s11 = sand.u32 1, %s2953_s24  }
 0x61e   : > { %p3496_p2 = scmp.ge.s32.totalorder %s2965_s27, 2  ;;  %s1941_s19 = scalar_lea.sflag [#allocation5], %s1940_s11 }
 0x623   : > { %p3495_p12 = scmp.ne.s32.totalorder %s3494_s17, 0 }
 0x625   : > { %p2660_p1 = pnand %p3496_p2, %p3495_p12 }
 0x627   : > { %2948 = dma.done.wait (!%p2660_p1), %s1941_s19, 256  }
 0x628   : > { %2950 = vsyncadd (!%p2660_p1), %s1941_s19, 4294967040  ;;  %p22_p4 = scmp.ge.s32.totalorder %s3129_s18, 4   ;;  %s3497_s24 = smov %s2957_s25 }
 0x629   : > { %s3498_s25 = smov %s2961_s26  ;;  %s3499_s26 = smov %s3157_s12 }
 0x62a   : > { %s3500_s27 = smov %s3129_s18  ;;  %24 = sbr.rel (!%p22_p4) target bundleno = 9 (0x9), region = 113 }
 0x631   :  { %1946 = vsyncpa [#allocation4], 1 }
 0x632   :  { %1948 = vsyncpa [#allocation4 + $0x1], 1 }
 0x633   :  { %1949 = vsyncpa [#allocation7], 1 }
 0x634   :  { %1950 = vsyncpa [#allocation10], 1 }
 0x635   :  { %1951 = vsyncpa [#allocation5], 1 }
 0x636   :  { %1953 = vsyncpa [#allocation5 + $0x1], 1 }

</bundles_post_ra>
